<compile_context>
chip_gen: v7x
topology: tpu7x:2x2x1
jax: 0.10.0
libtpu: 0.0.40
codegen_flags: <defaults>
</compile_context>

<pallas_src>
import math

import jax
import jax.numpy as jnp
from jax.experimental import pallas as pl
from jax.experimental.pallas import tpu as pltpu


# ---------------------------------------------------------------------------
# Pallas kernel
# ---------------------------------------------------------------------------
def _build_conv_kernel(Wp):
    """3x3 conv over a row-flattened, zero-padded NHWC input.

    x_ref : (1, (H+3)*Wp, Cin)  bf16; Wp = W+2; padding is 1 top / 2 bottom /
                                1 left / 1 right, then (H, W) flattened.
    w_ref : (9, Cin, Cout)      bf16 tap-major HWIO weights
    b_ref : (1, Cout)           f32 bias
    a_ref*: (1, H*Wp, Cout)     f32 pre-computed addends (fused band sums)
    o_ref : (1, H*Wp, Cout)     f32 output; columns w in [W, Wp) are garbage
                                and are dropped by the wrapper.
    """
    def kernel(x_ref, w_ref, b_ref, *rest):
        add_refs, o_ref = rest[:-1], rest[-1]
        M, Cout = o_ref.shape[1], o_ref.shape[2]
        acc = jnp.zeros((M, Cout), jnp.float32)
        # 9 taps -> 9 (M, Cin) x (Cin, Cout) MXU matmuls, single f32 accumulator.
        for dy in range(3):
            for dx in range(3):
                off = dy * Wp + dx                      # static shifted window
                acc += jnp.dot(x_ref[0, off:off + M, :], w_ref[dy * 3 + dx],
                               preferred_element_type=jnp.float32)
        acc += b_ref[...]                               # bias once, f32
        for a_ref in add_refs:                          # fused band sum, f32
            acc += a_ref[0]
        o_ref[0] = acc.astype(o_ref.dtype)
    return kernel


# ---------------------------------------------------------------------------
# Pallas wrapper: fused 3x3 conv (+ optional fused additions)
# ---------------------------------------------------------------------------
def conv3x3_fused(x_nhwc, w_hwio, b, addends=()):
    """3x3 conv, stride 1, padding 1: (B,H,W,Cin) -> (B,H,W,Cout), f32 output.

    `addends` are optional (B,H,W,Cout) tensors added to the conv result
    inside the kernel (fuses the band sum into the conv's output store)."""
    B, H, W, Cin = x_nhwc.shape
    Cout = w_hwio.shape[-1]
    Wp, Hp = W + 2, H + 3            # extra bottom row keeps all 9 shifted
    M = H * Wp                       # windows of length H*Wp in bounds
    xf = jnp.pad(x_nhwc, ((0, 0), (1, 2), (1, 1), (0, 0))
                 ).astype(jnp.bfloat16).reshape(B, Hp * Wp, Cin)
    w9 = w_hwio.astype(jnp.bfloat16).reshape(9, Cin, Cout)
    b2 = b.astype(jnp.float32).reshape(1, Cout)
    adds = [jnp.pad(a, ((0, 0), (0, 0), (0, 2), (0, 0))
                    ).astype(jnp.float32).reshape(B, M, Cout) for a in addends]

    out_flat = pl.pallas_call(
        _build_conv_kernel(Wp),
        out_shape=jax.ShapeDtypeStruct((B, M, Cout), jnp.float32),
        grid_spec=pltpu.PrefetchScalarGridSpec(
            num_scalar_prefetch=0,
            grid=(B,),
            in_specs=[
                pl.BlockSpec((1, Hp * Wp, Cin), lambda bi: (bi, 0, 0)),
                pl.BlockSpec((9, Cin, Cout), lambda bi: (0, 0, 0)),   # resident
                pl.BlockSpec((1, Cout), lambda bi: (0, 0)),           # resident
            ] + [pl.BlockSpec((1, M, Cout), lambda bi: (bi, 0, 0))
                 for _ in adds],
            out_specs=pl.BlockSpec((1, M, Cout), lambda bi: (bi, 0, 0)),
        ),
        compiler_params=pltpu.CompilerParams(
            dimension_semantics=("parallel",),
            vmem_limit_bytes=32 * 1024 * 1024),
    )(xf, w9, b2, *adds)
    # drop the 2 garbage columns per output row: (B, H*Wp, C) -> (B, H, W, C)
    return out_flat.reshape(B, H, Wp, Cout)[:, :, :W, :]


# ---------------------------------------------------------------------------
# Resampling glue (NHWC) — matches nn.AvgPool2d(k,k) / nn.Upsample(nearest)
# ---------------------------------------------------------------------------
def avg_pool(x, k):
    B, H, W, C = x.shape
    return x.reshape(B, H // k, k, W // k, k, C).mean(axis=(2, 4))


def upsample_nearest(x, k):
    return jnp.repeat(jnp.repeat(x, k, axis=1), k, axis=2)


# ---------------------------------------------------------------------------
# Parameter init (mirrors the PyTorch __init__: normal(0, sqrt(2/(3*3*Cout))),
# bias = 0), deterministic.
# ---------------------------------------------------------------------------
def init_conv_params(key, cin, cout):
    n = 3 * 3 * cout
    w_oihw = jax.random.normal(key, (cout, cin, 3, 3), jnp.float32) * math.sqrt(2.0 / n)
    w_hwio = jnp.transpose(w_oihw, (2, 3, 1, 0))     # (3,3,Cin,Cout)
    b = jnp.zeros((cout,), jnp.float32)
    return w_hwio, b


def init_eoct_params(key, in_channels, num_channels):
    in_h, in_l, in_ll = in_channels
    num_high, num_low, num_ll = num_channels
    ks = jax.random.split(key, 9)
    return {
        "conv1": init_conv_params(ks[0], in_h, num_high),   # h  -> h
        "conv2": init_conv_params(ks[1], in_h, num_low),    # h  -> l
        "conv3": init_conv_params(ks[2], in_h, num_ll),     # h  -> ll
        "conv4": init_conv_params(ks[3], in_l, num_low),    # l  -> l
        "conv5": init_conv_params(ks[4], in_l, num_high),   # l  -> h
        "conv6": init_conv_params(ks[5], in_l, num_ll),     # l  -> ll
        "conv7": init_conv_params(ks[6], in_ll, num_ll),    # ll -> ll
        "conv8": init_conv_params(ks[7], in_ll, num_high),  # ll -> h
        "conv9": init_conv_params(ks[8], in_ll, num_low),   # ll -> l
    }


# ---------------------------------------------------------------------------
# Forward pass: 3-band input, 3-band output, stride=1 (full EoctConv path).
# Inputs/outputs are NCHW to match PyTorch semantics.
# ---------------------------------------------------------------------------
def eoct_conv_forward(params, data_h, data_l, data_ll):
    to_nhwc = lambda x: jnp.transpose(x, (0, 2, 3, 1))
    to_nchw = lambda x: jnp.transpose(x, (0, 3, 1, 2))
    xh, xl, xll = map(to_nhwc, (data_h, data_l, data_ll))
    num_high = params["conv1"][0].shape[-1]

    # cross-band contributions whose conv outputs get nearest-upsampled
    l2h = conv3x3_fused(xl, *params["conv5"])                 # (B,H/2,W/2,high)
    # conv8 & conv9 share input xll -> one kernel with Cout concatenated
    w89 = jnp.concatenate([params["conv8"][0], params["conv9"][0]], axis=-1)
    b89 = jnp.concatenate([params["conv8"][1], params["conv9"][1]], axis=-1)
    ll2hl = conv3x3_fused(xll, w89, b89)                      # (B,H/4,W/4,high+low)
    ll2h, ll2l = ll2hl[..., :num_high], ll2hl[..., num_high:]

    # high band: conv1(xh) + up2(conv5(xl)) + up4(conv8(xll)); sums fused
    out_h = conv3x3_fused(xh, *params["conv1"],
                          addends=(upsample_nearest(l2h, 2),
                                   upsample_nearest(ll2h, 4)))

    # low band: conv2(pool2(xh)) + conv4(xl) fused via Cin concat, + up2(conv9)
    x_l = jnp.concatenate([avg_pool(xh, 2), xl], axis=-1)
    w_l = jnp.concatenate([params["conv2"][0], params["conv4"][0]], axis=2)
    b_l = params["conv2"][1] + params["conv4"][1]
    out_l = conv3x3_fused(x_l, w_l, b_l,
                          addends=(upsample_nearest(ll2l, 2),))

    # lowest band: conv3(pool4(xh)) + conv6(pool2(xl)) + conv7(xll) -> ONE conv
    x_ll = jnp.concatenate([avg_pool(xh, 4), avg_pool(xl, 2), xll], axis=-1)
    w_ll = jnp.concatenate([params["conv3"][0], params["conv6"][0],
                            params["conv7"][0]], axis=2)
    b_ll = params["conv3"][1] + params["conv6"][1] + params["conv7"][1]
    out_ll = conv3x3_fused(x_ll, w_ll, b_ll)

    return to_nchw(out_h), to_nchw(out_l), to_nchw(out_ll)


# ---------------------------------------------------------------------------
# Pure-JAX reference (mirrors the PyTorch graph; same bf16 matmul inputs)
# ---------------------------------------------------------------------------
def _conv_ref(x_nhwc, w_hwio, b):
    y = jax.lax.conv_general_dilated(
        x_nhwc.astype(jnp.bfloat16), w_hwio.astype(jnp.bfloat16),
        window_strides=(1, 1), padding="SAME",
        dimension_numbers=("NHWC", "HWIO", "NHWC"),
        preferred_element_type=jnp.float32)
    return y + b.reshape(1, 1, 1, -1)


def eoct_conv_reference(params, data_h, data_l, data_ll):
    to_nhwc = lambda x: jnp.transpose(x, (0, 2, 3, 1))
    to_nchw = lambda x: jnp.transpose(x, (0, 3, 1, 2))
    xh, xl, xll = map(to_nhwc, (data_h, data_l, data_ll))
    h2h = _conv_ref(xh, *params["conv1"])
    h2l = _conv_ref(avg_pool(xh, 2), *params["conv2"])
    h2ll = _conv_ref(avg_pool(xh, 4), *params["conv3"])
    l2l = _conv_ref(xl, *params["conv4"])
    l2h = upsample_nearest(_conv_ref(xl, *params["conv5"]), 2)
    l2ll = _conv_ref(avg_pool(xl, 2), *params["conv6"])
    ll2ll = _conv_ref(xll, *params["conv7"])
    ll2h = upsample_nearest(_conv_ref(xll, *params["conv8"]), 4)
    ll2l = upsample_nearest(_conv_ref(xll, *params["conv9"]), 2)
    return (to_nchw(h2h + l2h + ll2h),
            to_nchw(h2l + l2l + ll2l),
            to_nchw(h2ll + l2ll + ll2ll))


# ---------------------------------------------------------------------------
if __name__ == "__main__":
    key = jax.random.PRNGKey(0)
    k_par, k_h, k_l, k_ll = jax.random.split(key, 4)

    B, H, W = 2, 16, 16
    in_channels = (4, 4, 4)          # (in_h, in_l, in_ll)
    num_channels = (8, 4, 4)         # (num_high, num_low, num_ll)

    params = init_eoct_params(k_par, in_channels, num_channels)

    data_h = jax.random.normal(k_h, (B, in_channels[0], H, W), jnp.float32)
    data_l = jax.random.normal(k_l, (B, in_channels[1], H // 2, W // 2), jnp.float32)
    data_ll = jax.random.normal(k_ll, (B, in_channels[2], H // 4, W // 4), jnp.float32)

    fwd = jax.jit(eoct_conv_forward)
    out = fwd(params, data_h, data_l, data_ll)
    out = jax.block_until_ready(out)

    # sanity check against a pure-JAX reference with matching numerics
    ref = eoct_conv_reference(params, data_h, data_l, data_ll)
    for o, r in zip(out, ref):
        assert o.shape == r.shape
        assert jnp.allclose(o, r, rtol=1e-3, atol=1e-3), \
            f"mismatch: max abs err = {jnp.max(jnp.abs(o - r))}"

    print("KERNEL_OK")
</pallas_src>

<mosaic_0001>
module attributes {stable_mosaic.version = 11 : i64} {
  func.func @kernel(%arg0: i32, %arg1: memref<1x42x4xbf16, #tpu.memory_space<vmem>>, %arg2: memref<9x4x12xbf16, #tpu.memory_space<vmem>>, %arg3: memref<1x12xf32, #tpu.memory_space<vmem>>, %arg4: memref<1x24x12xf32, #tpu.memory_space<vmem>>) attributes {dimension_semantics = [#tpu.dimension_semantics<parallel>], iteration_bounds = array<i64: 2>, scalar_prefetch = 0 : i64, scratch_operands = 0 : i64, tpu.core_type = #tpu.core_type<tc>, window_params = [{transform_indices = @transform_0, window_bounds = array<i64: 1, 42, 4>}, {pipeline_mode = #tpu.pipeline_mode<synchronous>, transform_indices = @transform_1, window_bounds = array<i64: 9, 4, 12>}, {pipeline_mode = #tpu.pipeline_mode<synchronous>, transform_indices = @transform_2, window_bounds = array<i64: 1, 12>}, {transform_indices = @transform_3, window_bounds = array<i64: 1, 24, 12>}]} {
    %cst = arith.constant 0.000000e+00 : f32
    %0 = vector.broadcast %cst : f32 to vector<24x12xf32>
    %c0 = arith.constant 0 : index
    %c0_0 = arith.constant 0 : index
    %c0_1 = arith.constant 0 : index
    %1 = vector.load %arg1[%c0, %c0_0, %c0_1] : memref<1x42x4xbf16, #tpu.memory_space<vmem>>, vector<1x24x4xbf16>
    %2 = vector.shape_cast %1 : vector<1x24x4xbf16> to vector<24x4xbf16>
    %c0_2 = arith.constant 0 : index
    %c0_3 = arith.constant 0 : index
    %c0_4 = arith.constant 0 : index
    %3 = vector.load %arg2[%c0_2, %c0_3, %c0_4] : memref<9x4x12xbf16, #tpu.memory_space<vmem>>, vector<1x4x12xbf16>
    %4 = vector.shape_cast %3 : vector<1x4x12xbf16> to vector<4x12xbf16>
    %cst_5 = arith.constant dense<0.000000e+00> : vector<24x12xf32>
    %5 = tpu.matmul %2, %4, %cst_5 {dimension_numbers = #tpu.dot_dimension_numbers<[1], [0], [0], [1], [0, 0, 1, 1], [], []>} : vector<24x4xbf16>, vector<4x12xbf16>, vector<24x12xf32> -> vector<24x12xf32>
    %6 = arith.addf %0, %5 : vector<24x12xf32>
    %c0_6 = arith.constant 0 : index
    %c1 = arith.constant 1 : index
    %c0_7 = arith.constant 0 : index
    %7 = vector.load %arg1[%c0_6, %c1, %c0_7] : memref<1x42x4xbf16, #tpu.memory_space<vmem>>, vector<1x24x4xbf16>
    %8 = vector.shape_cast %7 : vector<1x24x4xbf16> to vector<24x4xbf16>
    %c1_8 = arith.constant 1 : index
    %c0_9 = arith.constant 0 : index
    %c0_10 = arith.constant 0 : index
    %9 = vector.load %arg2[%c1_8, %c0_9, %c0_10] : memref<9x4x12xbf16, #tpu.memory_space<vmem>>, vector<1x4x12xbf16>
    %10 = vector.shape_cast %9 : vector<1x4x12xbf16> to vector<4x12xbf16>
    %cst_11 = arith.constant dense<0.000000e+00> : vector<24x12xf32>
    %11 = tpu.matmul %8, %10, %cst_11 {dimension_numbers = #tpu.dot_dimension_numbers<[1], [0], [0], [1], [0, 0, 1, 1], [], []>} : vector<24x4xbf16>, vector<4x12xbf16>, vector<24x12xf32> -> vector<24x12xf32>
    %12 = arith.addf %6, %11 : vector<24x12xf32>
    %c0_12 = arith.constant 0 : index
    %c2 = arith.constant 2 : index
    %c0_13 = arith.constant 0 : index
    %13 = vector.load %arg1[%c0_12, %c2, %c0_13] : memref<1x42x4xbf16, #tpu.memory_space<vmem>>, vector<1x24x4xbf16>
    %14 = vector.shape_cast %13 : vector<1x24x4xbf16> to vector<24x4xbf16>
    %c2_14 = arith.constant 2 : index
    %c0_15 = arith.constant 0 : index
    %c0_16 = arith.constant 0 : index
    %15 = vector.load %arg2[%c2_14, %c0_15, %c0_16] : memref<9x4x12xbf16, #tpu.memory_space<vmem>>, vector<1x4x12xbf16>
    %16 = vector.shape_cast %15 : vector<1x4x12xbf16> to vector<4x12xbf16>
    %cst_17 = arith.constant dense<0.000000e+00> : vector<24x12xf32>
    %17 = tpu.matmul %14, %16, %cst_17 {dimension_numbers = #tpu.dot_dimension_numbers<[1], [0], [0], [1], [0, 0, 1, 1], [], []>} : vector<24x4xbf16>, vector<4x12xbf16>, vector<24x12xf32> -> vector<24x12xf32>
    %18 = arith.addf %12, %17 : vector<24x12xf32>
    %c0_18 = arith.constant 0 : index
    %c6 = arith.constant 6 : index
    %c0_19 = arith.constant 0 : index
    %19 = vector.load %arg1[%c0_18, %c6, %c0_19] : memref<1x42x4xbf16, #tpu.memory_space<vmem>>, vector<1x24x4xbf16>
    %20 = vector.shape_cast %19 : vector<1x24x4xbf16> to vector<24x4xbf16>
    %c3 = arith.constant 3 : index
    %c0_20 = arith.constant 0 : index
    %c0_21 = arith.constant 0 : index
    %21 = vector.load %arg2[%c3, %c0_20, %c0_21] : memref<9x4x12xbf16, #tpu.memory_space<vmem>>, vector<1x4x12xbf16>
    %22 = vector.shape_cast %21 : vector<1x4x12xbf16> to vector<4x12xbf16>
    %cst_22 = arith.constant dense<0.000000e+00> : vector<24x12xf32>
    %23 = tpu.matmul %20, %22, %cst_22 {dimension_numbers = #tpu.dot_dimension_numbers<[1], [0], [0], [1], [0, 0, 1, 1], [], []>} : vector<24x4xbf16>, vector<4x12xbf16>, vector<24x12xf32> -> vector<24x12xf32>
    %24 = arith.addf %18, %23 : vector<24x12xf32>
    %c0_23 = arith.constant 0 : index
    %c7 = arith.constant 7 : index
    %c0_24 = arith.constant 0 : index
    %25 = vector.load %arg1[%c0_23, %c7, %c0_24] : memref<1x42x4xbf16, #tpu.memory_space<vmem>>, vector<1x24x4xbf16>
    %26 = vector.shape_cast %25 : vector<1x24x4xbf16> to vector<24x4xbf16>
    %c4 = arith.constant 4 : index
    %c0_25 = arith.constant 0 : index
    %c0_26 = arith.constant 0 : index
    %27 = vector.load %arg2[%c4, %c0_25, %c0_26] : memref<9x4x12xbf16, #tpu.memory_space<vmem>>, vector<1x4x12xbf16>
    %28 = vector.shape_cast %27 : vector<1x4x12xbf16> to vector<4x12xbf16>
    %cst_27 = arith.constant dense<0.000000e+00> : vector<24x12xf32>
    %29 = tpu.matmul %26, %28, %cst_27 {dimension_numbers = #tpu.dot_dimension_numbers<[1], [0], [0], [1], [0, 0, 1, 1], [], []>} : vector<24x4xbf16>, vector<4x12xbf16>, vector<24x12xf32> -> vector<24x12xf32>
    %30 = arith.addf %24, %29 : vector<24x12xf32>
    %c0_28 = arith.constant 0 : index
    %c8 = arith.constant 8 : index
    %c0_29 = arith.constant 0 : index
    %31 = vector.load %arg1[%c0_28, %c8, %c0_29] : memref<1x42x4xbf16, #tpu.memory_space<vmem>>, vector<1x24x4xbf16>
    %32 = vector.shape_cast %31 : vector<1x24x4xbf16> to vector<24x4xbf16>
    %c5 = arith.constant 5 : index
    %c0_30 = arith.constant 0 : index
    %c0_31 = arith.constant 0 : index
    %33 = vector.load %arg2[%c5, %c0_30, %c0_31] : memref<9x4x12xbf16, #tpu.memory_space<vmem>>, vector<1x4x12xbf16>
    %34 = vector.shape_cast %33 : vector<1x4x12xbf16> to vector<4x12xbf16>
    %cst_32 = arith.constant dense<0.000000e+00> : vector<24x12xf32>
    %35 = tpu.matmul %32, %34, %cst_32 {dimension_numbers = #tpu.dot_dimension_numbers<[1], [0], [0], [1], [0, 0, 1, 1], [], []>} : vector<24x4xbf16>, vector<4x12xbf16>, vector<24x12xf32> -> vector<24x12xf32>
    %36 = arith.addf %30, %35 : vector<24x12xf32>
    %c0_33 = arith.constant 0 : index
    %c12 = arith.constant 12 : index
    %c0_34 = arith.constant 0 : index
    %37 = vector.load %arg1[%c0_33, %c12, %c0_34] : memref<1x42x4xbf16, #tpu.memory_space<vmem>>, vector<1x24x4xbf16>
    %38 = vector.shape_cast %37 : vector<1x24x4xbf16> to vector<24x4xbf16>
    %c6_35 = arith.constant 6 : index
    %c0_36 = arith.constant 0 : index
    %c0_37 = arith.constant 0 : index
    %39 = vector.load %arg2[%c6_35, %c0_36, %c0_37] : memref<9x4x12xbf16, #tpu.memory_space<vmem>>, vector<1x4x12xbf16>
    %40 = vector.shape_cast %39 : vector<1x4x12xbf16> to vector<4x12xbf16>
    %cst_38 = arith.constant dense<0.000000e+00> : vector<24x12xf32>
    %41 = tpu.matmul %38, %40, %cst_38 {dimension_numbers = #tpu.dot_dimension_numbers<[1], [0], [0], [1], [0, 0, 1, 1], [], []>} : vector<24x4xbf16>, vector<4x12xbf16>, vector<24x12xf32> -> vector<24x12xf32>
    %42 = arith.addf %36, %41 : vector<24x12xf32>
    %c0_39 = arith.constant 0 : index
    %c13 = arith.constant 13 : index
    %c0_40 = arith.constant 0 : index
    %43 = vector.load %arg1[%c0_39, %c13, %c0_40] : memref<1x42x4xbf16, #tpu.memory_space<vmem>>, vector<1x24x4xbf16>
    %44 = vector.shape_cast %43 : vector<1x24x4xbf16> to vector<24x4xbf16>
    %c7_41 = arith.constant 7 : index
    %c0_42 = arith.constant 0 : index
    %c0_43 = arith.constant 0 : index
    %45 = vector.load %arg2[%c7_41, %c0_42, %c0_43] : memref<9x4x12xbf16, #tpu.memory_space<vmem>>, vector<1x4x12xbf16>
    %46 = vector.shape_cast %45 : vector<1x4x12xbf16> to vector<4x12xbf16>
    %cst_44 = arith.constant dense<0.000000e+00> : vector<24x12xf32>
    %47 = tpu.matmul %44, %46, %cst_44 {dimension_numbers = #tpu.dot_dimension_numbers<[1], [0], [0], [1], [0, 0, 1, 1], [], []>} : vector<24x4xbf16>, vector<4x12xbf16>, vector<24x12xf32> -> vector<24x12xf32>
    %48 = arith.addf %42, %47 : vector<24x12xf32>
    %c0_45 = arith.constant 0 : index
    %c14 = arith.constant 14 : index
    %c0_46 = arith.constant 0 : index
    %49 = vector.load %arg1[%c0_45, %c14, %c0_46] : memref<1x42x4xbf16, #tpu.memory_space<vmem>>, vector<1x24x4xbf16>
    %50 = vector.shape_cast %49 : vector<1x24x4xbf16> to vector<24x4xbf16>
    %c8_47 = arith.constant 8 : index
    %c0_48 = arith.constant 0 : index
    %c0_49 = arith.constant 0 : index
    %51 = vector.load %arg2[%c8_47, %c0_48, %c0_49] : memref<9x4x12xbf16, #tpu.memory_space<vmem>>, vector<1x4x12xbf16>
    %52 = vector.shape_cast %51 : vector<1x4x12xbf16> to vector<4x12xbf16>
    %cst_50 = arith.constant dense<0.000000e+00> : vector<24x12xf32>
    %53 = tpu.matmul %50, %52, %cst_50 {dimension_numbers = #tpu.dot_dimension_numbers<[1], [0], [0], [1], [0, 0, 1, 1], [], []>} : vector<24x4xbf16>, vector<4x12xbf16>, vector<24x12xf32> -> vector<24x12xf32>
    %54 = arith.addf %48, %53 : vector<24x12xf32>
    %c0_51 = arith.constant 0 : index
    %c0_52 = arith.constant 0 : index
    %55 = vector.load %arg3[%c0_51, %c0_52] : memref<1x12xf32, #tpu.memory_space<vmem>>, vector<1x12xf32>
    %56 = vector.broadcast %55 : vector<1x12xf32> to vector<24x12xf32>
    %57 = arith.addf %54, %56 : vector<24x12xf32>
    %c0_53 = arith.constant 0 : index
    %c0_54 = arith.constant 0 : index
    %c0_55 = arith.constant 0 : index
    %58 = vector.load %arg4[%c0_53, %c0_54, %c0_55] : memref<1x24x12xf32, #tpu.memory_space<vmem>>, vector<1x24x12xf32>
    %59 = vector.shape_cast %58 : vector<1x24x12xf32> to vector<24x12xf32>
    %60 = vector.shape_cast %57 : vector<24x12xf32> to vector<1x24x12xf32>
    tpu.vector_store %arg4[%c0_53, %c0_54, %c0_55], %60 {strides = array<i32>} : memref<1x24x12xf32, #tpu.memory_space<vmem>>, vector<1x24x12xf32>,
    return
  }
  func.func @transform_0(%arg0: i32) -> (i32, i32, i32) {
    %c0_i32 = arith.constant 0 : i32
    %c0_i32_0 = arith.constant 0 : i32
    %c0_i32_1 = arith.constant 0 : i32
    return %arg0, %c0_i32, %c0_i32_0 : i32, i32, i32
  }
  func.func @transform_1(%arg0: i32) -> (i32, i32, i32) {
    %c0_i32 = arith.constant 0 : i32
    %c0_i32_0 = arith.constant 0 : i32
    %c0_i32_1 = arith.constant 0 : i32
    %c0_i32_2 = arith.constant 0 : i32
    return %c0_i32, %c0_i32_0, %c0_i32_1 : i32, i32, i32
  }
  func.func @transform_2(%arg0: i32) -> (i32, i32) {
    %c0_i32 = arith.constant 0 : i32
    %c0_i32_0 = arith.constant 0 : i32
    %c0_i32_1 = arith.constant 0 : i32
    return %c0_i32, %c0_i32_0 : i32, i32
  }
  func.func @transform_3(%arg0: i32) -> (i32, i32, i32) {
    %c0_i32 = arith.constant 0 : i32
    %c0_i32_0 = arith.constant 0 : i32
    %c0_i32_1 = arith.constant 0 : i32
    return %arg0, %c0_i32, %c0_i32_0 : i32, i32, i32
  }
}

module attributes {stable_mosaic.version = 11 : i64} {
  func.func @kernel(%arg0: i32, %arg1: memref<1x110x4xbf16, #tpu.memory_space<vmem>>, %arg2: memref<9x4x8xbf16, #tpu.memory_space<vmem>>, %arg3: memref<1x8xf32, #tpu.memory_space<vmem>>, %arg4: memref<1x80x8xf32, #tpu.memory_space<vmem>>) attributes {dimension_semantics = [#tpu.dimension_semantics<parallel>], iteration_bounds = array<i64: 2>, scalar_prefetch = 0 : i64, scratch_operands = 0 : i64, tpu.core_type = #tpu.core_type<tc>, window_params = [{transform_indices = @transform_0, window_bounds = array<i64: 1, 110, 4>}, {pipeline_mode = #tpu.pipeline_mode<synchronous>, transform_indices = @transform_1, window_bounds = array<i64: 9, 4, 8>}, {pipeline_mode = #tpu.pipeline_mode<synchronous>, transform_indices = @transform_2, window_bounds = array<i64: 1, 8>}, {transform_indices = @transform_3, window_bounds = array<i64: 1, 80, 8>}]} {
    %cst = arith.constant 0.000000e+00 : f32
    %0 = vector.broadcast %cst : f32 to vector<80x8xf32>
    %c0 = arith.constant 0 : index
    %c0_0 = arith.constant 0 : index
    %c0_1 = arith.constant 0 : index
    %1 = vector.load %arg1[%c0, %c0_0, %c0_1] : memref<1x110x4xbf16, #tpu.memory_space<vmem>>, vector<1x80x4xbf16>
    %2 = vector.shape_cast %1 : vector<1x80x4xbf16> to vector<80x4xbf16>
    %c0_2 = arith.constant 0 : index
    %c0_3 = arith.constant 0 : index
    %c0_4 = arith.constant 0 : index
    %3 = vector.load %arg2[%c0_2, %c0_3, %c0_4] : memref<9x4x8xbf16, #tpu.memory_space<vmem>>, vector<1x4x8xbf16>
    %4 = vector.shape_cast %3 : vector<1x4x8xbf16> to vector<4x8xbf16>
    %cst_5 = arith.constant dense<0.000000e+00> : vector<80x8xf32>
    %5 = tpu.matmul %2, %4, %cst_5 {dimension_numbers = #tpu.dot_dimension_numbers<[1], [0], [0], [1], [0, 0, 1, 1], [], []>} : vector<80x4xbf16>, vector<4x8xbf16>, vector<80x8xf32> -> vector<80x8xf32>
    %6 = arith.addf %0, %5 : vector<80x8xf32>
    %c0_6 = arith.constant 0 : index
    %c1 = arith.constant 1 : index
    %c0_7 = arith.constant 0 : index
    %7 = vector.load %arg1[%c0_6, %c1, %c0_7] : memref<1x110x4xbf16, #tpu.memory_space<vmem>>, vector<1x80x4xbf16>
    %8 = vector.shape_cast %7 : vector<1x80x4xbf16> to vector<80x4xbf16>
    %c1_8 = arith.constant 1 : index
    %c0_9 = arith.constant 0 : index
    %c0_10 = arith.constant 0 : index
    %9 = vector.load %arg2[%c1_8, %c0_9, %c0_10] : memref<9x4x8xbf16, #tpu.memory_space<vmem>>, vector<1x4x8xbf16>
    %10 = vector.shape_cast %9 : vector<1x4x8xbf16> to vector<4x8xbf16>
    %cst_11 = arith.constant dense<0.000000e+00> : vector<80x8xf32>
    %11 = tpu.matmul %8, %10, %cst_11 {dimension_numbers = #tpu.dot_dimension_numbers<[1], [0], [0], [1], [0, 0, 1, 1], [], []>} : vector<80x4xbf16>, vector<4x8xbf16>, vector<80x8xf32> -> vector<80x8xf32>
    %12 = arith.addf %6, %11 : vector<80x8xf32>
    %c0_12 = arith.constant 0 : index
    %c2 = arith.constant 2 : index
    %c0_13 = arith.constant 0 : index
    %13 = vector.load %arg1[%c0_12, %c2, %c0_13] : memref<1x110x4xbf16, #tpu.memory_space<vmem>>, vector<1x80x4xbf16>
    %14 = vector.shape_cast %13 : vector<1x80x4xbf16> to vector<80x4xbf16>
    %c2_14 = arith.constant 2 : index
    %c0_15 = arith.constant 0 : index
    %c0_16 = arith.constant 0 : index
    %15 = vector.load %arg2[%c2_14, %c0_15, %c0_16] : memref<9x4x8xbf16, #tpu.memory_space<vmem>>, vector<1x4x8xbf16>
    %16 = vector.shape_cast %15 : vector<1x4x8xbf16> to vector<4x8xbf16>
    %cst_17 = arith.constant dense<0.000000e+00> : vector<80x8xf32>
    %17 = tpu.matmul %14, %16, %cst_17 {dimension_numbers = #tpu.dot_dimension_numbers<[1], [0], [0], [1], [0, 0, 1, 1], [], []>} : vector<80x4xbf16>, vector<4x8xbf16>, vector<80x8xf32> -> vector<80x8xf32>
    %18 = arith.addf %12, %17 : vector<80x8xf32>
    %c0_18 = arith.constant 0 : index
    %c10 = arith.constant 10 : index
    %c0_19 = arith.constant 0 : index
    %19 = vector.load %arg1[%c0_18, %c10, %c0_19] : memref<1x110x4xbf16, #tpu.memory_space<vmem>>, vector<1x80x4xbf16>
    %20 = vector.shape_cast %19 : vector<1x80x4xbf16> to vector<80x4xbf16>
    %c3 = arith.constant 3 : index
    %c0_20 = arith.constant 0 : index
    %c0_21 = arith.constant 0 : index
    %21 = vector.load %arg2[%c3, %c0_20, %c0_21] : memref<9x4x8xbf16, #tpu.memory_space<vmem>>, vector<1x4x8xbf16>
    %22 = vector.shape_cast %21 : vector<1x4x8xbf16> to vector<4x8xbf16>
    %cst_22 = arith.constant dense<0.000000e+00> : vector<80x8xf32>
    %23 = tpu.matmul %20, %22, %cst_22 {dimension_numbers = #tpu.dot_dimension_numbers<[1], [0], [0], [1], [0, 0, 1, 1], [], []>} : vector<80x4xbf16>, vector<4x8xbf16>, vector<80x8xf32> -> vector<80x8xf32>
    %24 = arith.addf %18, %23 : vector<80x8xf32>
    %c0_23 = arith.constant 0 : index
    %c11 = arith.constant 11 : index
    %c0_24 = arith.constant 0 : index
    %25 = vector.load %arg1[%c0_23, %c11, %c0_24] : memref<1x110x4xbf16, #tpu.memory_space<vmem>>, vector<1x80x4xbf16>
    %26 = vector.shape_cast %25 : vector<1x80x4xbf16> to vector<80x4xbf16>
    %c4 = arith.constant 4 : index
    %c0_25 = arith.constant 0 : index
    %c0_26 = arith.constant 0 : index
    %27 = vector.load %arg2[%c4, %c0_25, %c0_26] : memref<9x4x8xbf16, #tpu.memory_space<vmem>>, vector<1x4x8xbf16>
    %28 = vector.shape_cast %27 : vector<1x4x8xbf16> to vector<4x8xbf16>
    %cst_27 = arith.constant dense<0.000000e+00> : vector<80x8xf32>
    %29 = tpu.matmul %26, %28, %cst_27 {dimension_numbers = #tpu.dot_dimension_numbers<[1], [0], [0], [1], [0, 0, 1, 1], [], []>} : vector<80x4xbf16>, vector<4x8xbf16>, vector<80x8xf32> -> vector<80x8xf32>
    %30 = arith.addf %24, %29 : vector<80x8xf32>
    %c0_28 = arith.constant 0 : index
    %c12 = arith.constant 12 : index
    %c0_29 = arith.constant 0 : index
    %31 = vector.load %arg1[%c0_28, %c12, %c0_29] : memref<1x110x4xbf16, #tpu.memory_space<vmem>>, vector<1x80x4xbf16>
    %32 = vector.shape_cast %31 : vector<1x80x4xbf16> to vector<80x4xbf16>
    %c5 = arith.constant 5 : index
    %c0_30 = arith.constant 0 : index
    %c0_31 = arith.constant 0 : index
    %33 = vector.load %arg2[%c5, %c0_30, %c0_31] : memref<9x4x8xbf16, #tpu.memory_space<vmem>>, vector<1x4x8xbf16>
    %34 = vector.shape_cast %33 : vector<1x4x8xbf16> to vector<4x8xbf16>
    %cst_32 = arith.constant dense<0.000000e+00> : vector<80x8xf32>
    %35 = tpu.matmul %32, %34, %cst_32 {dimension_numbers = #tpu.dot_dimension_numbers<[1], [0], [0], [1], [0, 0, 1, 1], [], []>} : vector<80x4xbf16>, vector<4x8xbf16>, vector<80x8xf32> -> vector<80x8xf32>
    %36 = arith.addf %30, %35 : vector<80x8xf32>
    %c0_33 = arith.constant 0 : index
    %c20 = arith.constant 20 : index
    %c0_34 = arith.constant 0 : index
    %37 = vector.load %arg1[%c0_33, %c20, %c0_34] : memref<1x110x4xbf16, #tpu.memory_space<vmem>>, vector<1x80x4xbf16>
    %38 = vector.shape_cast %37 : vector<1x80x4xbf16> to vector<80x4xbf16>
    %c6 = arith.constant 6 : index
    %c0_35 = arith.constant 0 : index
    %c0_36 = arith.constant 0 : index
    %39 = vector.load %arg2[%c6, %c0_35, %c0_36] : memref<9x4x8xbf16, #tpu.memory_space<vmem>>, vector<1x4x8xbf16>
    %40 = vector.shape_cast %39 : vector<1x4x8xbf16> to vector<4x8xbf16>
    %cst_37 = arith.constant dense<0.000000e+00> : vector<80x8xf32>
    %41 = tpu.matmul %38, %40, %cst_37 {dimension_numbers = #tpu.dot_dimension_numbers<[1], [0], [0], [1], [0, 0, 1, 1], [], []>} : vector<80x4xbf16>, vector<4x8xbf16>, vector<80x8xf32> -> vector<80x8xf32>
    %42 = arith.addf %36, %41 : vector<80x8xf32>
    %c0_38 = arith.constant 0 : index
    %c21 = arith.constant 21 : index
    %c0_39 = arith.constant 0 : index
    %43 = vector.load %arg1[%c0_38, %c21, %c0_39] : memref<1x110x4xbf16, #tpu.memory_space<vmem>>, vector<1x80x4xbf16>
    %44 = vector.shape_cast %43 : vector<1x80x4xbf16> to vector<80x4xbf16>
    %c7 = arith.constant 7 : index
    %c0_40 = arith.constant 0 : index
    %c0_41 = arith.constant 0 : index
    %45 = vector.load %arg2[%c7, %c0_40, %c0_41] : memref<9x4x8xbf16, #tpu.memory_space<vmem>>, vector<1x4x8xbf16>
    %46 = vector.shape_cast %45 : vector<1x4x8xbf16> to vector<4x8xbf16>
    %cst_42 = arith.constant dense<0.000000e+00> : vector<80x8xf32>
    %47 = tpu.matmul %44, %46, %cst_42 {dimension_numbers = #tpu.dot_dimension_numbers<[1], [0], [0], [1], [0, 0, 1, 1], [], []>} : vector<80x4xbf16>, vector<4x8xbf16>, vector<80x8xf32> -> vector<80x8xf32>
    %48 = arith.addf %42, %47 : vector<80x8xf32>
    %c0_43 = arith.constant 0 : index
    %c22 = arith.constant 22 : index
    %c0_44 = arith.constant 0 : index
    %49 = vector.load %arg1[%c0_43, %c22, %c0_44] : memref<1x110x4xbf16, #tpu.memory_space<vmem>>, vector<1x80x4xbf16>
    %50 = vector.shape_cast %49 : vector<1x80x4xbf16> to vector<80x4xbf16>
    %c8 = arith.constant 8 : index
    %c0_45 = arith.constant 0 : index
    %c0_46 = arith.constant 0 : index
    %51 = vector.load %arg2[%c8, %c0_45, %c0_46] : memref<9x4x8xbf16, #tpu.memory_space<vmem>>, vector<1x4x8xbf16>
    %52 = vector.shape_cast %51 : vector<1x4x8xbf16> to vector<4x8xbf16>
    %cst_47 = arith.constant dense<0.000000e+00> : vector<80x8xf32>
    %53 = tpu.matmul %50, %52, %cst_47 {dimension_numbers = #tpu.dot_dimension_numbers<[1], [0], [0], [1], [0, 0, 1, 1], [], []>} : vector<80x4xbf16>, vector<4x8xbf16>, vector<80x8xf32> -> vector<80x8xf32>
    %54 = arith.addf %48, %53 : vector<80x8xf32>
    %c0_48 = arith.constant 0 : index
    %c0_49 = arith.constant 0 : index
    %55 = vector.load %arg3[%c0_48, %c0_49] : memref<1x8xf32, #tpu.memory_space<vmem>>, vector<1x8xf32>
    %56 = vector.broadcast %55 : vector<1x8xf32> to vector<80x8xf32>
    %57 = arith.addf %54, %56 : vector<80x8xf32>
    %c0_50 = arith.constant 0 : index
    %c0_51 = arith.constant 0 : index
    %c0_52 = arith.constant 0 : index
    %58 = vector.load %arg4[%c0_50, %c0_51, %c0_52] : memref<1x80x8xf32, #tpu.memory_space<vmem>>, vector<1x80x8xf32>
    %59 = vector.shape_cast %58 : vector<1x80x8xf32> to vector<80x8xf32>
    %60 = vector.shape_cast %57 : vector<80x8xf32> to vector<1x80x8xf32>
    tpu.vector_store %arg4[%c0_50, %c0_51, %c0_52], %60 {strides = array<i32>} : memref<1x80x8xf32, #tpu.memory_space<vmem>>, vector<1x80x8xf32>,
    return
  }
  func.func @transform_0(%arg0: i32) -> (i32, i32, i32) {
    %c0_i32 = arith.constant 0 : i32
    %c0_i32_0 = arith.constant 0 : i32
    %c0_i32_1 = arith.constant 0 : i32
    return %arg0, %c0_i32, %c0_i32_0 : i32, i32, i32
  }
  func.func @transform_1(%arg0: i32) -> (i32, i32, i32) {
    %c0_i32 = arith.constant 0 : i32
    %c0_i32_0 = arith.constant 0 : i32
    %c0_i32_1 = arith.constant 0 : i32
    %c0_i32_2 = arith.constant 0 : i32
    return %c0_i32, %c0_i32_0, %c0_i32_1 : i32, i32, i32
  }
  func.func @transform_2(%arg0: i32) -> (i32, i32) {
    %c0_i32 = arith.constant 0 : i32
    %c0_i32_0 = arith.constant 0 : i32
    %c0_i32_1 = arith.constant 0 : i32
    return %c0_i32, %c0_i32_0 : i32, i32
  }
  func.func @transform_3(%arg0: i32) -> (i32, i32, i32) {
    %c0_i32 = arith.constant 0 : i32
    %c0_i32_0 = arith.constant 0 : i32
    %c0_i32_1 = arith.constant 0 : i32
    return %arg0, %c0_i32, %c0_i32_0 : i32, i32, i32
  }
}

module attributes {stable_mosaic.version = 11 : i64} {
  func.func @kernel(%arg0: i32, %arg1: memref<1x110x8xbf16, #tpu.memory_space<vmem>>, %arg2: memref<9x8x4xbf16, #tpu.memory_space<vmem>>, %arg3: memref<1x4xf32, #tpu.memory_space<vmem>>, %arg4: memref<1x80x4xf32, #tpu.memory_space<vmem>>, %arg5: memref<1x80x4xf32, #tpu.memory_space<vmem>>) attributes {dimension_semantics = [#tpu.dimension_semantics<parallel>], iteration_bounds = array<i64: 2>, scalar_prefetch = 0 : i64, scratch_operands = 0 : i64, tpu.core_type = #tpu.core_type<tc>, window_params = [{transform_indices = @transform_0, window_bounds = array<i64: 1, 110, 8>}, {pipeline_mode = #tpu.pipeline_mode<synchronous>, transform_indices = @transform_1, window_bounds = array<i64: 9, 8, 4>}, {pipeline_mode = #tpu.pipeline_mode<synchronous>, transform_indices = @transform_2, window_bounds = array<i64: 1, 4>}, {transform_indices = @transform_3, window_bounds = array<i64: 1, 80, 4>}, {transform_indices = @transform_4, window_bounds = array<i64: 1, 80, 4>}]} {
    %cst = arith.constant 0.000000e+00 : f32
    %0 = vector.broadcast %cst : f32 to vector<80x4xf32>
    %c0 = arith.constant 0 : index
    %c0_0 = arith.constant 0 : index
    %c0_1 = arith.constant 0 : index
    %1 = vector.load %arg1[%c0, %c0_0, %c0_1] : memref<1x110x8xbf16, #tpu.memory_space<vmem>>, vector<1x80x8xbf16>
    %2 = vector.shape_cast %1 : vector<1x80x8xbf16> to vector<80x8xbf16>
    %c0_2 = arith.constant 0 : index
    %c0_3 = arith.constant 0 : index
    %c0_4 = arith.constant 0 : index
    %3 = vector.load %arg2[%c0_2, %c0_3, %c0_4] : memref<9x8x4xbf16, #tpu.memory_space<vmem>>, vector<1x8x4xbf16>
    %4 = vector.shape_cast %3 : vector<1x8x4xbf16> to vector<8x4xbf16>
    %cst_5 = arith.constant dense<0.000000e+00> : vector<80x4xf32>
    %5 = tpu.matmul %2, %4, %cst_5 {dimension_numbers = #tpu.dot_dimension_numbers<[1], [0], [0], [1], [0, 0, 1, 1], [], []>} : vector<80x8xbf16>, vector<8x4xbf16>, vector<80x4xf32> -> vector<80x4xf32>
    %6 = arith.addf %0, %5 : vector<80x4xf32>
    %c0_6 = arith.constant 0 : index
    %c1 = arith.constant 1 : index
    %c0_7 = arith.constant 0 : index
    %7 = vector.load %arg1[%c0_6, %c1, %c0_7] : memref<1x110x8xbf16, #tpu.memory_space<vmem>>, vector<1x80x8xbf16>
    %8 = vector.shape_cast %7 : vector<1x80x8xbf16> to vector<80x8xbf16>
    %c1_8 = arith.constant 1 : index
    %c0_9 = arith.constant 0 : index
    %c0_10 = arith.constant 0 : index
    %9 = vector.load %arg2[%c1_8, %c0_9, %c0_10] : memref<9x8x4xbf16, #tpu.memory_space<vmem>>, vector<1x8x4xbf16>
    %10 = vector.shape_cast %9 : vector<1x8x4xbf16> to vector<8x4xbf16>
    %cst_11 = arith.constant dense<0.000000e+00> : vector<80x4xf32>
    %11 = tpu.matmul %8, %10, %cst_11 {dimension_numbers = #tpu.dot_dimension_numbers<[1], [0], [0], [1], [0, 0, 1, 1], [], []>} : vector<80x8xbf16>, vector<8x4xbf16>, vector<80x4xf32> -> vector<80x4xf32>
    %12 = arith.addf %6, %11 : vector<80x4xf32>
    %c0_12 = arith.constant 0 : index
    %c2 = arith.constant 2 : index
    %c0_13 = arith.constant 0 : index
    %13 = vector.load %arg1[%c0_12, %c2, %c0_13] : memref<1x110x8xbf16, #tpu.memory_space<vmem>>, vector<1x80x8xbf16>
    %14 = vector.shape_cast %13 : vector<1x80x8xbf16> to vector<80x8xbf16>
    %c2_14 = arith.constant 2 : index
    %c0_15 = arith.constant 0 : index
    %c0_16 = arith.constant 0 : index
    %15 = vector.load %arg2[%c2_14, %c0_15, %c0_16] : memref<9x8x4xbf16, #tpu.memory_space<vmem>>, vector<1x8x4xbf16>
    %16 = vector.shape_cast %15 : vector<1x8x4xbf16> to vector<8x4xbf16>
    %cst_17 = arith.constant dense<0.000000e+00> : vector<80x4xf32>
    %17 = tpu.matmul %14, %16, %cst_17 {dimension_numbers = #tpu.dot_dimension_numbers<[1], [0], [0], [1], [0, 0, 1, 1], [], []>} : vector<80x8xbf16>, vector<8x4xbf16>, vector<80x4xf32> -> vector<80x4xf32>
    %18 = arith.addf %12, %17 : vector<80x4xf32>
    %c0_18 = arith.constant 0 : index
    %c10 = arith.constant 10 : index
    %c0_19 = arith.constant 0 : index
    %19 = vector.load %arg1[%c0_18, %c10, %c0_19] : memref<1x110x8xbf16, #tpu.memory_space<vmem>>, vector<1x80x8xbf16>
    %20 = vector.shape_cast %19 : vector<1x80x8xbf16> to vector<80x8xbf16>
    %c3 = arith.constant 3 : index
    %c0_20 = arith.constant 0 : index
    %c0_21 = arith.constant 0 : index
    %21 = vector.load %arg2[%c3, %c0_20, %c0_21] : memref<9x8x4xbf16, #tpu.memory_space<vmem>>, vector<1x8x4xbf16>
    %22 = vector.shape_cast %21 : vector<1x8x4xbf16> to vector<8x4xbf16>
    %cst_22 = arith.constant dense<0.000000e+00> : vector<80x4xf32>
    %23 = tpu.matmul %20, %22, %cst_22 {dimension_numbers = #tpu.dot_dimension_numbers<[1], [0], [0], [1], [0, 0, 1, 1], [], []>} : vector<80x8xbf16>, vector<8x4xbf16>, vector<80x4xf32> -> vector<80x4xf32>
    %24 = arith.addf %18, %23 : vector<80x4xf32>
    %c0_23 = arith.constant 0 : index
    %c11 = arith.constant 11 : index
    %c0_24 = arith.constant 0 : index
    %25 = vector.load %arg1[%c0_23, %c11, %c0_24] : memref<1x110x8xbf16, #tpu.memory_space<vmem>>, vector<1x80x8xbf16>
    %26 = vector.shape_cast %25 : vector<1x80x8xbf16> to vector<80x8xbf16>
    %c4 = arith.constant 4 : index
    %c0_25 = arith.constant 0 : index
    %c0_26 = arith.constant 0 : index
    %27 = vector.load %arg2[%c4, %c0_25, %c0_26] : memref<9x8x4xbf16, #tpu.memory_space<vmem>>, vector<1x8x4xbf16>
    %28 = vector.shape_cast %27 : vector<1x8x4xbf16> to vector<8x4xbf16>
    %cst_27 = arith.constant dense<0.000000e+00> : vector<80x4xf32>
    %29 = tpu.matmul %26, %28, %cst_27 {dimension_numbers = #tpu.dot_dimension_numbers<[1], [0], [0], [1], [0, 0, 1, 1], [], []>} : vector<80x8xbf16>, vector<8x4xbf16>, vector<80x4xf32> -> vector<80x4xf32>
    %30 = arith.addf %24, %29 : vector<80x4xf32>
    %c0_28 = arith.constant 0 : index
    %c12 = arith.constant 12 : index
    %c0_29 = arith.constant 0 : index
    %31 = vector.load %arg1[%c0_28, %c12, %c0_29] : memref<1x110x8xbf16, #tpu.memory_space<vmem>>, vector<1x80x8xbf16>
    %32 = vector.shape_cast %31 : vector<1x80x8xbf16> to vector<80x8xbf16>
    %c5 = arith.constant 5 : index
    %c0_30 = arith.constant 0 : index
    %c0_31 = arith.constant 0 : index
    %33 = vector.load %arg2[%c5, %c0_30, %c0_31] : memref<9x8x4xbf16, #tpu.memory_space<vmem>>, vector<1x8x4xbf16>
    %34 = vector.shape_cast %33 : vector<1x8x4xbf16> to vector<8x4xbf16>
    %cst_32 = arith.constant dense<0.000000e+00> : vector<80x4xf32>
    %35 = tpu.matmul %32, %34, %cst_32 {dimension_numbers = #tpu.dot_dimension_numbers<[1], [0], [0], [1], [0, 0, 1, 1], [], []>} : vector<80x8xbf16>, vector<8x4xbf16>, vector<80x4xf32> -> vector<80x4xf32>
    %36 = arith.addf %30, %35 : vector<80x4xf32>
    %c0_33 = arith.constant 0 : index
    %c20 = arith.constant 20 : index
    %c0_34 = arith.constant 0 : index
    %37 = vector.load %arg1[%c0_33, %c20, %c0_34] : memref<1x110x8xbf16, #tpu.memory_space<vmem>>, vector<1x80x8xbf16>
    %38 = vector.shape_cast %37 : vector<1x80x8xbf16> to vector<80x8xbf16>
    %c6 = arith.constant 6 : index
    %c0_35 = arith.constant 0 : index
    %c0_36 = arith.constant 0 : index
    %39 = vector.load %arg2[%c6, %c0_35, %c0_36] : memref<9x8x4xbf16, #tpu.memory_space<vmem>>, vector<1x8x4xbf16>
    %40 = vector.shape_cast %39 : vector<1x8x4xbf16> to vector<8x4xbf16>
    %cst_37 = arith.constant dense<0.000000e+00> : vector<80x4xf32>
    %41 = tpu.matmul %38, %40, %cst_37 {dimension_numbers = #tpu.dot_dimension_numbers<[1], [0], [0], [1], [0, 0, 1, 1], [], []>} : vector<80x8xbf16>, vector<8x4xbf16>, vector<80x4xf32> -> vector<80x4xf32>
    %42 = arith.addf %36, %41 : vector<80x4xf32>
    %c0_38 = arith.constant 0 : index
    %c21 = arith.constant 21 : index
    %c0_39 = arith.constant 0 : index
    %43 = vector.load %arg1[%c0_38, %c21, %c0_39] : memref<1x110x8xbf16, #tpu.memory_space<vmem>>, vector<1x80x8xbf16>
    %44 = vector.shape_cast %43 : vector<1x80x8xbf16> to vector<80x8xbf16>
    %c7 = arith.constant 7 : index
    %c0_40 = arith.constant 0 : index
    %c0_41 = arith.constant 0 : index
    %45 = vector.load %arg2[%c7, %c0_40, %c0_41] : memref<9x8x4xbf16, #tpu.memory_space<vmem>>, vector<1x8x4xbf16>
    %46 = vector.shape_cast %45 : vector<1x8x4xbf16> to vector<8x4xbf16>
    %cst_42 = arith.constant dense<0.000000e+00> : vector<80x4xf32>
    %47 = tpu.matmul %44, %46, %cst_42 {dimension_numbers = #tpu.dot_dimension_numbers<[1], [0], [0], [1], [0, 0, 1, 1], [], []>} : vector<80x8xbf16>, vector<8x4xbf16>, vector<80x4xf32> -> vector<80x4xf32>
    %48 = arith.addf %42, %47 : vector<80x4xf32>
    %c0_43 = arith.constant 0 : index
    %c22 = arith.constant 22 : index
    %c0_44 = arith.constant 0 : index
    %49 = vector.load %arg1[%c0_43, %c22, %c0_44] : memref<1x110x8xbf16, #tpu.memory_space<vmem>>, vector<1x80x8xbf16>
    %50 = vector.shape_cast %49 : vector<1x80x8xbf16> to vector<80x8xbf16>
    %c8 = arith.constant 8 : index
    %c0_45 = arith.constant 0 : index
    %c0_46 = arith.constant 0 : index
    %51 = vector.load %arg2[%c8, %c0_45, %c0_46] : memref<9x8x4xbf16, #tpu.memory_space<vmem>>, vector<1x8x4xbf16>
    %52 = vector.shape_cast %51 : vector<1x8x4xbf16> to vector<8x4xbf16>
    %cst_47 = arith.constant dense<0.000000e+00> : vector<80x4xf32>
    %53 = tpu.matmul %50, %52, %cst_47 {dimension_numbers = #tpu.dot_dimension_numbers<[1], [0], [0], [1], [0, 0, 1, 1], [], []>} : vector<80x8xbf16>, vector<8x4xbf16>, vector<80x4xf32> -> vector<80x4xf32>
    %54 = arith.addf %48, %53 : vector<80x4xf32>
    %c0_48 = arith.constant 0 : index
    %c0_49 = arith.constant 0 : index
    %55 = vector.load %arg3[%c0_48, %c0_49] : memref<1x4xf32, #tpu.memory_space<vmem>>, vector<1x4xf32>
    %56 = vector.broadcast %55 : vector<1x4xf32> to vector<80x4xf32>
    %57 = arith.addf %54, %56 : vector<80x4xf32>
    %c0_50 = arith.constant 0 : index
    %c0_51 = arith.constant 0 : index
    %c0_52 = arith.constant 0 : index
    %58 = vector.load %arg4[%c0_50, %c0_51, %c0_52] : memref<1x80x4xf32, #tpu.memory_space<vmem>>, vector<1x80x4xf32>
    %59 = vector.shape_cast %58 : vector<1x80x4xf32> to vector<80x4xf32>
    %60 = arith.addf %57, %59 : vector<80x4xf32>
    %c0_53 = arith.constant 0 : index
    %c0_54 = arith.constant 0 : index
    %c0_55 = arith.constant 0 : index
    %61 = vector.load %arg5[%c0_53, %c0_54, %c0_55] : memref<1x80x4xf32, #tpu.memory_space<vmem>>, vector<1x80x4xf32>
    %62 = vector.shape_cast %61 : vector<1x80x4xf32> to vector<80x4xf32>
    %63 = vector.shape_cast %60 : vector<80x4xf32> to vector<1x80x4xf32>
    tpu.vector_store %arg5[%c0_53, %c0_54, %c0_55], %63 {strides = array<i32>} : memref<1x80x4xf32, #tpu.memory_space<vmem>>, vector<1x80x4xf32>,
    return
  }
  func.func @transform_0(%arg0: i32) -> (i32, i32, i32) {
    %c0_i32 = arith.constant 0 : i32
    %c0_i32_0 = arith.constant 0 : i32
    %c0_i32_1 = arith.constant 0 : i32
    return %arg0, %c0_i32, %c0_i32_0 : i32, i32, i32
  }
  func.func @transform_1(%arg0: i32) -> (i32, i32, i32) {
    %c0_i32 = arith.constant 0 : i32
    %c0_i32_0 = arith.constant 0 : i32
    %c0_i32_1 = arith.constant 0 : i32
    %c0_i32_2 = arith.constant 0 : i32
    return %c0_i32, %c0_i32_0, %c0_i32_1 : i32, i32, i32
  }
  func.func @transform_2(%arg0: i32) -> (i32, i32) {
    %c0_i32 = arith.constant 0 : i32
    %c0_i32_0 = arith.constant 0 : i32
    %c0_i32_1 = arith.constant 0 : i32
    return %c0_i32, %c0_i32_0 : i32, i32
  }
  func.func @transform_3(%arg0: i32) -> (i32, i32, i32) {
    %c0_i32 = arith.constant 0 : i32
    %c0_i32_0 = arith.constant 0 : i32
    %c0_i32_1 = arith.constant 0 : i32
    return %arg0, %c0_i32, %c0_i32_0 : i32, i32, i32
  }
  func.func @transform_4(%arg0: i32) -> (i32, i32, i32) {
    %c0_i32 = arith.constant 0 : i32
    %c0_i32_0 = arith.constant 0 : i32
    %c0_i32_1 = arith.constant 0 : i32
    return %arg0, %c0_i32, %c0_i32_0 : i32, i32, i32
  }
}

module attributes {stable_mosaic.version = 11 : i64} {
  func.func @kernel(%arg0: i32, %arg1: memref<1x42x12xbf16, #tpu.memory_space<vmem>>, %arg2: memref<9x12x4xbf16, #tpu.memory_space<vmem>>, %arg3: memref<1x4xf32, #tpu.memory_space<vmem>>, %arg4: memref<1x24x4xf32, #tpu.memory_space<vmem>>) attributes {dimension_semantics = [#tpu.dimension_semantics<parallel>], iteration_bounds = array<i64: 2>, scalar_prefetch = 0 : i64, scratch_operands = 0 : i64, tpu.core_type = #tpu.core_type<tc>, window_params = [{transform_indices = @transform_0, window_bounds = array<i64: 1, 42, 12>}, {pipeline_mode = #tpu.pipeline_mode<synchronous>, transform_indices = @transform_1, window_bounds = array<i64: 9, 12, 4>}, {pipeline_mode = #tpu.pipeline_mode<synchronous>, transform_indices = @transform_2, window_bounds = array<i64: 1, 4>}, {transform_indices = @transform_3, window_bounds = array<i64: 1, 24, 4>}]} {
    %cst = arith.constant 0.000000e+00 : f32
    %0 = vector.broadcast %cst : f32 to vector<24x4xf32>
    %c0 = arith.constant 0 : index
    %c0_0 = arith.constant 0 : index
    %c0_1 = arith.constant 0 : index
    %1 = vector.load %arg1[%c0, %c0_0, %c0_1] : memref<1x42x12xbf16, #tpu.memory_space<vmem>>, vector<1x24x12xbf16>
    %2 = vector.shape_cast %1 : vector<1x24x12xbf16> to vector<24x12xbf16>
    %c0_2 = arith.constant 0 : index
    %c0_3 = arith.constant 0 : index
    %c0_4 = arith.constant 0 : index
    %3 = vector.load %arg2[%c0_2, %c0_3, %c0_4] : memref<9x12x4xbf16, #tpu.memory_space<vmem>>, vector<1x12x4xbf16>
    %4 = vector.shape_cast %3 : vector<1x12x4xbf16> to vector<12x4xbf16>
    %cst_5 = arith.constant dense<0.000000e+00> : vector<24x4xf32>
    %5 = tpu.matmul %2, %4, %cst_5 {dimension_numbers = #tpu.dot_dimension_numbers<[1], [0], [0], [1], [0, 0, 1, 1], [], []>} : vector<24x12xbf16>, vector<12x4xbf16>, vector<24x4xf32> -> vector<24x4xf32>
    %6 = arith.addf %0, %5 : vector<24x4xf32>
    %c0_6 = arith.constant 0 : index
    %c1 = arith.constant 1 : index
    %c0_7 = arith.constant 0 : index
    %7 = vector.load %arg1[%c0_6, %c1, %c0_7] : memref<1x42x12xbf16, #tpu.memory_space<vmem>>, vector<1x24x12xbf16>
    %8 = vector.shape_cast %7 : vector<1x24x12xbf16> to vector<24x12xbf16>
    %c1_8 = arith.constant 1 : index
    %c0_9 = arith.constant 0 : index
    %c0_10 = arith.constant 0 : index
    %9 = vector.load %arg2[%c1_8, %c0_9, %c0_10] : memref<9x12x4xbf16, #tpu.memory_space<vmem>>, vector<1x12x4xbf16>
    %10 = vector.shape_cast %9 : vector<1x12x4xbf16> to vector<12x4xbf16>
    %cst_11 = arith.constant dense<0.000000e+00> : vector<24x4xf32>
    %11 = tpu.matmul %8, %10, %cst_11 {dimension_numbers = #tpu.dot_dimension_numbers<[1], [0], [0], [1], [0, 0, 1, 1], [], []>} : vector<24x12xbf16>, vector<12x4xbf16>, vector<24x4xf32> -> vector<24x4xf32>
    %12 = arith.addf %6, %11 : vector<24x4xf32>
    %c0_12 = arith.constant 0 : index
    %c2 = arith.constant 2 : index
    %c0_13 = arith.constant 0 : index
    %13 = vector.load %arg1[%c0_12, %c2, %c0_13] : memref<1x42x12xbf16, #tpu.memory_space<vmem>>, vector<1x24x12xbf16>
    %14 = vector.shape_cast %13 : vector<1x24x12xbf16> to vector<24x12xbf16>
    %c2_14 = arith.constant 2 : index
    %c0_15 = arith.constant 0 : index
    %c0_16 = arith.constant 0 : index
    %15 = vector.load %arg2[%c2_14, %c0_15, %c0_16] : memref<9x12x4xbf16, #tpu.memory_space<vmem>>, vector<1x12x4xbf16>
    %16 = vector.shape_cast %15 : vector<1x12x4xbf16> to vector<12x4xbf16>
    %cst_17 = arith.constant dense<0.000000e+00> : vector<24x4xf32>
    %17 = tpu.matmul %14, %16, %cst_17 {dimension_numbers = #tpu.dot_dimension_numbers<[1], [0], [0], [1], [0, 0, 1, 1], [], []>} : vector<24x12xbf16>, vector<12x4xbf16>, vector<24x4xf32> -> vector<24x4xf32>
    %18 = arith.addf %12, %17 : vector<24x4xf32>
    %c0_18 = arith.constant 0 : index
    %c6 = arith.constant 6 : index
    %c0_19 = arith.constant 0 : index
    %19 = vector.load %arg1[%c0_18, %c6, %c0_19] : memref<1x42x12xbf16, #tpu.memory_space<vmem>>, vector<1x24x12xbf16>
    %20 = vector.shape_cast %19 : vector<1x24x12xbf16> to vector<24x12xbf16>
    %c3 = arith.constant 3 : index
    %c0_20 = arith.constant 0 : index
    %c0_21 = arith.constant 0 : index
    %21 = vector.load %arg2[%c3, %c0_20, %c0_21] : memref<9x12x4xbf16, #tpu.memory_space<vmem>>, vector<1x12x4xbf16>
    %22 = vector.shape_cast %21 : vector<1x12x4xbf16> to vector<12x4xbf16>
    %cst_22 = arith.constant dense<0.000000e+00> : vector<24x4xf32>
    %23 = tpu.matmul %20, %22, %cst_22 {dimension_numbers = #tpu.dot_dimension_numbers<[1], [0], [0], [1], [0, 0, 1, 1], [], []>} : vector<24x12xbf16>, vector<12x4xbf16>, vector<24x4xf32> -> vector<24x4xf32>
    %24 = arith.addf %18, %23 : vector<24x4xf32>
    %c0_23 = arith.constant 0 : index
    %c7 = arith.constant 7 : index
    %c0_24 = arith.constant 0 : index
    %25 = vector.load %arg1[%c0_23, %c7, %c0_24] : memref<1x42x12xbf16, #tpu.memory_space<vmem>>, vector<1x24x12xbf16>
    %26 = vector.shape_cast %25 : vector<1x24x12xbf16> to vector<24x12xbf16>
    %c4 = arith.constant 4 : index
    %c0_25 = arith.constant 0 : index
    %c0_26 = arith.constant 0 : index
    %27 = vector.load %arg2[%c4, %c0_25, %c0_26] : memref<9x12x4xbf16, #tpu.memory_space<vmem>>, vector<1x12x4xbf16>
    %28 = vector.shape_cast %27 : vector<1x12x4xbf16> to vector<12x4xbf16>
    %cst_27 = arith.constant dense<0.000000e+00> : vector<24x4xf32>
    %29 = tpu.matmul %26, %28, %cst_27 {dimension_numbers = #tpu.dot_dimension_numbers<[1], [0], [0], [1], [0, 0, 1, 1], [], []>} : vector<24x12xbf16>, vector<12x4xbf16>, vector<24x4xf32> -> vector<24x4xf32>
    %30 = arith.addf %24, %29 : vector<24x4xf32>
    %c0_28 = arith.constant 0 : index
    %c8 = arith.constant 8 : index
    %c0_29 = arith.constant 0 : index
    %31 = vector.load %arg1[%c0_28, %c8, %c0_29] : memref<1x42x12xbf16, #tpu.memory_space<vmem>>, vector<1x24x12xbf16>
    %32 = vector.shape_cast %31 : vector<1x24x12xbf16> to vector<24x12xbf16>
    %c5 = arith.constant 5 : index
    %c0_30 = arith.constant 0 : index
    %c0_31 = arith.constant 0 : index
    %33 = vector.load %arg2[%c5, %c0_30, %c0_31] : memref<9x12x4xbf16, #tpu.memory_space<vmem>>, vector<1x12x4xbf16>
    %34 = vector.shape_cast %33 : vector<1x12x4xbf16> to vector<12x4xbf16>
    %cst_32 = arith.constant dense<0.000000e+00> : vector<24x4xf32>
    %35 = tpu.matmul %32, %34, %cst_32 {dimension_numbers = #tpu.dot_dimension_numbers<[1], [0], [0], [1], [0, 0, 1, 1], [], []>} : vector<24x12xbf16>, vector<12x4xbf16>, vector<24x4xf32> -> vector<24x4xf32>
    %36 = arith.addf %30, %35 : vector<24x4xf32>
    %c0_33 = arith.constant 0 : index
    %c12 = arith.constant 12 : index
    %c0_34 = arith.constant 0 : index
    %37 = vector.load %arg1[%c0_33, %c12, %c0_34] : memref<1x42x12xbf16, #tpu.memory_space<vmem>>, vector<1x24x12xbf16>
    %38 = vector.shape_cast %37 : vector<1x24x12xbf16> to vector<24x12xbf16>
    %c6_35 = arith.constant 6 : index
    %c0_36 = arith.constant 0 : index
    %c0_37 = arith.constant 0 : index
    %39 = vector.load %arg2[%c6_35, %c0_36, %c0_37] : memref<9x12x4xbf16, #tpu.memory_space<vmem>>, vector<1x12x4xbf16>
    %40 = vector.shape_cast %39 : vector<1x12x4xbf16> to vector<12x4xbf16>
    %cst_38 = arith.constant dense<0.000000e+00> : vector<24x4xf32>
    %41 = tpu.matmul %38, %40, %cst_38 {dimension_numbers = #tpu.dot_dimension_numbers<[1], [0], [0], [1], [0, 0, 1, 1], [], []>} : vector<24x12xbf16>, vector<12x4xbf16>, vector<24x4xf32> -> vector<24x4xf32>
    %42 = arith.addf %36, %41 : vector<24x4xf32>
    %c0_39 = arith.constant 0 : index
    %c13 = arith.constant 13 : index
    %c0_40 = arith.constant 0 : index
    %43 = vector.load %arg1[%c0_39, %c13, %c0_40] : memref<1x42x12xbf16, #tpu.memory_space<vmem>>, vector<1x24x12xbf16>
    %44 = vector.shape_cast %43 : vector<1x24x12xbf16> to vector<24x12xbf16>
    %c7_41 = arith.constant 7 : index
    %c0_42 = arith.constant 0 : index
    %c0_43 = arith.constant 0 : index
    %45 = vector.load %arg2[%c7_41, %c0_42, %c0_43] : memref<9x12x4xbf16, #tpu.memory_space<vmem>>, vector<1x12x4xbf16>
    %46 = vector.shape_cast %45 : vector<1x12x4xbf16> to vector<12x4xbf16>
    %cst_44 = arith.constant dense<0.000000e+00> : vector<24x4xf32>
    %47 = tpu.matmul %44, %46, %cst_44 {dimension_numbers = #tpu.dot_dimension_numbers<[1], [0], [0], [1], [0, 0, 1, 1], [], []>} : vector<24x12xbf16>, vector<12x4xbf16>, vector<24x4xf32> -> vector<24x4xf32>
    %48 = arith.addf %42, %47 : vector<24x4xf32>
    %c0_45 = arith.constant 0 : index
    %c14 = arith.constant 14 : index
    %c0_46 = arith.constant 0 : index
    %49 = vector.load %arg1[%c0_45, %c14, %c0_46] : memref<1x42x12xbf16, #tpu.memory_space<vmem>>, vector<1x24x12xbf16>
    %50 = vector.shape_cast %49 : vector<1x24x12xbf16> to vector<24x12xbf16>
    %c8_47 = arith.constant 8 : index
    %c0_48 = arith.constant 0 : index
    %c0_49 = arith.constant 0 : index
    %51 = vector.load %arg2[%c8_47, %c0_48, %c0_49] : memref<9x12x4xbf16, #tpu.memory_space<vmem>>, vector<1x12x4xbf16>
    %52 = vector.shape_cast %51 : vector<1x12x4xbf16> to vector<12x4xbf16>
    %cst_50 = arith.constant dense<0.000000e+00> : vector<24x4xf32>
    %53 = tpu.matmul %50, %52, %cst_50 {dimension_numbers = #tpu.dot_dimension_numbers<[1], [0], [0], [1], [0, 0, 1, 1], [], []>} : vector<24x12xbf16>, vector<12x4xbf16>, vector<24x4xf32> -> vector<24x4xf32>
    %54 = arith.addf %48, %53 : vector<24x4xf32>
    %c0_51 = arith.constant 0 : index
    %c0_52 = arith.constant 0 : index
    %55 = vector.load %arg3[%c0_51, %c0_52] : memref<1x4xf32, #tpu.memory_space<vmem>>, vector<1x4xf32>
    %56 = vector.broadcast %55 : vector<1x4xf32> to vector<24x4xf32>
    %57 = arith.addf %54, %56 : vector<24x4xf32>
    %c0_53 = arith.constant 0 : index
    %c0_54 = arith.constant 0 : index
    %c0_55 = arith.constant 0 : index
    %58 = vector.load %arg4[%c0_53, %c0_54, %c0_55] : memref<1x24x4xf32, #tpu.memory_space<vmem>>, vector<1x24x4xf32>
    %59 = vector.shape_cast %58 : vector<1x24x4xf32> to vector<24x4xf32>
    %60 = vector.shape_cast %57 : vector<24x4xf32> to vector<1x24x4xf32>
    tpu.vector_store %arg4[%c0_53, %c0_54, %c0_55], %60 {strides = array<i32>} : memref<1x24x4xf32, #tpu.memory_space<vmem>>, vector<1x24x4xf32>,
    return
  }
  func.func @transform_0(%arg0: i32) -> (i32, i32, i32) {
    %c0_i32 = arith.constant 0 : i32
    %c0_i32_0 = arith.constant 0 : i32
    %c0_i32_1 = arith.constant 0 : i32
    return %arg0, %c0_i32, %c0_i32_0 : i32, i32, i32
  }
  func.func @transform_1(%arg0: i32) -> (i32, i32, i32) {
    %c0_i32 = arith.constant 0 : i32
    %c0_i32_0 = arith.constant 0 : i32
    %c0_i32_1 = arith.constant 0 : i32
    %c0_i32_2 = arith.constant 0 : i32
    return %c0_i32, %c0_i32_0, %c0_i32_1 : i32, i32, i32
  }
  func.func @transform_2(%arg0: i32) -> (i32, i32) {
    %c0_i32 = arith.constant 0 : i32
    %c0_i32_0 = arith.constant 0 : i32
    %c0_i32_1 = arith.constant 0 : i32
    return %c0_i32, %c0_i32_0 : i32, i32
  }
  func.func @transform_3(%arg0: i32) -> (i32, i32, i32) {
    %c0_i32 = arith.constant 0 : i32
    %c0_i32_0 = arith.constant 0 : i32
    %c0_i32_1 = arith.constant 0 : i32
    return %arg0, %c0_i32, %c0_i32_0 : i32, i32, i32
  }
}

module attributes {stable_mosaic.version = 11 : i64} {
  func.func @kernel(%arg0: i32, %arg1: memref<1x342x4xbf16, #tpu.memory_space<vmem>>, %arg2: memref<9x4x8xbf16, #tpu.memory_space<vmem>>, %arg3: memref<1x8xf32, #tpu.memory_space<vmem>>, %arg4: memref<1x288x8xf32, #tpu.memory_space<vmem>>, %arg5: memref<1x288x8xf32, #tpu.memory_space<vmem>>, %arg6: memref<1x288x8xf32, #tpu.memory_space<vmem>>) attributes {dimension_semantics = [#tpu.dimension_semantics<parallel>], iteration_bounds = array<i64: 2>, scalar_prefetch = 0 : i64, scratch_operands = 0 : i64, tpu.core_type = #tpu.core_type<tc>, window_params = [{transform_indices = @transform_0, window_bounds = array<i64: 1, 342, 4>}, {pipeline_mode = #tpu.pipeline_mode<synchronous>, transform_indices = @transform_1, window_bounds = array<i64: 9, 4, 8>}, {pipeline_mode = #tpu.pipeline_mode<synchronous>, transform_indices = @transform_2, window_bounds = array<i64: 1, 8>}, {transform_indices = @transform_3, window_bounds = array<i64: 1, 288, 8>}, {transform_indices = @transform_4, window_bounds = array<i64: 1, 288, 8>}, {transform_indices = @transform_5, window_bounds = array<i64: 1, 288, 8>}]} {
    %cst = arith.constant 0.000000e+00 : f32
    %0 = vector.broadcast %cst : f32 to vector<288x8xf32>
    %c0 = arith.constant 0 : index
    %c0_0 = arith.constant 0 : index
    %c0_1 = arith.constant 0 : index
    %1 = vector.load %arg1[%c0, %c0_0, %c0_1] : memref<1x342x4xbf16, #tpu.memory_space<vmem>>, vector<1x288x4xbf16>
    %2 = vector.shape_cast %1 : vector<1x288x4xbf16> to vector<288x4xbf16>
    %c0_2 = arith.constant 0 : index
    %c0_3 = arith.constant 0 : index
    %c0_4 = arith.constant 0 : index
    %3 = vector.load %arg2[%c0_2, %c0_3, %c0_4] : memref<9x4x8xbf16, #tpu.memory_space<vmem>>, vector<1x4x8xbf16>
    %4 = vector.shape_cast %3 : vector<1x4x8xbf16> to vector<4x8xbf16>
    %cst_5 = arith.constant dense<0.000000e+00> : vector<288x8xf32>
    %5 = tpu.matmul %2, %4, %cst_5 {dimension_numbers = #tpu.dot_dimension_numbers<[1], [0], [0], [1], [0, 0, 1, 1], [], []>} : vector<288x4xbf16>, vector<4x8xbf16>, vector<288x8xf32> -> vector<288x8xf32>
    %6 = arith.addf %0, %5 : vector<288x8xf32>
    %c0_6 = arith.constant 0 : index
    %c1 = arith.constant 1 : index
    %c0_7 = arith.constant 0 : index
    %7 = vector.load %arg1[%c0_6, %c1, %c0_7] : memref<1x342x4xbf16, #tpu.memory_space<vmem>>, vector<1x288x4xbf16>
    %8 = vector.shape_cast %7 : vector<1x288x4xbf16> to vector<288x4xbf16>
    %c1_8 = arith.constant 1 : index
    %c0_9 = arith.constant 0 : index
    %c0_10 = arith.constant 0 : index
    %9 = vector.load %arg2[%c1_8, %c0_9, %c0_10] : memref<9x4x8xbf16, #tpu.memory_space<vmem>>, vector<1x4x8xbf16>
    %10 = vector.shape_cast %9 : vector<1x4x8xbf16> to vector<4x8xbf16>
    %cst_11 = arith.constant dense<0.000000e+00> : vector<288x8xf32>
    %11 = tpu.matmul %8, %10, %cst_11 {dimension_numbers = #tpu.dot_dimension_numbers<[1], [0], [0], [1], [0, 0, 1, 1], [], []>} : vector<288x4xbf16>, vector<4x8xbf16>, vector<288x8xf32> -> vector<288x8xf32>
    %12 = arith.addf %6, %11 : vector<288x8xf32>
    %c0_12 = arith.constant 0 : index
    %c2 = arith.constant 2 : index
    %c0_13 = arith.constant 0 : index
    %13 = vector.load %arg1[%c0_12, %c2, %c0_13] : memref<1x342x4xbf16, #tpu.memory_space<vmem>>, vector<1x288x4xbf16>
    %14 = vector.shape_cast %13 : vector<1x288x4xbf16> to vector<288x4xbf16>
    %c2_14 = arith.constant 2 : index
    %c0_15 = arith.constant 0 : index
    %c0_16 = arith.constant 0 : index
    %15 = vector.load %arg2[%c2_14, %c0_15, %c0_16] : memref<9x4x8xbf16, #tpu.memory_space<vmem>>, vector<1x4x8xbf16>
    %16 = vector.shape_cast %15 : vector<1x4x8xbf16> to vector<4x8xbf16>
    %cst_17 = arith.constant dense<0.000000e+00> : vector<288x8xf32>
    %17 = tpu.matmul %14, %16, %cst_17 {dimension_numbers = #tpu.dot_dimension_numbers<[1], [0], [0], [1], [0, 0, 1, 1], [], []>} : vector<288x4xbf16>, vector<4x8xbf16>, vector<288x8xf32> -> vector<288x8xf32>
    %18 = arith.addf %12, %17 : vector<288x8xf32>
    %c0_18 = arith.constant 0 : index
    %c18 = arith.constant 18 : index
    %c0_19 = arith.constant 0 : index
    %19 = vector.load %arg1[%c0_18, %c18, %c0_19] : memref<1x342x4xbf16, #tpu.memory_space<vmem>>, vector<1x288x4xbf16>
    %20 = vector.shape_cast %19 : vector<1x288x4xbf16> to vector<288x4xbf16>
    %c3 = arith.constant 3 : index
    %c0_20 = arith.constant 0 : index
    %c0_21 = arith.constant 0 : index
    %21 = vector.load %arg2[%c3, %c0_20, %c0_21] : memref<9x4x8xbf16, #tpu.memory_space<vmem>>, vector<1x4x8xbf16>
    %22 = vector.shape_cast %21 : vector<1x4x8xbf16> to vector<4x8xbf16>
    %cst_22 = arith.constant dense<0.000000e+00> : vector<288x8xf32>
    %23 = tpu.matmul %20, %22, %cst_22 {dimension_numbers = #tpu.dot_dimension_numbers<[1], [0], [0], [1], [0, 0, 1, 1], [], []>} : vector<288x4xbf16>, vector<4x8xbf16>, vector<288x8xf32> -> vector<288x8xf32>
    %24 = arith.addf %18, %23 : vector<288x8xf32>
    %c0_23 = arith.constant 0 : index
    %c19 = arith.constant 19 : index
    %c0_24 = arith.constant 0 : index
    %25 = vector.load %arg1[%c0_23, %c19, %c0_24] : memref<1x342x4xbf16, #tpu.memory_space<vmem>>, vector<1x288x4xbf16>
    %26 = vector.shape_cast %25 : vector<1x288x4xbf16> to vector<288x4xbf16>
    %c4 = arith.constant 4 : index
    %c0_25 = arith.constant 0 : index
    %c0_26 = arith.constant 0 : index
    %27 = vector.load %arg2[%c4, %c0_25, %c0_26] : memref<9x4x8xbf16, #tpu.memory_space<vmem>>, vector<1x4x8xbf16>
    %28 = vector.shape_cast %27 : vector<1x4x8xbf16> to vector<4x8xbf16>
    %cst_27 = arith.constant dense<0.000000e+00> : vector<288x8xf32>
    %29 = tpu.matmul %26, %28, %cst_27 {dimension_numbers = #tpu.dot_dimension_numbers<[1], [0], [0], [1], [0, 0, 1, 1], [], []>} : vector<288x4xbf16>, vector<4x8xbf16>, vector<288x8xf32> -> vector<288x8xf32>
    %30 = arith.addf %24, %29 : vector<288x8xf32>
    %c0_28 = arith.constant 0 : index
    %c20 = arith.constant 20 : index
    %c0_29 = arith.constant 0 : index
    %31 = vector.load %arg1[%c0_28, %c20, %c0_29] : memref<1x342x4xbf16, #tpu.memory_space<vmem>>, vector<1x288x4xbf16>
    %32 = vector.shape_cast %31 : vector<1x288x4xbf16> to vector<288x4xbf16>
    %c5 = arith.constant 5 : index
    %c0_30 = arith.constant 0 : index
    %c0_31 = arith.constant 0 : index
    %33 = vector.load %arg2[%c5, %c0_30, %c0_31] : memref<9x4x8xbf16, #tpu.memory_space<vmem>>, vector<1x4x8xbf16>
    %34 = vector.shape_cast %33 : vector<1x4x8xbf16> to vector<4x8xbf16>
    %cst_32 = arith.constant dense<0.000000e+00> : vector<288x8xf32>
    %35 = tpu.matmul %32, %34, %cst_32 {dimension_numbers = #tpu.dot_dimension_numbers<[1], [0], [0], [1], [0, 0, 1, 1], [], []>} : vector<288x4xbf16>, vector<4x8xbf16>, vector<288x8xf32> -> vector<288x8xf32>
    %36 = arith.addf %30, %35 : vector<288x8xf32>
    %c0_33 = arith.constant 0 : index
    %c36 = arith.constant 36 : index
    %c0_34 = arith.constant 0 : index
    %37 = vector.load %arg1[%c0_33, %c36, %c0_34] : memref<1x342x4xbf16, #tpu.memory_space<vmem>>, vector<1x288x4xbf16>
    %38 = vector.shape_cast %37 : vector<1x288x4xbf16> to vector<288x4xbf16>
    %c6 = arith.constant 6 : index
    %c0_35 = arith.constant 0 : index
    %c0_36 = arith.constant 0 : index
    %39 = vector.load %arg2[%c6, %c0_35, %c0_36] : memref<9x4x8xbf16, #tpu.memory_space<vmem>>, vector<1x4x8xbf16>
    %40 = vector.shape_cast %39 : vector<1x4x8xbf16> to vector<4x8xbf16>
    %cst_37 = arith.constant dense<0.000000e+00> : vector<288x8xf32>
    %41 = tpu.matmul %38, %40, %cst_37 {dimension_numbers = #tpu.dot_dimension_numbers<[1], [0], [0], [1], [0, 0, 1, 1], [], []>} : vector<288x4xbf16>, vector<4x8xbf16>, vector<288x8xf32> -> vector<288x8xf32>
    %42 = arith.addf %36, %41 : vector<288x8xf32>
    %c0_38 = arith.constant 0 : index
    %c37 = arith.constant 37 : index
    %c0_39 = arith.constant 0 : index
    %43 = vector.load %arg1[%c0_38, %c37, %c0_39] : memref<1x342x4xbf16, #tpu.memory_space<vmem>>, vector<1x288x4xbf16>
    %44 = vector.shape_cast %43 : vector<1x288x4xbf16> to vector<288x4xbf16>
    %c7 = arith.constant 7 : index
    %c0_40 = arith.constant 0 : index
    %c0_41 = arith.constant 0 : index
    %45 = vector.load %arg2[%c7, %c0_40, %c0_41] : memref<9x4x8xbf16, #tpu.memory_space<vmem>>, vector<1x4x8xbf16>
    %46 = vector.shape_cast %45 : vector<1x4x8xbf16> to vector<4x8xbf16>
    %cst_42 = arith.constant dense<0.000000e+00> : vector<288x8xf32>
    %47 = tpu.matmul %44, %46, %cst_42 {dimension_numbers = #tpu.dot_dimension_numbers<[1], [0], [0], [1], [0, 0, 1, 1], [], []>} : vector<288x4xbf16>, vector<4x8xbf16>, vector<288x8xf32> -> vector<288x8xf32>
    %48 = arith.addf %42, %47 : vector<288x8xf32>
    %c0_43 = arith.constant 0 : index
    %c38 = arith.constant 38 : index
    %c0_44 = arith.constant 0 : index
    %49 = vector.load %arg1[%c0_43, %c38, %c0_44] : memref<1x342x4xbf16, #tpu.memory_space<vmem>>, vector<1x288x4xbf16>
    %50 = vector.shape_cast %49 : vector<1x288x4xbf16> to vector<288x4xbf16>
    %c8 = arith.constant 8 : index
    %c0_45 = arith.constant 0 : index
    %c0_46 = arith.constant 0 : index
    %51 = vector.load %arg2[%c8, %c0_45, %c0_46] : memref<9x4x8xbf16, #tpu.memory_space<vmem>>, vector<1x4x8xbf16>
    %52 = vector.shape_cast %51 : vector<1x4x8xbf16> to vector<4x8xbf16>
    %cst_47 = arith.constant dense<0.000000e+00> : vector<288x8xf32>
    %53 = tpu.matmul %50, %52, %cst_47 {dimension_numbers = #tpu.dot_dimension_numbers<[1], [0], [0], [1], [0, 0, 1, 1], [], []>} : vector<288x4xbf16>, vector<4x8xbf16>, vector<288x8xf32> -> vector<288x8xf32>
    %54 = arith.addf %48, %53 : vector<288x8xf32>
    %c0_48 = arith.constant 0 : index
    %c0_49 = arith.constant 0 : index
    %55 = vector.load %arg3[%c0_48, %c0_49] : memref<1x8xf32, #tpu.memory_space<vmem>>, vector<1x8xf32>
    %56 = vector.broadcast %55 : vector<1x8xf32> to vector<288x8xf32>
    %57 = arith.addf %54, %56 : vector<288x8xf32>
    %c0_50 = arith.constant 0 : index
    %c0_51 = arith.constant 0 : index
    %c0_52 = arith.constant 0 : index
    %58 = vector.load %arg4[%c0_50, %c0_51, %c0_52] : memref<1x288x8xf32, #tpu.memory_space<vmem>>, vector<1x288x8xf32>
    %59 = vector.shape_cast %58 : vector<1x288x8xf32> to vector<288x8xf32>
    %60 = arith.addf %57, %59 : vector<288x8xf32>
    %c0_53 = arith.constant 0 : index
    %c0_54 = arith.constant 0 : index
    %c0_55 = arith.constant 0 : index
    %61 = vector.load %arg5[%c0_53, %c0_54, %c0_55] : memref<1x288x8xf32, #tpu.memory_space<vmem>>, vector<1x288x8xf32>
    %62 = vector.shape_cast %61 : vector<1x288x8xf32> to vector<288x8xf32>
    %63 = arith.addf %60, %62 : vector<288x8xf32>
    %c0_56 = arith.constant 0 : index
    %c0_57 = arith.constant 0 : index
    %c0_58 = arith.constant 0 : index
    %64 = vector.load %arg6[%c0_56, %c0_57, %c0_58] : memref<1x288x8xf32, #tpu.memory_space<vmem>>, vector<1x288x8xf32>
    %65 = vector.shape_cast %64 : vector<1x288x8xf32> to vector<288x8xf32>
    %66 = vector.shape_cast %63 : vector<288x8xf32> to vector<1x288x8xf32>
    tpu.vector_store %arg6[%c0_56, %c0_57, %c0_58], %66 {strides = array<i32>} : memref<1x288x8xf32, #tpu.memory_space<vmem>>, vector<1x288x8xf32>,
    return
  }
  func.func @transform_0(%arg0: i32) -> (i32, i32, i32) {
    %c0_i32 = arith.constant 0 : i32
    %c0_i32_0 = arith.constant 0 : i32
    %c0_i32_1 = arith.constant 0 : i32
    return %arg0, %c0_i32, %c0_i32_0 : i32, i32, i32
  }
  func.func @transform_1(%arg0: i32) -> (i32, i32, i32) {
    %c0_i32 = arith.constant 0 : i32
    %c0_i32_0 = arith.constant 0 : i32
    %c0_i32_1 = arith.constant 0 : i32
    %c0_i32_2 = arith.constant 0 : i32
    return %c0_i32, %c0_i32_0, %c0_i32_1 : i32, i32, i32
  }
  func.func @transform_2(%arg0: i32) -> (i32, i32) {
    %c0_i32 = arith.constant 0 : i32
    %c0_i32_0 = arith.constant 0 : i32
    %c0_i32_1 = arith.constant 0 : i32
    return %c0_i32, %c0_i32_0 : i32, i32
  }
  func.func @transform_3(%arg0: i32) -> (i32, i32, i32) {
    %c0_i32 = arith.constant 0 : i32
    %c0_i32_0 = arith.constant 0 : i32
    %c0_i32_1 = arith.constant 0 : i32
    return %arg0, %c0_i32, %c0_i32_0 : i32, i32, i32
  }
  func.func @transform_4(%arg0: i32) -> (i32, i32, i32) {
    %c0_i32 = arith.constant 0 : i32
    %c0_i32_0 = arith.constant 0 : i32
    %c0_i32_1 = arith.constant 0 : i32
    return %arg0, %c0_i32, %c0_i32_0 : i32, i32, i32
  }
  func.func @transform_5(%arg0: i32) -> (i32, i32, i32) {
    %c0_i32 = arith.constant 0 : i32
    %c0_i32_0 = arith.constant 0 : i32
    %c0_i32_1 = arith.constant 0 : i32
    return %arg0, %c0_i32, %c0_i32_0 : i32, i32, i32
  }
}

</mosaic_0001>

<bundles_post_ra>
// kernel: eoct_conv_forward.6
= control target key start
LH: loop header
LB: loop body
LE: loop exit
PB: predicated region body
PF: predicated region fallthrough
CT: control target
= control target key end

     0   :  { %s1104_s12 = smov 0   ;;  %s1242_s0 = inlined_call_operand.vmem [shape: bf16[2,42,4], index: 0, kind: input, shape index: {}]   ;;  %s1243_s1 = inlined_call_operand.vmem [shape: bf16[9,4,12], index: 1, kind: input, shape index: {}]   ;;  %s1244_s2 = inlined_call_operand.vmem [shape: f32[1,12], index: 2, kind: input, shape index: {}]   ;;  %s1245_s3 = inlined_call_operand.vmem [shape: f32[2,24,12], index: 3, kind: output, shape index: {}]  }
   0x1 LB: > { %s915_s13 = sadd.s32 4294967295, %s1082_s12   ;;  %p919_p0 = scmp.ge.s32.totalorder %s1082_s12, 1  ;;  %s1082_s12 = sphi %s1104_s12, %s13_s12  }
   0x2   : > { %p137_p1 = scmp.lt.s32.totalorder %s1082_s12, 3 }
   0x4   : > { %p138_p2 = pnand %p919_p0, %p137_p1 }
   0x5   : > { %v922_v0 = vld [vmem:[%s1243_s1 + $0x2] sm:$0x3] (!%p138_p2)  ;;  %vm212_vm0 = vcmask (!%p138_p2), 1041408   ;;  %v175_v1 = vld [vmem:[%s1243_s1] sm:$0x3] (!%p138_p2)  ;;  %p161_p3 = scmp.lt.s32.totalorder (!%p138_p2), %s915_s13, 1 }
   0x6   : > { %141 = sbr.rel (%p138_p2) target bundleno = 280 (0x118), region = 32  ;;  %1045 = vmatprep.subr.msk.bf16.mxu0 (!%p138_p2), %vm212_vm0, %v922_v0  ;;  %v214_v2 = vsel (!%p138_p2), %vm212_vm0, %v922_v0, 0  ;;  %1046 = vmatprep.subr.msk.bf16.mxu1 (!%p138_p2), %vm212_vm0, %v175_v1  ;;  %v271_v3 = vsel (!%p138_p2), %vm212_vm0, %v175_v1, 0  ;;  %v930_v4 = vld [vmem:[%s1243_s1 + $0x4] sm:$0x3] (!%p138_p2)  ;;  %vm205_vm2 = vcmask (!%p138_p2), 31744  }
   0x7   : > { %992 = vmatpush3.bf16.msra.mxu0 (!%p138_p2), %v214_v2  ;;  %998 = vmatpush3.bf16.msra.mxu1 (!%p138_p2), %v271_v3  ;;  %v934_v5 = vld [vmem:[%s1243_s1 + $0x6] sm:$0x3] (!%p138_p2)  ;;  %vm189_vm1 = vsmask.f32 (!%p138_p2), 7424  ;;  %vm327_vm3 = vcmask (!%p138_p2), 1046528   ;;  %vm401_vm4 = vcmask (!%p138_p2), 1044480  }
   0x8   : > { %1047 = vmatprep.subr.msk.bf16.mxu0 (!%p138_p2), %vm212_vm0, %v930_v4  ;;  %1048 = vmatprep.subr.msk.bf16.mxu1 (!%p138_p2), %vm212_vm0, %v934_v5  ;;  %v412_v6 = vsel (!%p138_p2), %vm212_vm0, %v934_v5, 0  ;;  %v943_v23 = vld [vmem:[%s1243_s1 + $0xa] sm:$0x3] (!%p138_p2)  ;;  %v338_v39 = vsel (!%p138_p2), %vm212_vm0, %v930_v4, 0  ;;  %v939_v52 = vld [vmem:[%s1243_s1 + $0x8] sm:$0x3] (!%p138_p2) }
   0x9   : > { %v560_v55 = vsel (!%p138_p2), %vm212_vm0, %v943_v23, 0  ;;  %v953_v57 = vld [vmem:[%s1243_s1 + $0xe] sm:$0x3] (!%p138_p2)  ;;  %vm471_vm5 = vsmask.f32 (!%p138_p2), 4352  ;;  %vm629_vm7 = vcmask (!%p138_p2), 1045504  }
   0xa   : > { %vm699_vm6 = vsmask.f32 (!%p138_p2), 5376  ;;  %vm856_vm8 = vcmask (!%p138_p2), 97280  }
   0xd   : > { %s1247_s13 = smov (!%p161_p3, %s915_s13), 1 }
   0xe   : > { %s1054_s22 = smul.u32 24, %s1247_s13 }
  0x10   : > { %s1138_s25 = scalar_lea.vmem %s1242_s0, %s1054_s22  ;;  %s170_s15 = scalar_lea.vmem %s1245_s3, %s1054_s22 }
  0x11   : > { %v172_v7 = vld [vmem:[%s1138_s25] sm:$0xf]  ;;  %v1143_v8 = vld [vmem:[%s1138_s25 + $0x4] sm:$0xf]  ;;  %v1146_v9 = vld [vmem:[%s1138_s25 + $0x8] sm:$0xf] }
  0x12   : > { %v176_v10 = vld [vmem:[%s1138_s25 + $0xc] sm:$0x1]  ;;  %v923_v11 = vcombine.low %v172_v7, %v1143_v8  ;;  %v927_v12 = vcombine.low %v1146_v9, %v1146_v9  ;;  %v321_v13 = vld [vmem:[%s1138_s25] sm:$0xe]  ;;  %v613_v33 = vld [vmem:[%s1138_s25 + $0x4] sm:$0xc]  ;;  %v944_v53 = vcombine.low %v1143_v8, %v1146_v9 }
  0x13   : > { %v391_v14 = vld [vmem:[%s1138_s25] sm:$0x8]  ;;  %v1155_v15 = vcombine.low %v1146_v9, %v176_v10  ;;  %v931_v16 = vcombine.low %v321_v13, %v1143_v8  ;;  %v392_v17 = vld [vmem:[%s1138_s25 + $0xc] sm:$0x7]  ;;  %v1177_v37 = vld [vmem:[%s1138_s25 + $0x8] sm:$0xf] }
  0x14   : > { %v935_v18 = vcombine.low %v391_v14, %v1143_v8  ;;  %v1161_v19 = vld [vmem:[%s1138_s25 + $0xc] sm:$0xf]  ;;  %v191_v20 = vshrl.u32 %v923_v11, 16  ;;  %v193_v21 = vshll.u32 %v923_v11, 16  ;;  %999 = vmatprep.mubr.msk.bf16.mxu1 %vm205_vm2, %v923_v11  ;;  %v936_v22 = vcombine.low %v1146_v9, %v392_v17  ;;  %v693_v43 = vld [vmem:[%s1138_s25 + $0x10] sm:$0x7] }
  0x15   : > { %v940_v24 = vcombine.low %v1146_v9, %v1161_v19  ;;  %v198_v25 = vshll.u32 %v1155_v15, 16  ;;  %v202_v26 = vshrl.u32 %v1155_v15, 16  ;;  %1000 = vmatmul.mubr.msk.bf16.vlgmr.msra.gmra.mrb[0].mxu1 %vm205_vm2, %v927_v12  ;;  %v328_v27 = vrot.slane %v931_v16, 1  ;;  %v615_v42 = vld [vmem:[%s1138_s25 + $0xc] sm:$0xf] }
  0x16   : > { %v329_v28 = vrot.slane %v1155_v15, 1  ;;  %v195_v29 = vrot.slane %v193_v21, 1  ;;  %1010 = vmatpush3.bf16.msra.mxu1 %v412_v6  ;;  %v402_v30 = vrot.slane %v935_v18, 3  ;;  %v403_v31 = vrot.slane %v936_v22, 3  ;;  %v616_v0 = vld [vmem:[%s1138_s25 + $0x10] sm:$0x3] }
  0x17   : > { %v473_v32 = vshrl.u32 %v935_v18, 16  ;;  %v200_v34 = vrot.slane %v198_v25, 1  ;;  %1050 = vmatprep.subr.msk.bf16.mxu1 %vm212_vm0, %v943_v23  ;;  %v476_v35 = vshll.u32 %v935_v18, 16  ;;  %v481_v36 = vshrl.u32 %v940_v24, 16  ;;  %v948_v10 = vld [vmem:[%s1243_s1 + $0xc] sm:$0x3] }
  0x18   : > { %v196_v38 = vor.u32 %v195_v29, %v191_v20  ;;  %v404_v40 = vsel %vm401_vm4, %v402_v30, %v403_v31  ;;  %v484_v41 = vshll.u32 %v940_v24, 16  ;;  %v330_v45 = vsel %vm327_vm3, %v328_v27, %v329_v28  ;;  %v777_v15 = vld [vmem:[%s1138_s25 + $0x4] sm:$0x8] }
  0x19   : > { %v204_v44 = vor.u32 %v202_v26, %v200_v34  ;;  %1011 = vmatprep.mubr.msk.bf16.mxu1 %vm205_vm2, %v404_v40  ;;  %v475_v46 = vrot.slane %v473_v32, 3  ;;  %v478_v47 = vrot.slane %v476_v35, 4  ;;  %v483_v49 = vrot.slane %v481_v36, 3 }
  0x1a   : > { %v201_v48 = vsel %vm189_vm1, %v196_v38, %v200_v34  ;;  %v486_v50 = vrot.slane %v484_v41, 4  ;;  %v949_v51 = vcombine.low %v613_v33, %v1177_v37  ;;  %v954_v54 = vcombine.low %v615_v42, %v693_v43 }
  0x1b   : > { %993 = vmatprep.mubr.msk.bf16.mxu0 %vm205_vm2, %v201_v48  ;;  %v479_v61 = vor.u32 %v478_v47, %v475_v46  ;;  %v496_v6 = vsel %vm212_vm0, %v939_v52, 0  ;;  %v945_v8 = vcombine.low %v1161_v19, %v1161_v19  ;;  %v950_v9 = vcombine.low %v615_v42, %v616_v0  ;;  %v957_v19 = vld [vmem:[%s1243_s1 + $0x10] sm:$0x3] }
  0x1c   : > { %994 = vmatmul.mubr.msk.bf16.vlgmr.msra.gmra.mrb[0].mxu0 %vm205_vm2, %v204_v44  ;;  %v701_v56 = vshrl.u32 %v949_v51, 16  ;;  %v704_v58 = vshll.u32 %v949_v51, 16  ;;  %v709_v59 = vshrl.u32 %v954_v54, 16  ;;  %v712_v60 = vshll.u32 %v954_v54, 16 }
  0x1d   : > { %1004 = vmatpush3.bf16.msra.mxu0 %v338_v39  ;;  %1005 = vmatprep.mubr.msk.bf16.mxu0 %vm205_vm2, %v330_v45  ;;  %v487_v62 = vor.u32 %v486_v50, %v483_v49  ;;  %v724_v11 = vsel %vm212_vm0, %v953_v57, 0  ;;  %v630_v13 = vrot.slane %v949_v51, 2  ;;  %v631_v14 = vrot.slane %v950_v9, 2 }
  0x1e   : > { %1049 = vmatprep.subr.msk.bf16.mxu0 %vm212_vm0, %v939_v52  ;;  %1012 = vmatmul.mubr.msk.bf16.vlgmr.msra.gmra.mrb[4].mxu1 %vm205_vm2, %v403_v31  ;;  %v703_v63 = vrot.slane %v701_v56, 2  ;;  %v706_v1 = vrot.slane %v704_v58, 3  ;;  %v711_v2 = vrot.slane %v709_v59, 2  ;;  %v714_v3 = vrot.slane %v712_v60, 3 }
  0x1f   : > { %1022 = vmatpush3.bf16.msra.mxu1 %v560_v55  ;;  %1023 = vmatprep.mubr.msk.bf16.mxu1 %vm205_vm2, %v944_v53  ;;  %v488_v7 = vsel %vm471_vm5, %v479_v61, %v487_v62  ;;  %v640_v16 = vsel %vm212_vm0, %v948_v10, 0  ;;  %v632_v17 = vsel %vm629_vm7, %v630_v13, %v631_v14  ;;  %v958_v18 = vcombine.low %v777_v15, %v1177_v37 }
  0x20   : > { %1052 = vmatprep.subr.msk.bf16.mxu1 %vm212_vm0, %v953_v57  ;;  %v707_v4 = vor.u32 %v706_v1, %v703_v63  ;;  %v715_v5 = vor.u32 %v714_v3, %v711_v2  ;;  %v784_v21 = vrot.slane %v954_v54, 3  ;;  %v793_v22 = vsel %vm212_vm0, %v957_v19, 0 }
  0x21   : > { %v783_v20 = vrot.slane %v958_v18, 3 }
  0x22   : > { %v716_v12 = vsel %vm699_vm6, %v707_v4, %v715_v5 }
  0x23   : > { %v785_v23 = vsel %vm401_vm4, %v783_v20, %v784_v21 }
  0x24   : > { %1006 = vmatmul.mubr.msk.bf16.vlgmr.msra.gmra.mrb[4].mxu0 %vm205_vm2, %v329_v28 }
  0x25   : > { %1016 = vmatpush3.bf16.msra.mxu0 %v496_v6  ;;  %1017 = vmatprep.mubr.msk.bf16.mxu0 %vm205_vm2, %v488_v7 }
  0x26   : > { %1051 = vmatprep.subr.msk.bf16.mxu0 %vm212_vm0, %v948_v10  ;;  %1024 = vmatmul.mubr.msk.bf16.vlgmr.msra.gmra.mrb[8].mxu1 %vm205_vm2, %v945_v8 }
  0x27   : > { %1034 = vmatpush3.bf16.msra.mxu1 %v724_v11  ;;  %1035 = vmatprep.mubr.msk.bf16.mxu1 %vm205_vm2, %v716_v12 }
  0x2c   : > { %1018 = vmatmul.mubr.msk.bf16.vlgmr.msra.gmra.mrb[8].mxu0 %vm205_vm2, %v487_v62 }
  0x2d   : > { %1028 = vmatpush3.bf16.msra.mxu0 %v640_v16  ;;  %1029 = vmatprep.mubr.msk.bf16.mxu0 %vm205_vm2, %v632_v17 }
  0x2e   : > { %1053 = vmatprep.subr.msk.bf16.mxu0 %vm212_vm0, %v957_v19  ;;  %1036 = vmatmul.mubr.msk.bf16.vlgmr.msra.gmra.mrb[12].mxu1 %vm205_vm2, %v715_v5 }
  0x34   : > { %1030 = vmatmul.mubr.msk.bf16.vlgmr.msra.gmra.mrb[12].mxu0 %vm205_vm2, %v631_v14  ;;  %v961_v14 = vld [vmem:[%s1244_s2] ss:$0 sm:$0xff] }
  0x35   : > { %1040 = vmatpush3.bf16.msra.mxu0 %v793_v22  ;;  %1041 = vmatprep.mubr.msk.bf16.mxu0 %vm205_vm2, %v785_v23 }
  0x3c   : > { %1042 = vmatmul.mubr.msk.bf16.vlgmr.msra.gmra.mrb[16].mxu0 %vm205_vm2, %v784_v21 }
  0xe8   : > { %v1001_v24 = vpop.f32.mrb[0].mxu1 }
  0xe9   : > { %v307_v25 = vpop.f32.mrb[1].mxu1 }
  0xea   : > { %v1002_v26 = vpop.f32.mrb[2].mxu1 }
  0xeb   : > { %v310_v27 = vpop.f32.mrb[3].mxu1 }
  0xef   : > { %v995_v28 = vpop.f32.mrb[0].mxu0 }
  0xf0   : > { %v316_v29 = vadd.f32 %v1001_v24, %v995_v28  ;;  %v250_v30 = vpop.f32.mrb[1].mxu0 }
  0xf1   : > { %v308_v31 = vadd.f32 %v307_v25, %v250_v30  ;;  %v996_v32 = vpop.f32.mrb[2].mxu0  ;;  %v1013_v33 = vpop.f32.mrb[4].mxu1 }
  0xf2   : > { %v253_v34 = vpop.f32.mrb[3].mxu0  ;;  %v448_v35 = vpop.f32.mrb[5].mxu1 }
  0xf3   : > { %v311_v36 = vadd.f32 %v310_v27, %v253_v34  ;;  %v1014_v37 = vpop.f32.mrb[6].mxu1 }
  0xf4   : > { %v451_v38 = vpop.f32.mrb[7].mxu1 }
  0xf7   : > { %v1007_v39 = vpop.f32.mrb[4].mxu0 }
  0xf8   : > { %v390_v40 = vadd.f32 %v1007_v39, %v316_v29  ;;  %v374_v41 = vpop.f32.mrb[5].mxu0 }
  0xf9   : > { %v388_v42 = vadd.f32 %v374_v41, %v308_v31  ;;  %v1008_v43 = vpop.f32.mrb[6].mxu0  ;;  %v1025_v44 = vpop.f32.mrb[8].mxu1 }
  0xfa   : > { %v464_v45 = vadd.f32 %v1013_v33, %v390_v40  ;;  %v377_v46 = vpop.f32.mrb[7].mxu0  ;;  %v596_v47 = vpop.f32.mrb[9].mxu1 }
  0xfb   : > { %v389_v48 = vadd.f32 %v377_v46, %v311_v36  ;;  %v462_v49 = vadd.f32 %v448_v35, %v388_v42  ;;  %v1026_v50 = vpop.f32.mrb[10].mxu1 }
  0xfc   : > { %v599_v51 = vpop.f32.mrb[11].mxu1 }
  0xfd   : > { %v463_v52 = vadd.f32 %v451_v38, %v389_v48 }
  0xff   : > { %v1019_v53 = vpop.f32.mrb[8].mxu0 }
 0x100   : > { %v548_v54 = vadd.f32 %v1019_v53, %v464_v45  ;;  %v532_v55 = vpop.f32.mrb[9].mxu0 }
 0x101   : > { %v546_v56 = vadd.f32 %v532_v55, %v462_v49  ;;  %v1020_v57 = vpop.f32.mrb[10].mxu0  ;;  %v1037_v58 = vpop.f32.mrb[12].mxu1 }
 0x102   : > { %v612_v59 = vadd.f32 %v1025_v44, %v548_v54  ;;  %v535_v60 = vpop.f32.mrb[11].mxu0  ;;  %v760_v61 = vpop.f32.mrb[13].mxu1 }
 0x103   : > { %v547_v62 = vadd.f32 %v535_v60, %v463_v52  ;;  %v610_v63 = vadd.f32 %v596_v47, %v546_v56  ;;  %v1038_v0 = vpop.f32.mrb[14].mxu1 }
 0x104   : > { %v763_v1 = vpop.f32.mrb[15].mxu1 }
 0x105   : > { %v611_v2 = vadd.f32 %v599_v51, %v547_v62 }
 0x107   : > { %v1031_v3 = vpop.f32.mrb[12].mxu0 }
 0x108   : > { %v692_v4 = vadd.f32 %v1031_v3, %v612_v59  ;;  %v676_v5 = vpop.f32.mrb[13].mxu0 }
 0x109   : > { %v690_v6 = vadd.f32 %v676_v5, %v610_v63  ;;  %v1032_v7 = vpop.f32.mrb[14].mxu0 }
 0x10a   : > { %v776_v8 = vadd.f32 %v1037_v58, %v692_v4  ;;  %v679_v9 = vpop.f32.mrb[15].mxu0 }
 0x10b   : > { %v691_v10 = vadd.f32 %v679_v9, %v611_v2  ;;  %v774_v11 = vadd.f32 %v760_v61, %v690_v6 }
 0x10d   : > { %v775_v12 = vadd.f32 %v763_v1, %v691_v10 }
 0x10f   : > { %v1043_v13 = vpop.f32.mrb[16].mxu0 }
 0x110   : > { %v845_v15 = vadd.f32 %v1043_v13, %v776_v8  ;;  %v829_v16 = vpop.f32.mrb[17].mxu0 }
 0x111   : > { %v843_v17 = vadd.f32 %v829_v16, %v774_v11  ;;  %v1044_v18 = vpop.f32.mrb[18].mxu0 }
 0x112   : > { %v855_v19 = vadd.f32 %v961_v14, %v845_v15  ;;  %v832_v20 = vpop.f32.mrb[19].mxu0 }
 0x113   : > { %v853_v21 = vadd.f32 %v961_v14, %v843_v17  ;;  %v844_v22 = vadd.f32 %v832_v20, %v775_v12 }
 0x114   : > { %859 = vst.msk [vmem:[%s170_s15 + $0x10] sm:$0xff] %vm856_vm8, %v855_v19 }
 0x115   : > { %857 = vst.msk [vmem:[%s170_s15] sm:$0xff] %vm856_vm8, %v853_v21  ;;  %v854_v23 = vadd.f32 %v961_v14, %v844_v22 }
 0x117   : > { %858 = vst.msk [vmem:[%s170_s15 + $0x8] sm:$0xff] %vm856_vm8, %v854_v23 }
 0x118 PF: > { %s13_s12 = sadd.s32 1, %s1082_s12  }
 0x119   : > { %p10_p4 = scmp.ge.s32.totalorder %s13_s12, 4  }
 0x11b   :  { %12 = sbr.rel (!%p10_p4) target bundleno = 1 (0x1), region = 70 }

// kernel: eoct_conv_forward.5
= control target key start
LH: loop header
LB: loop body
LE: loop exit
PB: predicated region body
PF: predicated region fallthrough
CT: control target
= control target key end

     0   :  { %s1911_s12 = smov 0   ;;  %s2335_s0 = inlined_call_operand.vmem [shape: bf16[2,110,4], index: 0, kind: input, shape index: {}]   ;;  %s2336_s1 = inlined_call_operand.vmem [shape: bf16[9,4,8], index: 1, kind: input, shape index: {}]   ;;  %s2337_s2 = inlined_call_operand.vmem [shape: f32[1,8], index: 2, kind: input, shape index: {}]   ;;  %s2338_s3 = inlined_call_operand.vmem [shape: f32[2,80,8], index: 3, kind: output, shape index: {}]  }
   0x1 LB: > { %s1506_s13 = sadd.s32 4294967295, %s1887_s12   ;;  %p1510_p0 = scmp.ge.s32.totalorder %s1887_s12, 1  ;;  %s1887_s12 = sphi %s1911_s12, %s13_s12  }
   0x2   : > { %p137_p1 = scmp.lt.s32.totalorder %s1887_s12, 3 }
   0x4   : > { %p138_p2 = pnand %p1510_p0, %p137_p1 }
   0x5   : > { %v1513_v0 = vld [vmem:[%s2336_s1 + $0x2] sm:$0x3] (!%p138_p2)  ;;  %vm275_vm0 = vcmask (!%p138_p2), 1041408   ;;  %p161_p3 = scmp.lt.s32.totalorder (!%p138_p2), %s1506_s13, 1  ;;  %v1889_v1 = vmov (!%p138_p2), 0.0   ;;  %vm1890_vm1 = vmmov (!%p138_p2), 0  }
   0x6   : > { %141 = sbr.rel (%p138_p2) target bundleno = 422 (0x1a6), region = 32  ;;  %1646 = vmatprep.subr.bf16.mxu0 (!%p138_p2), %v1889_v1  ;;  %1844 = vmatprep.subr.bf16.mxu1 (!%p138_p2), %v1889_v1  ;;  %v277_v2 = vsel (!%p138_p2), %vm275_vm0, %v1513_v0, 0  ;;  %vm214_vm2 = vsmask.f32 (!%p138_p2), 7424  ;;  %v1530_v13 = vld [vmem:[%s2336_s1 + $0x4] sm:$0x3] (!%p138_p2) }
   0x7   : > { %1647 = vmatpush3.bf16.msra.mxu0 (!%p138_p2), %v277_v2  ;;  %1845 = vmatpush3.bf16.msra.mxu1 (!%p138_p2), %v277_v2  ;;  %vm259_vm3 = vcmask (!%p138_p2), 31744   ;;  %v182_v22 = vld [vmem:[%s2336_s1] sm:$0x3] (!%p138_p2)  ;;  %v472_v26 = vsel (!%p138_p2), %vm275_vm0, %v1530_v13, 0  ;;  %vm444_vm4 = vcmask (!%p138_p2), 1046528   ;;  %vm877_vm6 = vcmask (!%p138_p2), 1045504  }
   0x8   : > { %1648 = vmatprep.mubr.msk.bf16.mxu0 (!%p138_p2), %vm1890_vm1, %v1889_v1  ;;  %1660 = vmatprep.mubr.msk.bf16.mxu1 (!%p138_p2), %vm1890_vm1, %v1889_v1  ;;  %v363_v31 = vsel (!%p138_p2), %vm275_vm0, %v182_v22, 0  ;;  %v1537_v48 = vld [vmem:[%s2336_s1 + $0x6] sm:$0x3] (!%p138_p2)  ;;  %v1549_v53 = vld [vmem:[%s2336_s1 + $0x8] sm:$0x3] (!%p138_p2)  ;;  %vm1310_vm8 = vcmask (!%p138_p2), 1044480  }
   0x9   : > { %1690 = vmatprep.subr.bf16.mxu0 (!%p138_p2), %v1889_v1  ;;  %1668 = vmatprep.subr.bf16.mxu1 (!%p138_p2), %v1889_v1  ;;  %v625_v50 = vsel (!%p138_p2), %vm275_vm0, %v1537_v48, 0  ;;  %v786_v55 = vsel (!%p138_p2), %vm275_vm0, %v1549_v53, 0  ;;  %vm716_vm5 = vsmask.f32 (!%p138_p2), 6400  ;;  %vm1149_vm7 = vsmask.f32 (!%p138_p2), 5376 }
   0xa   : > { %vm1440_vm9 = vcmask (!%p138_p2), 64512  }
   0xd   : > { %s2340_s13 = smov (!%p161_p3, %s1506_s13), 1 }
   0xe   : > { %s1846_s16 = smul.u32 56, %s2340_s13 }
   0xf   : > { %s1847_s9 = smul.u32 80, %s2340_s13 }
  0x10   : > { %s1937_s19 = scalar_lea.vmem %s2335_s0, %s1846_s16 }
  0x11   : > { %v172_v3 = vld [vmem:[%s1937_s19] sm:$0xf]  ;;  %v1941_v4 = vld [vmem:[%s1937_s19 + $0x4] sm:$0xf]  ;;  %v1947_v6 = vld [vmem:[%s1937_s19 + $0x8] sm:$0xff]   ;;  %s2296_s16 = scalar_lea.vmem %s2338_s3, %s1847_s9 }
  0x12   : > { %v1944_v5 = vcombine.low %v172_v3, %v1941_v4  ;;  %v223_v9 = vshll.u32 %v1947_v6, 16  ;;  %v1953_v10 = vld [vmem:[%s1937_s19 + $0x18] sm:$0xff]   ;;  %v1956_v11 = vld [vmem:[%s1937_s19 + $0x20] sm:$0xff]   ;;  %v1959_v12 = vld [vmem:[%s1937_s19 + $0x10] sm:$0xff]   ;;  %v227_v23 = vshrl.u32 %v1947_v6, 16  ;;  %v446_v52 = vrot.slane %v1947_v6, 1 }
  0x13   : > { %v239_v16 = vshll.u32 %v1953_v10, 16  ;;  %v243_v17 = vshrl.u32 %v1953_v10, 16  ;;  %v247_v18 = vshll.u32 %v1956_v11, 16  ;;  %v1968_v19 = vld [vmem:[%s1937_s19 + $0x28] ss:$0 sps:$4 sm:$0x11]  }
  0x14   : > { %v216_v7 = vshrl.u32 %v1944_v5, 16  ;;  %v218_v8 = vshll.u32 %v1944_v5, 16  ;;  %v225_v15 = vrot.slane %v223_v9, 1  ;;  %v231_v24 = vshll.u32 %v1959_v12, 16  ;;  %v1992_v39 = vld [vmem:[%s1937_s19 + $0x24] sm:$0xff]   ;;  %v2063_v2 = vld [vmem:[%s1937_s19 + $0xc] sm:$0xff]  }
  0x15   : > { %v241_v21 = vrot.slane %v239_v16, 1  ;;  %v249_v25 = vrot.slane %v247_v18, 1  ;;  %v251_v29 = vshrl.u32 %v1956_v11, 16  ;;  %v255_v30 = vshll.u32 %v1968_v19, 16  ;;  %v438_v43 = vld [vmem:[%s1937_s19] sm:$0xe] }
  0x16   : > { %v220_v14 = vrot.slane %v218_v8, 1  ;;  %v229_v33 = vor.u32 %v227_v23, %v225_v15  ;;  %v233_v34 = vrot.slane %v231_v24, 1  ;;  %v235_v38 = vshrl.u32 %v1959_v12, 16  ;;  %v1870_v40 = vld [vmem:[%s1937_s19 + $0x2c] ss:$0 sps:$4 sm:$0x11]  }
  0x17   : > { %v245_v28 = vor.u32 %v243_v17, %v241_v21  ;;  %v253_v35 = vor.u32 %v251_v29, %v249_v25  ;;  %v257_v36 = vrot.slane %v255_v30, 1  ;;  %v605_v44 = vrot.slane %v1992_v39, 1  ;;  %v557_v61 = vld [vmem:[%s1937_s19 + $0x4] sm:$0xe]  ;;  %v2058_v62 = vld [vmem:[%s1937_s19 + $0x8] sm:$0xf] }
  0x18   : > { %v221_v20 = vor.u32 %v220_v14, %v216_v7  ;;  %v234_v37 = vsel %vm214_vm2, %v229_v33, %v233_v34  ;;  %v237_v42 = vor.u32 %v235_v38, %v233_v34  ;;  %v607_v45 = vrot.slane %v1870_v40, 1  ;;  %v2082_v18 = vld [vmem:[%s1937_s19 + $0x14] sm:$0xff]   ;;  %v1563_v24 = vld [vmem:[%s2336_s1 + $0xc] sm:$0x3]  ;;  %v2102_v30 = vld [vmem:[%s1937_s19 + $0x1c] sm:$0xff]  }
  0x19   : > { %v250_v32 = vsel %vm214_vm2, %v245_v28, %v249_v25  ;;  %v258_v41 = vsel %vm214_vm2, %v253_v35, %v257_v36  ;;  %v1531_v49 = vcombine.low %v438_v43, %v1941_v4  ;;  %v448_v56 = vrot.slane %v1959_v12, 1  ;;  %v2126_v48 = vld [vmem:[%s1937_s19 + $0x2c] ss:$0 sps:$4 sm:$0x33]   ;;  %v871_v53 = vld [vmem:[%s1937_s19 + $0x4] sm:$0xc] }
  0x1a   : > { %v226_v27 = vsel %vm214_vm2, %v221_v20, %v225_v15  ;;  %1661 = vmatmul.mubr.msk.bf16.vlgmr.msra.gmra.mrb[0].mxu1 %vm259_vm3, %v250_v32  ;;  %v2007_v46 = vsel %vm444_vm4, %v605_v44, %v607_v45  ;;  %v242_v47 = vsel %vm214_vm2, %v237_v42, %v241_v21  ;;  %v450_v58 = vrot.slane %v1953_v10, 1 }
  0x1b   : > { %1649 = vmatmul.mubr.msk.bf16.vlgmr.msra.gmra.mrb[0].mxu0 %vm259_vm3, %v226_v27  ;;  %1669 = vmatpush3.bf16.msra.mxu1 %v363_v31  ;;  %v445_v51 = vrot.slane %v1531_v49, 1  ;;  %v449_v57 = vsel %vm444_vm4, %v446_v52, %v448_v56  ;;  %v452_v60 = vrot.slane %v1956_v11, 1  ;;  %v1538_v0 = vcombine.low %v557_v61, %v2058_v62 }
  0x1c   : > { %1691 = vmatpush3.bf16.msra.mxu0 %v472_v26  ;;  %1652 = vmatprep.mubr.msk.bf16.mxu0 %vm1890_vm1, %v1889_v1  ;;  %v451_v59 = vsel %vm444_vm4, %v448_v56, %v450_v58  ;;  %v454_v3 = vrot.slane %v1968_v19, 1  ;;  %v729_v7 = vshll.u32 %v2063_v2, 16  ;;  %v599_v9 = vrot.slane %v2063_v2, 1 }
  0x1d   : > { %1734 = vmatprep.subr.bf16.mxu0 %v1889_v1  ;;  %1664 = vmatprep.mubr.msk.bf16.mxu1 %vm1890_vm1, %v1889_v1  ;;  %v447_v54 = vsel %vm444_vm4, %v445_v51, %v446_v52  ;;  %v453_v63 = vsel %vm444_vm4, %v450_v58, %v452_v60  ;;  %v718_v4 = vshrl.u32 %v1538_v0, 16  ;;  %v598_v8 = vrot.slane %v1538_v0, 1  ;;  %v990_v58 = vld [vmem:[%s1937_s19 + $0x8] sm:$0xc] }
  0x1e   : > { %1712 = vmatprep.subr.bf16.mxu1 %v1889_v1  ;;  %v731_v16 = vrot.slane %v729_v7, 2  ;;  %v735_v21 = vshrl.u32 %v2082_v18, 16  ;;  %v738_v22 = vshll.u32 %v2082_v18, 16  ;;  %v601_v23 = vrot.slane %v2082_v18, 1  ;;  %v1582_v7 = vld [vmem:[%s2336_s1 + $0x10] sm:$0x3] }
  0x1f   : > { %v720_v13 = vrot.slane %v718_v4, 1  ;;  %v600_v17 = vsel %vm444_vm4, %v598_v8, %v599_v9  ;;  %v1058_v28 = vsel %vm275_vm0, %v1563_v24, 0  ;;  %v744_v32 = vshrl.u32 %v2102_v30, 16 }
  0x20   : > { %v737_v26 = vrot.slane %v735_v21, 1  ;;  %v740_v27 = vrot.slane %v738_v22, 2  ;;  %v602_v29 = vsel %vm444_vm4, %v599_v9, %v601_v23  ;;  %v747_v33 = vshll.u32 %v2102_v30, 16  ;;  %v2177_v9 = vld [vmem:[%s1937_s19 + $0x18] sm:$0xff]  }
  0x21   : > { %v603_v34 = vrot.slane %v2102_v30, 1  ;;  %v746_v36 = vrot.slane %v744_v32, 1  ;;  %v756_v42 = vshll.u32 %v1992_v39, 16  ;;  %v762_v51 = vshrl.u32 %v2126_v48, 16 }
  0x22   : > { %1665 = vmatmul.mubr.msk.bf16.gmra.mrb[4].mxu1 %vm259_vm3, %v258_v41  ;;  %v741_v31 = vor.u32 %v740_v27, %v737_v26  ;;  %v753_v41 = vshrl.u32 %v1992_v39, 16  ;;  %v765_v52 = vshll.u32 %v2126_v48, 16  ;;  %v1557_v56 = vcombine.low %v871_v53, %v2058_v62 }
  0x23   : > { %1653 = vmatmul.mubr.msk.bf16.gmra.mrb[4].mxu0 %vm259_vm3, %v234_v37  ;;  %1670 = vmatprep.mubr.msk.bf16.mxu1 %vm1890_vm1, %v1889_v1  ;;  %v749_v37 = vrot.slane %v747_v33, 2  ;;  %v604_v38 = vsel %vm444_vm4, %v601_v23, %v603_v34  ;;  %v606_v49 = vsel %vm444_vm4, %v603_v34, %v605_v44  ;;  %v879_v61 = vrot.slane %v2063_v2, 2 }
  0x24   : > { %1656 = vmatprep.mubr.msk.bf16.mxu0 %vm1890_vm1, %v1889_v1  ;;  %v755_v45 = vrot.slane %v753_v41, 1  ;;  %v887_v23 = vrot.slane %v2126_v48, 2 }
  0x25   : > { %v750_v40 = vor.u32 %v749_v37, %v746_v36 }
  0x27   : > { %v751_v43 = vsel %vm716_vm5, %v741_v31, %v750_v40 }
  0x2a   : > { %1671 = vmatmul.mubr.msk.bf16.vlgmr.msra.gmra.mrb[8].mxu1 %vm259_vm3, %v1944_v5  ;;  %v721_v5 = vshll.u32 %v1538_v0, 16 }
  0x2b   : > { %1657 = vmatmul.mubr.msk.bf16.gmra.mrb[8].mxu0 %vm259_vm3, %v242_v47  ;;  %1713 = vmatpush3.bf16.msra.mxu1 %v625_v50  ;;  %v758_v47 = vrot.slane %v756_v42, 2 }
  0x2c   : > { %1692 = vmatprep.mubr.msk.bf16.mxu0 %vm1890_vm1, %v1889_v1  ;;  %1674 = vmatprep.mubr.msk.bf16.mxu1 %vm1890_vm1, %v1889_v1  ;;  %v723_v14 = vrot.slane %v721_v5, 2 }
  0x2d   : > { %1756 = vmatprep.subr.bf16.mxu1 %v1889_v1  ;;  %v759_v50 = vor.u32 %v758_v47, %v755_v45 }
  0x2e   : > { %v724_v19 = vor.u32 %v723_v14, %v720_v13  ;;  %v1034_v13 = vrot.slane %v2177_v9, 2  ;;  %v883_v14 = vrot.slane %v2102_v30, 2 }
  0x2f   : > { %v760_v44 = vsel %vm716_vm5, %v750_v40, %v759_v50  ;;  %v1171_v40 = vshll.u32 %v2177_v9, 16 }
  0x31   : > { %v1173_v47 = vrot.slane %v1171_v40, 3 }
  0x32   : > { %1675 = vmatmul.mubr.msk.bf16.gmra.mrb[12].mxu1 %vm259_vm3, %v1947_v6  ;;  %v726_v6 = vshrl.u32 %v2063_v2, 16 }
  0x33   : > { %1693 = vmatmul.mubr.msk.bf16.vlgmr.msra.gmra.mrb[12].mxu0 %vm259_vm3, %v447_v54  ;;  %1678 = vmatprep.mubr.msk.bf16.mxu1 %vm1890_vm1, %v1889_v1  ;;  %v764_v54 = vrot.slane %v762_v51, 1 }
  0x34   : > { %1735 = vmatpush3.bf16.msra.mxu0 %v786_v55  ;;  %1696 = vmatprep.mubr.msk.bf16.mxu0 %vm1890_vm1, %v1889_v1  ;;  %v728_v15 = vrot.slane %v726_v6, 1  ;;  %v767_v55 = vrot.slane %v765_v52, 2  ;;  %v881_v6 = vrot.slane %v2082_v18, 2 }
  0x35   : > { %1778 = vmatprep.subr.bf16.mxu0 %v1889_v1 }
  0x36   : > { %v732_v20 = vor.u32 %v731_v16, %v728_v15  ;;  %v2191_v16 = vld [vmem:[%s1937_s19 + $0x20] sm:$0xff]  }
  0x37   : > { %v1036_v18 = vrot.slane %v2191_v16, 2  ;;  %v1177_v51 = vshrl.u32 %v2191_v16, 16  ;;  %v1180_v52 = vshll.u32 %v2191_v16, 16 }
  0x38   : > { %v733_v25 = vsel %vm716_vm5, %v724_v19, %v732_v20  ;;  %v742_v35 = vsel %vm716_vm5, %v732_v20, %v741_v31  ;;  %v2204_v20 = vld [vmem:[%s1937_s19 + $0x28] sm:$0xff]  }
  0x39   : > { %v1037_v19 = vsel %vm877_vm6, %v1034_v13, %v1036_v18  ;;  %v1038_v22 = vrot.slane %v2204_v20, 2 }
  0x3a   : > { %1679 = vmatmul.mubr.msk.bf16.gmra.mrb[16].mxu1 %vm259_vm3, %v1959_v12  ;;  %v1556_v12 = vld [vmem:[%s2336_s1 + $0xa] sm:$0x3] }
  0x3b   : > { %1697 = vmatmul.mubr.msk.bf16.gmra.mrb[16].mxu0 %vm259_vm3, %v449_v57  ;;  %1682 = vmatprep.mubr.msk.bf16.mxu1 %vm1890_vm1, %v1889_v1  ;;  %v768_v57 = vor.u32 %v767_v55, %v764_v54  ;;  %v1039_v27 = vsel %vm877_vm6, %v1036_v18, %v1038_v22  ;;  %v1179_v54 = vrot.slane %v1177_v51, 2  ;;  %v1182_v55 = vrot.slane %v1180_v52, 3 }
  0x3c   : > { %1700 = vmatprep.mubr.msk.bf16.mxu0 %vm1890_vm1, %v1889_v1 }
  0x3d   : > { %v769_v62 = vsel %vm716_vm5, %v759_v50, %v768_v57  ;;  %v1183_v57 = vor.u32 %v1182_v55, %v1179_v54 }
  0x42   : > { %1683 = vmatmul.mubr.msk.bf16.gmra.mrb[20].mxu1 %vm259_vm3, %v1953_v10  ;;  %v455_v10 = vsel %vm444_vm4, %v452_v60, %v454_v3  ;;  %v878_v60 = vrot.slane %v1557_v56, 2  ;;  %v1314_v56 = vrot.slane %v2177_v9, 3 }
  0x43   : > { %1701 = vmatmul.mubr.msk.bf16.gmra.mrb[20].mxu0 %vm259_vm3, %v451_v59  ;;  %1686 = vmatprep.mubr.msk.bf16.mxu1 %vm1890_vm1, %v1889_v1  ;;  %v2149_v59 = vld [vmem:[%s1937_s19 + $0xc] sm:$0xf] }
  0x44   : > { %1704 = vmatprep.mubr.msk.bf16.mxu0 %vm1890_vm1, %v1889_v1  ;;  %v1564_v0 = vcombine.low %v990_v58, %v2149_v59  ;;  %v880_v3 = vsel %vm877_vm6, %v878_v60, %v879_v61  ;;  %v1186_v58 = vshrl.u32 %v2204_v20, 16 }
  0x46   : > { %v1031_v2 = vrot.slane %v1564_v0, 2  ;;  %v1154_v24 = vshll.u32 %v1564_v0, 16 }
  0x48   : > { %v1156_v31 = vrot.slane %v1154_v24, 3 }
  0x4a   : > { %1687 = vmatmul.mubr.msk.bf16.gmra.mrb[24].mxu1 %vm259_vm3, %v1956_v11  ;;  %v905_v11 = vsel %vm275_vm0, %v1556_v12, 0  ;;  %v882_v12 = vsel %vm877_vm6, %v879_v61, %v881_v6 }
  0x4b   : > { %1705 = vmatmul.mubr.msk.bf16.gmra.mrb[24].mxu0 %vm259_vm3, %v453_v63  ;;  %1714 = vmatprep.mubr.msk.bf16.mxu1 %vm1890_vm1, %v1889_v1  ;;  %v1575_v63 = vld [vmem:[%s2336_s1 + $0xe] sm:$0x3] }
  0x4c   : > { %1708 = vmatprep.mubr.msk.bf16.mxu0 %vm1890_vm1, %v1889_v1  ;;  %v1219_v4 = vsel %vm275_vm0, %v1575_v63, 0 }
  0x52   : > { %1715 = vmatmul.mubr.msk.bf16.vlgmr.msra.gmra.mrb[28].mxu1 %vm259_vm3, %v600_v17  ;;  %v884_v17 = vsel %vm877_vm6, %v881_v6, %v883_v14 }
  0x53   : > { %1709 = vmatmul.mubr.msk.bf16.gmra.mrb[28].mxu0 %vm259_vm3, %v455_v10  ;;  %1757 = vmatpush3.bf16.msra.mxu1 %v905_v11  ;;  %v1338_v10 = vsel %vm275_vm0, %v1582_v7, 0  ;;  %v885_v11 = vrot.slane %v1992_v39, 2  ;;  %v1151_v39 = vshrl.u32 %v1564_v0, 16  ;;  %v1880_v0 = vld [vmem:[%s1937_s19 + $0x30] ss:$0 sps:$4 sm:$0x77]  }
  0x54   : > { %1736 = vmatprep.mubr.msk.bf16.mxu0 %vm1890_vm1, %v1889_v1  ;;  %1718 = vmatprep.mubr.msk.bf16.mxu1 %vm1890_vm1, %v1889_v1 }
  0x55   : > { %1800 = vmatprep.subr.bf16.mxu1 %v1889_v1  ;;  %v886_v21 = vsel %vm877_vm6, %v883_v14, %v885_v11  ;;  %v1153_v30 = vrot.slane %v1151_v39, 2  ;;  %v1320_v14 = vrot.slane %v1880_v0, 3 }
  0x57   : > { %v1157_v36 = vor.u32 %v1156_v31, %v1153_v30 }
  0x5a   : > { %1719 = vmatmul.mubr.msk.bf16.gmra.mrb[32].mxu1 %vm259_vm3, %v602_v29  ;;  %v888_v29 = vsel %vm877_vm6, %v885_v11, %v887_v23 }
  0x5b   : > { %1737 = vmatmul.mubr.msk.bf16.vlgmr.msra.gmra.mrb[32].mxu0 %vm259_vm3, %v733_v25  ;;  %1722 = vmatprep.mubr.msk.bf16.mxu1 %vm1890_vm1, %v1889_v1 }
  0x5c   : > { %1779 = vmatpush3.bf16.msra.mxu0 %v1058_v28  ;;  %1740 = vmatprep.mubr.msk.bf16.mxu0 %vm1890_vm1, %v1889_v1  ;;  %v1878_v28 = vld [vmem:[%s1937_s19 + $0x30] ss:$0 sps:$4 sm:$0x33]  }
  0x5d   : > { %1822 = vmatprep.subr.bf16.mxu0 %v1889_v1  ;;  %v1040_v34 = vrot.slane %v1878_v28, 2 }
  0x5f   : > { %v1041_v41 = vsel %vm877_vm6, %v1038_v22, %v1040_v34 }
  0x62   : > { %1723 = vmatmul.mubr.msk.bf16.gmra.mrb[36].mxu1 %vm259_vm3, %v604_v38  ;;  %v1168_v38 = vshrl.u32 %v2177_v9, 16  ;;  %v1318_v9 = vrot.slane %v2204_v20, 3 }
  0x63   : > { %1741 = vmatmul.mubr.msk.bf16.gmra.mrb[36].mxu0 %vm259_vm3, %v742_v35  ;;  %1726 = vmatprep.mubr.msk.bf16.mxu1 %vm1890_vm1, %v1889_v1  ;;  %v1304_v35 = vld [vmem:[%s1937_s19 + $0x8] sm:$0x8] }
  0x64   : > { %1744 = vmatprep.mubr.msk.bf16.mxu0 %vm1890_vm1, %v1889_v1  ;;  %v1583_v42 = vcombine.low %v1304_v35, %v2149_v59  ;;  %v1170_v45 = vrot.slane %v1168_v38, 2  ;;  %v1189_v59 = vshll.u32 %v2204_v20, 16 }
  0x66   : > { %v1311_v48 = vrot.slane %v1583_v42, 3  ;;  %v1174_v50 = vor.u32 %v1173_v47, %v1170_v45  ;;  %v1191_v63 = vrot.slane %v1189_v59, 3 }
  0x68   : > { %v1184_v61 = vsel %vm1149_vm7, %v1174_v50, %v1183_v57 }
  0x6a   : > { %1727 = vmatmul.mubr.msk.bf16.gmra.mrb[40].mxu1 %vm259_vm3, %v606_v49 }
  0x6b   : > { %1745 = vmatmul.mubr.msk.bf16.gmra.mrb[40].mxu0 %vm259_vm3, %v751_v43  ;;  %1730 = vmatprep.mubr.msk.bf16.mxu1 %vm1890_vm1, %v1889_v1 }
  0x6c   : > { %1748 = vmatprep.mubr.msk.bf16.mxu0 %vm1890_vm1, %v1889_v1 }
  0x72   : > { %1731 = vmatmul.mubr.msk.bf16.gmra.mrb[44].mxu1 %vm259_vm3, %v2007_v46  ;;  %v2160_v46 = vld [vmem:[%s1937_s19 + $0x10] sm:$0xff]  }
  0x73   : > { %1749 = vmatmul.mubr.msk.bf16.gmra.mrb[44].mxu0 %vm259_vm3, %v760_v44  ;;  %1758 = vmatprep.mubr.msk.bf16.mxu1 %vm1890_vm1, %v1889_v1  ;;  %v1032_v5 = vrot.slane %v2160_v46, 2  ;;  %v1159_v25 = vshrl.u32 %v2160_v46, 16  ;;  %v1162_v26 = vshll.u32 %v2160_v46, 16  ;;  %v1312_v49 = vrot.slane %v2160_v46, 3 }
  0x74   : > { %1752 = vmatprep.mubr.msk.bf16.mxu0 %vm1890_vm1, %v1889_v1  ;;  %v1316_v46 = vrot.slane %v2191_v16, 3 }
  0x75   : > { %v1033_v8 = vsel %vm877_vm6, %v1031_v2, %v1032_v5  ;;  %v1035_v15 = vsel %vm877_vm6, %v1032_v5, %v1034_v13  ;;  %v1161_v32 = vrot.slane %v1159_v25, 2  ;;  %v1164_v33 = vrot.slane %v1162_v26, 3 }
  0x76   : > { %v1313_v53 = vsel %vm1310_vm8, %v1311_v48, %v1312_v49  ;;  %v1315_v60 = vsel %vm1310_vm8, %v1312_v49, %v1314_v56  ;;  %v1198_v2 = vshll.u32 %v1880_v0, 16  ;;  %v1317_v5 = vsel %vm1310_vm8, %v1314_v56, %v1316_v46 }
  0x77   : > { %v1165_v37 = vor.u32 %v1164_v33, %v1161_v32 }
  0x79   : > { %v1166_v43 = vsel %vm1149_vm7, %v1157_v36, %v1165_v37  ;;  %v1175_v44 = vsel %vm1149_vm7, %v1165_v37, %v1174_v50 }
  0x7a   : > { %1759 = vmatmul.mubr.msk.bf16.vlgmr.msra.gmra.mrb[48].mxu1 %vm259_vm3, %v880_v3 }
  0x7b   : > { %1753 = vmatmul.mubr.msk.bf16.gmra.mrb[48].mxu0 %vm259_vm3, %v769_v62  ;;  %1801 = vmatpush3.bf16.msra.mxu1 %v1219_v4  ;;  %v1188_v62 = vrot.slane %v1186_v58, 2  ;;  %v1195_v4 = vshrl.u32 %v1880_v0, 16 }
  0x7c   : > { %1780 = vmatprep.mubr.msk.bf16.mxu0 %vm1890_vm1, %v1889_v1  ;;  %1762 = vmatprep.mubr.msk.bf16.mxu1 %vm1890_vm1, %v1889_v1 }
  0x7d   : > { %v1192_v3 = vor.u32 %v1191_v63, %v1188_v62  ;;  %v1197_v7 = vrot.slane %v1195_v4, 2 }
  0x7f   : > { %v1193_v6 = vsel %vm1149_vm7, %v1183_v57, %v1192_v3 }
  0x82   : > { %1763 = vmatmul.mubr.msk.bf16.gmra.mrb[52].mxu1 %vm259_vm3, %v882_v12  ;;  %v1319_v12 = vsel %vm1310_vm8, %v1316_v46, %v1318_v9 }
  0x83   : > { %1781 = vmatmul.mubr.msk.bf16.vlgmr.msra.gmra.mrb[52].mxu0 %vm259_vm3, %v1033_v8  ;;  %1766 = vmatprep.mubr.msk.bf16.mxu1 %vm1890_vm1, %v1889_v1  ;;  %v1200_v8 = vrot.slane %v1198_v2, 3 }
  0x84   : > { %1823 = vmatpush3.bf16.msra.mxu0 %v1338_v10  ;;  %1784 = vmatprep.mubr.msk.bf16.mxu0 %vm1890_vm1, %v1889_v1 }
  0x85   : > { %v1201_v10 = vor.u32 %v1200_v8, %v1197_v7 }
  0x87   : > { %v1202_v13 = vsel %vm1149_vm7, %v1192_v3, %v1201_v10 }
  0x8a   : > { %1767 = vmatmul.mubr.msk.bf16.gmra.mrb[56].mxu1 %vm259_vm3, %v884_v17 }
  0x8b   : > { %1785 = vmatmul.mubr.msk.bf16.gmra.mrb[56].mxu0 %vm259_vm3, %v1035_v15  ;;  %1770 = vmatprep.mubr.msk.bf16.mxu1 %vm1890_vm1, %v1889_v1  ;;  %v1321_v15 = vsel %vm1310_vm8, %v1318_v9, %v1320_v14 }
  0x8c   : > { %1788 = vmatprep.mubr.msk.bf16.mxu0 %vm1890_vm1, %v1889_v1 }
  0x92   : > { %1771 = vmatmul.mubr.msk.bf16.gmra.mrb[60].mxu1 %vm259_vm3, %v886_v21 }
  0x93   : > { %1789 = vmatmul.mubr.msk.bf16.gmra.mrb[60].mxu0 %vm259_vm3, %v1037_v19  ;;  %1774 = vmatprep.mubr.msk.bf16.mxu1 %vm1890_vm1, %v1889_v1 }
  0x94   : > { %1792 = vmatprep.mubr.msk.bf16.mxu0 %vm1890_vm1, %v1889_v1 }
  0x9a   : > { %1775 = vmatmul.mubr.msk.bf16.gmra.mrb[64].mxu1 %vm259_vm3, %v888_v29 }
  0x9b   : > { %1793 = vmatmul.mubr.msk.bf16.gmra.mrb[64].mxu0 %vm259_vm3, %v1039_v27  ;;  %1802 = vmatprep.mubr.msk.bf16.mxu1 %vm1890_vm1, %v1889_v1 }
  0x9c   : > { %1796 = vmatprep.mubr.msk.bf16.mxu0 %vm1890_vm1, %v1889_v1 }
  0xa2   : > { %1803 = vmatmul.mubr.msk.bf16.vlgmr.msra.gmra.mrb[68].mxu1 %vm259_vm3, %v1166_v43 }
  0xa3   : > { %1797 = vmatmul.mubr.msk.bf16.gmra.mrb[68].mxu0 %vm259_vm3, %v1041_v41  ;;  %1806 = vmatprep.mubr.msk.bf16.mxu1 %vm1890_vm1, %v1889_v1 }
  0xa4   : > { %1824 = vmatprep.mubr.msk.bf16.mxu0 %vm1890_vm1, %v1889_v1 }
  0xaa   : > { %1807 = vmatmul.mubr.msk.bf16.gmra.mrb[72].mxu1 %vm259_vm3, %v1175_v44 }
  0xab   : > { %1825 = vmatmul.mubr.msk.bf16.vlgmr.msra.gmra.mrb[72].mxu0 %vm259_vm3, %v1313_v53  ;;  %1810 = vmatprep.mubr.msk.bf16.mxu1 %vm1890_vm1, %v1889_v1 }
  0xac   : > { %1828 = vmatprep.mubr.msk.bf16.mxu0 %vm1890_vm1, %v1889_v1 }
  0xb2   : > { %1811 = vmatmul.mubr.msk.bf16.gmra.mrb[76].mxu1 %vm259_vm3, %v1184_v61 }
  0xb3   : > { %1829 = vmatmul.mubr.msk.bf16.gmra.mrb[76].mxu0 %vm259_vm3, %v1315_v60  ;;  %1814 = vmatprep.mubr.msk.bf16.mxu1 %vm1890_vm1, %v1889_v1 }
  0xb4   : > { %1832 = vmatprep.mubr.msk.bf16.mxu0 %vm1890_vm1, %v1889_v1 }
  0xba   : > { %1815 = vmatmul.mubr.msk.bf16.gmra.mrb[80].mxu1 %vm259_vm3, %v1193_v6 }
  0xbb   : > { %1833 = vmatmul.mubr.msk.bf16.gmra.mrb[80].mxu0 %vm259_vm3, %v1317_v5  ;;  %1818 = vmatprep.mubr.msk.bf16.mxu1 %vm1890_vm1, %v1889_v1 }
  0xbc   : > { %1836 = vmatprep.mubr.msk.bf16.mxu0 %vm1890_vm1, %v1889_v1 }
  0xc2   : > { %1819 = vmatmul.mubr.msk.bf16.gmra.mrb[84].mxu1 %vm259_vm3, %v1202_v13 }
  0xc3   : > { %1837 = vmatmul.mubr.msk.bf16.gmra.mrb[84].mxu0 %vm259_vm3, %v1319_v12 }
  0xc4   : > { %1840 = vmatprep.mubr.msk.bf16.mxu0 %vm1890_vm1, %v1889_v1 }
  0xcb   : > { %1841 = vmatmul.mubr.msk.bf16.gmra.mrb[88].mxu0 %vm259_vm3, %v1321_v15 }
  0xed   : > { %v337_v11 = vpop.f32.mrb[0].mxu1 }
  0xee   : > { %v313_v16 = vpop.f32.mrb[0].mxu0  ;;  %v1662_v20 = vpop.f32.mrb[1].mxu1 }
  0xef   : > { %v1650_v17 = vpop.f32.mrb[1].mxu0  ;;  %v340_v21 = vpop.f32.mrb[2].mxu1 }
  0xf0   : > { %v316_v18 = vpop.f32.mrb[2].mxu0  ;;  %v1663_v22 = vpop.f32.mrb[3].mxu1 }
  0xf1   : > { %v1651_v19 = vpop.f32.mrb[3].mxu0 }
  0xf5   : > { %v345_v25 = vpop.f32.mrb[4].mxu1 }
  0xf6   : > { %v321_v23 = vpop.f32.mrb[4].mxu0  ;;  %v1666_v26 = vpop.f32.mrb[5].mxu1 }
  0xf7   : > { %v1654_v39 = vpop.f32.mrb[5].mxu0  ;;  %v348_v27 = vpop.f32.mrb[6].mxu1 }
  0xf8   : > { %v324_v24 = vpop.f32.mrb[6].mxu0  ;;  %v1667_v28 = vpop.f32.mrb[7].mxu1 }
  0xf9   : > { %v1655_v1 = vpop.f32.mrb[7].mxu0 }
  0xfd   : > { %v399_v31 = vpop.f32.mrb[8].mxu1 }
  0xfe   : > { %v329_v29 = vpop.f32.mrb[8].mxu0  ;;  %v400_v33 = vadd.f32 %v399_v31, %v313_v16  ;;  %v1672_v34 = vpop.f32.mrb[9].mxu1 }
  0xff   : > { %v1658_v30 = vpop.f32.mrb[9].mxu0  ;;  %v402_v36 = vpop.f32.mrb[10].mxu1 }
 0x100   : > { %v332_v32 = vpop.f32.mrb[10].mxu0  ;;  %v403_v37 = vadd.f32 %v402_v36, %v316_v18  ;;  %v1673_v38 = vpop.f32.mrb[11].mxu1 }
 0x101   : > { %v1659_v35 = vpop.f32.mrb[11].mxu0 }
 0x105   : > { %v407_v43 = vpop.f32.mrb[12].mxu1 }
 0x106   : > { %v508_v40 = vpop.f32.mrb[12].mxu0  ;;  %v408_v47 = vadd.f32 %v407_v43, %v321_v23  ;;  %v1676_v48 = vpop.f32.mrb[13].mxu1 }
 0x107   : > { %v547_v41 = vadd.f32 %v508_v40, %v400_v33  ;;  %v1694_v42 = vpop.f32.mrb[13].mxu0  ;;  %v410_v51 = vpop.f32.mrb[14].mxu1 }
 0x108   : > { %v511_v45 = vpop.f32.mrb[14].mxu0  ;;  %v411_v52 = vadd.f32 %v410_v51, %v324_v24  ;;  %v1677_v53 = vpop.f32.mrb[15].mxu1 }
 0x109   : > { %v548_v49 = vadd.f32 %v511_v45, %v403_v37  ;;  %v1695_v50 = vpop.f32.mrb[15].mxu0 }
 0x10d   : > { %v415_v56 = vpop.f32.mrb[16].mxu1 }
 0x10e   : > { %v516_v44 = vpop.f32.mrb[16].mxu0  ;;  %v416_v58 = vadd.f32 %v415_v56, %v329_v29  ;;  %v1680_v59 = vpop.f32.mrb[17].mxu1 }
 0x10f   : > { %v549_v54 = vadd.f32 %v516_v44, %v408_v47  ;;  %v1698_v55 = vpop.f32.mrb[17].mxu0  ;;  %v418_v62 = vpop.f32.mrb[18].mxu1 }
 0x110   : > { %v519_v57 = vpop.f32.mrb[18].mxu0  ;;  %v419_v63 = vadd.f32 %v418_v62, %v332_v32  ;;  %v1681_v0 = vpop.f32.mrb[19].mxu1 }
 0x111   : > { %v550_v60 = vadd.f32 %v519_v57, %v411_v52  ;;  %v1699_v61 = vpop.f32.mrb[19].mxu0 }
 0x115   : > { %v423_v2 = vpop.f32.mrb[20].mxu1 }
 0x116   : > { %v524_v46 = vpop.f32.mrb[20].mxu0  ;;  %v424_v6 = vadd.f32 %v423_v2, %v337_v11  ;;  %v1684_v7 = vpop.f32.mrb[21].mxu1 }
 0x117   : > { %v551_v3 = vadd.f32 %v524_v46, %v416_v58  ;;  %v1702_v4 = vpop.f32.mrb[21].mxu0  ;;  %v426_v10 = vpop.f32.mrb[22].mxu1 }
 0x118   : > { %v527_v5 = vpop.f32.mrb[22].mxu0  ;;  %v427_v12 = vadd.f32 %v426_v10, %v340_v21  ;;  %v1685_v13 = vpop.f32.mrb[23].mxu1 }
 0x119   : > { %v552_v8 = vadd.f32 %v527_v5, %v419_v63  ;;  %v1703_v9 = vpop.f32.mrb[23].mxu0 }
 0x11d   : > { %v431_v17 = vpop.f32.mrb[24].mxu1 }
 0x11e   : > { %v532_v14 = vpop.f32.mrb[24].mxu0  ;;  %v432_v19 = vadd.f32 %v431_v17, %v345_v25  ;;  %v1688_v20 = vpop.f32.mrb[25].mxu1 }
 0x11f   : > { %v553_v15 = vadd.f32 %v532_v14, %v424_v6  ;;  %v1706_v16 = vpop.f32.mrb[25].mxu0  ;;  %v434_v39 = vpop.f32.mrb[26].mxu1 }
 0x120   : > { %v535_v18 = vpop.f32.mrb[26].mxu0  ;;  %v435_v24 = vadd.f32 %v434_v39, %v348_v27  ;;  %v1689_v1 = vpop.f32.mrb[27].mxu1 }
 0x121   : > { %v554_v22 = vadd.f32 %v535_v18, %v427_v12  ;;  %v1707_v23 = vpop.f32.mrb[27].mxu0 }
 0x125   : > { %v661_v29 = vpop.f32.mrb[28].mxu1 }
 0x126   : > { %v540_v26 = vpop.f32.mrb[28].mxu0  ;;  %v700_v31 = vadd.f32 %v661_v29, %v547_v41  ;;  %v1716_v21 = vpop.f32.mrb[29].mxu1 }
 0x127   : > { %v555_v11 = vadd.f32 %v540_v26, %v432_v19  ;;  %v1710_v28 = vpop.f32.mrb[29].mxu0  ;;  %v664_v34 = vpop.f32.mrb[30].mxu1 }
 0x128   : > { %v543_v30 = vpop.f32.mrb[30].mxu0  ;;  %v701_v35 = vadd.f32 %v664_v34, %v548_v49  ;;  %v1717_v36 = vpop.f32.mrb[31].mxu1 }
 0x129   : > { %v556_v32 = vadd.f32 %v543_v30, %v435_v24  ;;  %v1711_v33 = vpop.f32.mrb[31].mxu0 }
 0x12d   : > { %v669_v40 = vpop.f32.mrb[32].mxu1 }
 0x12e   : > { %v822_v37 = vpop.f32.mrb[32].mxu0  ;;  %v702_v43 = vadd.f32 %v669_v40, %v549_v54  ;;  %v1720_v27 = vpop.f32.mrb[33].mxu1 }
 0x12f   : > { %v861_v25 = vadd.f32 %v822_v37, %v700_v31  ;;  %v1738_v38 = vpop.f32.mrb[33].mxu0  ;;  %v672_v48 = vpop.f32.mrb[34].mxu1 }
 0x130   : > { %v825_v42 = vpop.f32.mrb[34].mxu0  ;;  %v703_v50 = vadd.f32 %v672_v48, %v550_v60  ;;  %v1721_v51 = vpop.f32.mrb[35].mxu1 }
 0x131   : > { %v862_v45 = vadd.f32 %v825_v42, %v701_v35  ;;  %v1739_v47 = vpop.f32.mrb[35].mxu0 }
 0x135   : > { %v677_v44 = vpop.f32.mrb[36].mxu1 }
 0x136   : > { %v830_v52 = vpop.f32.mrb[36].mxu0  ;;  %v704_v56 = vadd.f32 %v677_v44, %v551_v3  ;;  %v1724_v49 = vpop.f32.mrb[37].mxu1 }
 0x137   : > { %v863_v41 = vadd.f32 %v830_v52, %v702_v43  ;;  %v1742_v53 = vpop.f32.mrb[37].mxu0  ;;  %v680_v59 = vpop.f32.mrb[38].mxu1 }
 0x138   : > { %v833_v55 = vpop.f32.mrb[38].mxu0  ;;  %v705_v61 = vadd.f32 %v680_v59, %v552_v8  ;;  %v1725_v62 = vpop.f32.mrb[39].mxu1 }
 0x139   : > { %v864_v57 = vadd.f32 %v833_v55, %v703_v50  ;;  %v1743_v58 = vpop.f32.mrb[39].mxu0 }
 0x13d   : > { %v685_v46 = vpop.f32.mrb[40].mxu1 }
 0x13e   : > { %v838_v63 = vpop.f32.mrb[40].mxu0  ;;  %v706_v2 = vadd.f32 %v685_v46, %v553_v15  ;;  %v1728_v60 = vpop.f32.mrb[41].mxu1 }
 0x13f   : > { %v865_v54 = vadd.f32 %v838_v63, %v704_v56  ;;  %v1746_v0 = vpop.f32.mrb[41].mxu0  ;;  %v688_v7 = vpop.f32.mrb[42].mxu1 }
 0x140   : > { %v841_v4 = vpop.f32.mrb[42].mxu0  ;;  %v707_v9 = vadd.f32 %v688_v7, %v554_v22  ;;  %v1729_v10 = vpop.f32.mrb[43].mxu1 }
 0x141   : > { %v866_v5 = vadd.f32 %v841_v4, %v705_v61  ;;  %v1747_v6 = vpop.f32.mrb[43].mxu0 }
 0x145   : > { %v693_v14 = vpop.f32.mrb[44].mxu1 }
 0x146   : > { %v846_v12 = vpop.f32.mrb[44].mxu0  ;;  %v708_v17 = vadd.f32 %v693_v14, %v555_v11  ;;  %v1732_v8 = vpop.f32.mrb[45].mxu1 }
 0x147   : > { %v867_v3 = vadd.f32 %v846_v12, %v706_v2  ;;  %v1750_v13 = vpop.f32.mrb[45].mxu0  ;;  %v696_v20 = vpop.f32.mrb[46].mxu1 }
 0x148   : > { %v849_v16 = vpop.f32.mrb[46].mxu0  ;;  %v709_v23 = vadd.f32 %v696_v20, %v556_v32  ;;  %v1733_v39 = vpop.f32.mrb[47].mxu1 }
 0x149   : > { %v868_v18 = vadd.f32 %v849_v16, %v707_v9  ;;  %v1751_v19 = vpop.f32.mrb[47].mxu0 }
 0x14d   : > { %v941_v26 = vpop.f32.mrb[48].mxu1 }
 0x14e   : > { %v854_v24 = vpop.f32.mrb[48].mxu0  ;;  %v980_v29 = vadd.f32 %v941_v26, %v861_v25  ;;  %v1760_v22 = vpop.f32.mrb[49].mxu1 }
 0x14f   : > { %v869_v15 = vadd.f32 %v854_v24, %v708_v17  ;;  %v1754_v1 = vpop.f32.mrb[49].mxu0  ;;  %v944_v21 = vpop.f32.mrb[50].mxu1 }
 0x150   : > { %v857_v28 = vpop.f32.mrb[50].mxu0  ;;  %v981_v33 = vadd.f32 %v944_v21, %v862_v45  ;;  %v1761_v34 = vpop.f32.mrb[51].mxu1 }
 0x151   : > { %v870_v30 = vadd.f32 %v857_v28, %v709_v23  ;;  %v1755_v31 = vpop.f32.mrb[51].mxu0 }
 0x155   : > { %v949_v37 = vpop.f32.mrb[52].mxu1 }
 0x156   : > { %v1094_v35 = vpop.f32.mrb[52].mxu0  ;;  %v982_v40 = vadd.f32 %v949_v37, %v863_v41  ;;  %v1764_v32 = vpop.f32.mrb[53].mxu1 }
 0x157   : > { %v1133_v11 = vadd.f32 %v1094_v35, %v980_v29  ;;  %v1782_v36 = vpop.f32.mrb[53].mxu0  ;;  %v952_v27 = vpop.f32.mrb[54].mxu1 }
 0x158   : > { %v1097_v38 = vpop.f32.mrb[54].mxu0  ;;  %v983_v47 = vadd.f32 %v952_v27, %v864_v57  ;;  %v1765_v48 = vpop.f32.mrb[55].mxu1 }
 0x159   : > { %v1134_v42 = vadd.f32 %v1097_v38, %v981_v33  ;;  %v1783_v43 = vpop.f32.mrb[55].mxu0 }
 0x15d   : > { %v957_v52 = vpop.f32.mrb[56].mxu1 }
 0x15e   : > { %v1102_v50 = vpop.f32.mrb[56].mxu0  ;;  %v984_v44 = vadd.f32 %v957_v52, %v865_v54  ;;  %v1768_v45 = vpop.f32.mrb[57].mxu1 }
 0x15f   : > { %v1135_v25 = vadd.f32 %v1102_v50, %v982_v40  ;;  %v1786_v51 = vpop.f32.mrb[57].mxu0  ;;  %v960_v49 = vpop.f32.mrb[58].mxu1 }
 0x160   : > { %v1105_v53 = vpop.f32.mrb[58].mxu0  ;;  %v985_v58 = vadd.f32 %v960_v49, %v866_v5  ;;  %v1769_v59 = vpop.f32.mrb[59].mxu1 }
 0x161   : > { %v1136_v55 = vadd.f32 %v1105_v53, %v983_v47  ;;  %v1787_v56 = vpop.f32.mrb[59].mxu0 }
 0x165   : > { %v965_v63 = vpop.f32.mrb[60].mxu1 }
 0x166   : > { %v1110_v61 = vpop.f32.mrb[60].mxu0  ;;  %v986_v46 = vadd.f32 %v965_v63, %v867_v3  ;;  %v1772_v57 = vpop.f32.mrb[61].mxu1 }
 0x167   : > { %v1137_v41 = vadd.f32 %v1110_v61, %v984_v44  ;;  %v1790_v62 = vpop.f32.mrb[61].mxu0  ;;  %v968_v60 = vpop.f32.mrb[62].mxu1 }
 0x168   : > { %v1113_v0 = vpop.f32.mrb[62].mxu0  ;;  %v987_v6 = vadd.f32 %v968_v60, %v868_v18  ;;  %v1773_v7 = vpop.f32.mrb[63].mxu1 }
 0x169   : > { %v1138_v4 = vadd.f32 %v1113_v0, %v985_v58  ;;  %v1791_v2 = vpop.f32.mrb[63].mxu0 }
 0x16d   : > { %v973_v12 = vpop.f32.mrb[64].mxu1 }
 0x16e   : > { %v1118_v9 = vpop.f32.mrb[64].mxu0  ;;  %v988_v5 = vadd.f32 %v973_v12, %v869_v15  ;;  %v1776_v14 = vpop.f32.mrb[65].mxu1 }
 0x16f   : > { %v2279_v54 = vadd.f32 %v1118_v9, %v986_v46  ;;  %v1794_v10 = vpop.f32.mrb[65].mxu0  ;;  %v976_v8 = vpop.f32.mrb[66].mxu1 }
 0x170   : > { %v1121_v13 = vpop.f32.mrb[66].mxu0  ;;  %v989_v3 = vadd.f32 %v976_v8, %v870_v30  ;;  %v1777_v19 = vpop.f32.mrb[67].mxu1  ;;  %v2291_v30 = vld [vmem:[%s2337_s2] ss:$0 sm:$0xff] }
 0x171   : > { %v2281_v16 = vadd.f32 %v1121_v13, %v987_v6  ;;  %v1795_v17 = vpop.f32.mrb[67].mxu0 }
 0x175   : > { %v1255_v39 = vpop.f32.mrb[68].mxu1 }
 0x176   : > { %v1126_v20 = vpop.f32.mrb[68].mxu0  ;;  %v1294_v1 = vadd.f32 %v1255_v39, %v1133_v11  ;;  %v1804_v26 = vpop.f32.mrb[69].mxu1 }
 0x177   : > { %v2283_v23 = vadd.f32 %v1126_v20, %v988_v5  ;;  %v1798_v18 = vpop.f32.mrb[69].mxu0  ;;  %v1258_v15 = vpop.f32.mrb[70].mxu1 }
 0x178   : > { %v1129_v24 = vpop.f32.mrb[70].mxu0  ;;  %v1295_v22 = vadd.f32 %v1258_v15, %v1134_v42  ;;  %v1805_v31 = vpop.f32.mrb[71].mxu1 }
 0x179   : > { %v2285_v28 = vadd.f32 %v1129_v24, %v989_v3  ;;  %v1799_v29 = vpop.f32.mrb[71].mxu0 }
 0x17d   : > { %v1263_v35 = vpop.f32.mrb[72].mxu1 }
 0x17e   : > { %v1374_v21 = vpop.f32.mrb[72].mxu0  ;;  %v1296_v36 = vadd.f32 %v1263_v35, %v1135_v25  ;;  %v1808_v38 = vpop.f32.mrb[73].mxu1 }
 0x17f   : > { %v1413_v33 = vadd.f32 %v1374_v21, %v1294_v1  ;;  %v1826_v34 = vpop.f32.mrb[73].mxu0  ;;  %v1266_v42 = vpop.f32.mrb[74].mxu1 }
 0x180   : > { %v1377_v11 = vpop.f32.mrb[74].mxu0  ;;  %v1297_v43 = vadd.f32 %v1266_v42, %v1136_v55  ;;  %v1809_v47 = vpop.f32.mrb[75].mxu1 }
 0x181   : > { %v1430_v37 = vadd.f32 %v2291_v30, %v1413_v33  ;;  %v1414_v40 = vadd.f32 %v1377_v11, %v1295_v22  ;;  %v1827_v32 = vpop.f32.mrb[75].mxu0 }
 0x183   : > { %1441 = vst.msk [vmem:[%s2296_s16] sm:$0xff] %vm1440_vm9, %v1430_v37  ;;  %v1431_v27 = vadd.f32 %v2291_v30, %v1414_v40 }
 0x185   : > { %1442 = vst.msk [vmem:[%s2296_s16 + $0x8] sm:$0xff] %vm1440_vm9, %v1431_v27  ;;  %v1271_v25 = vpop.f32.mrb[76].mxu1 }
 0x186   : > { %v1382_v48 = vpop.f32.mrb[76].mxu0  ;;  %v1298_v53 = vadd.f32 %v1271_v25, %v1137_v41  ;;  %v1812_v45 = vpop.f32.mrb[77].mxu1 }
 0x187   : > { %v1415_v50 = vadd.f32 %v1382_v48, %v1296_v36  ;;  %v1830_v51 = vpop.f32.mrb[77].mxu0  ;;  %v1274_v58 = vpop.f32.mrb[78].mxu1 }
 0x188   : > { %v1385_v52 = vpop.f32.mrb[78].mxu0  ;;  %v1299_v55 = vadd.f32 %v1274_v58, %v1138_v4  ;;  %v1813_v61 = vpop.f32.mrb[79].mxu1 }
 0x189   : > { %v1432_v44 = vadd.f32 %v2291_v30, %v1415_v50  ;;  %v1416_v56 = vadd.f32 %v1385_v52, %v1297_v43  ;;  %v1831_v49 = vpop.f32.mrb[79].mxu0 }
 0x18b   : > { %1443 = vst.msk [vmem:[%s2296_s16 + $0x10] sm:$0xff] %vm1440_vm9, %v1432_v44  ;;  %v1433_v59 = vadd.f32 %v2291_v30, %v1416_v56 }
 0x18d   : > { %1444 = vst.msk [vmem:[%s2296_s16 + $0x18] sm:$0xff] %vm1440_vm9, %v1433_v59  ;;  %v1279_v41 = vpop.f32.mrb[80].mxu1 }
 0x18e   : > { %v1390_v62 = vpop.f32.mrb[80].mxu0  ;;  %v1300_v57 = vadd.f32 %v1279_v41, %v2279_v54  ;;  %v1816_v60 = vpop.f32.mrb[81].mxu1 }
 0x18f   : > { %v1417_v63 = vadd.f32 %v1390_v62, %v1298_v53  ;;  %v1834_v0 = vpop.f32.mrb[81].mxu0  ;;  %v1282_v9 = vpop.f32.mrb[82].mxu1 }
 0x190   : > { %v1393_v46 = vpop.f32.mrb[82].mxu0  ;;  %v1301_v4 = vadd.f32 %v1282_v9, %v2281_v16  ;;  %v1817_v12 = vpop.f32.mrb[83].mxu1 }
 0x191   : > { %v1434_v2 = vadd.f32 %v2291_v30, %v1417_v63  ;;  %v1418_v6 = vadd.f32 %v1393_v46, %v1299_v55  ;;  %v1835_v7 = vpop.f32.mrb[83].mxu0 }
 0x193   : > { %1445 = vst.msk [vmem:[%s2296_s16 + $0x20] sm:$0xff] %vm1440_vm9, %v1434_v2  ;;  %v1435_v10 = vadd.f32 %v2291_v30, %v1418_v6 }
 0x195   : > { %1446 = vst.msk [vmem:[%s2296_s16 + $0x28] sm:$0xff] %vm1440_vm9, %v1435_v10  ;;  %v1287_v14 = vpop.f32.mrb[84].mxu1 }
 0x196   : > { %v1398_v13 = vpop.f32.mrb[84].mxu0  ;;  %v1302_v8 = vadd.f32 %v1287_v14, %v2283_v23  ;;  %v1820_v19 = vpop.f32.mrb[85].mxu1 }
 0x197   : > { %v1419_v5 = vadd.f32 %v1398_v13, %v1300_v57  ;;  %v1838_v54 = vpop.f32.mrb[85].mxu0  ;;  %v1290_v16 = vpop.f32.mrb[86].mxu1 }
 0x198   : > { %v1401_v17 = vpop.f32.mrb[86].mxu0  ;;  %v1303_v39 = vadd.f32 %v1290_v16, %v2285_v28  ;;  %v1821_v1 = vpop.f32.mrb[87].mxu1 }
 0x199   : > { %v1436_v3 = vadd.f32 %v2291_v30, %v1419_v5  ;;  %v1420_v20 = vadd.f32 %v1401_v17, %v1301_v4  ;;  %v1839_v18 = vpop.f32.mrb[87].mxu0 }
 0x19b   : > { %1447 = vst.msk [vmem:[%s2296_s16 + $0x30] sm:$0xff] %vm1440_vm9, %v1436_v3  ;;  %v1437_v24 = vadd.f32 %v2291_v30, %v1420_v20 }
 0x19d   : > { %1448 = vst.msk [vmem:[%s2296_s16 + $0x38] sm:$0xff] %vm1440_vm9, %v1437_v24 }
 0x19e   : > { %v1406_v26 = vpop.f32.mrb[88].mxu0 }
 0x19f   : > { %v1421_v29 = vadd.f32 %v1406_v26, %v1302_v8  ;;  %v1842_v23 = vpop.f32.mrb[89].mxu0 }
 0x1a0   : > { %v1409_v15 = vpop.f32.mrb[90].mxu0 }
 0x1a1   : > { %v1438_v22 = vadd.f32 %v2291_v30, %v1421_v29  ;;  %v1422_v31 = vadd.f32 %v1409_v15, %v1303_v39  ;;  %v1843_v21 = vpop.f32.mrb[91].mxu0 }
 0x1a3   : > { %1449 = vst.msk [vmem:[%s2296_s16 + $0x40] sm:$0xff] %vm1440_vm9, %v1438_v22  ;;  %v1439_v33 = vadd.f32 %v2291_v30, %v1422_v31 }
 0x1a5   : > { %1450 = vst.msk [vmem:[%s2296_s16 + $0x48] sm:$0xff] %vm1440_vm9, %v1439_v33 }
 0x1a6 PF: > { %s13_s12 = sadd.s32 1, %s1887_s12  }
 0x1a7   : > { %p10_p4 = scmp.ge.s32.totalorder %s13_s12, 4  }
 0x1a9   :  { %12 = sbr.rel (!%p10_p4) target bundleno = 1 (0x1), region = 70 }

// kernel: eoct_conv_forward.8
= control target key start
LH: loop header
LB: loop body
LE: loop exit
PB: predicated region body
PF: predicated region fallthrough
CT: control target
= control target key end

     0   :  { %s1996_s15 = smov 0   ;;  %s2441_s0 = inlined_call_operand.vmem [shape: bf16[2,110,8], index: 0, kind: input, shape index: {}]   ;;  %s2442_s1 = inlined_call_operand.vmem [shape: bf16[9,8,4], index: 1, kind: input, shape index: {}]   ;;  %s2443_s2 = inlined_call_operand.vmem [shape: f32[1,4], index: 2, kind: input, shape index: {}]   ;;  %s2444_s3 = inlined_call_operand.vmem [shape: f32[2,80,4], index: 3, kind: input, shape index: {}]   ;;  %s2445_s4 = inlined_call_operand.vmem [shape: f32[2,80,4], index: 4, kind: output, shape index: {}]  }
   0x1 LB: > { %s1585_s16 = sadd.s32 4294967295, %s1967_s15   ;;  %p1589_p0 = scmp.ge.s32.totalorder %s1967_s15, 1  ;;  %s1967_s15 = sphi %s1996_s15, %s14_s15  }
   0x2   : > { %p172_p1 = scmp.lt.s32.totalorder %s1967_s15, 3 }
   0x4   : > { %p173_p2 = pnand %p1589_p0, %p172_p1 }
   0x5   : > { %v1593_v0 = vld [vmem:[%s2442_s1 + $0x4] sm:$0xf] (!%p173_p2)  ;;  %vm322_vm0 = vcmask (!%p173_p2), 1043456   ;;  %p203_p3 = scmp.lt.s32.totalorder (!%p173_p2), %s1585_s16, 1  ;;  %v1969_v1 = vmov (!%p173_p2), 0.0   ;;  %vm1970_vm1 = vmmov (!%p173_p2), 0  }
   0x6   : > { %176 = sbr.rel (%p173_p2) target bundleno = 424 (0x1a8), region = 36  ;;  %1726 = vmatprep.subr.bf16.mxu0 (!%p173_p2), %v1969_v1  ;;  %1924 = vmatprep.subr.bf16.mxu1 (!%p173_p2), %v1969_v1  ;;  %v324_v2 = vsel (!%p173_p2), %vm322_vm0, %v1593_v0, 0  ;;  %vm261_vm2 = vsmask.f32 (!%p173_p2), 7424  ;;  %v1610_v13 = vld [vmem:[%s2442_s1 + $0x8] sm:$0xf] (!%p173_p2) }
   0x7   : > { %1727 = vmatpush3.bf16.msra.mxu0 (!%p173_p2), %v324_v2  ;;  %1925 = vmatpush3.bf16.msra.mxu1 (!%p173_p2), %v324_v2  ;;  %vm306_vm3 = vcmask (!%p173_p2), 64512   ;;  %v229_v22 = vld [vmem:[%s2442_s1] sm:$0xf] (!%p173_p2)  ;;  %v519_v26 = vsel (!%p173_p2), %vm322_vm0, %v1610_v13, 0  ;;  %vm491_vm4 = vcmask (!%p173_p2), 1046528   ;;  %vm924_vm6 = vcmask (!%p173_p2), 1045504  }
   0x8   : > { %1728 = vmatprep.mubr.msk.bf16.mxu0 (!%p173_p2), %vm1970_vm1, %v1969_v1  ;;  %1740 = vmatprep.mubr.msk.bf16.mxu1 (!%p173_p2), %vm1970_vm1, %v1969_v1  ;;  %v410_v31 = vsel (!%p173_p2), %vm322_vm0, %v229_v22, 0  ;;  %v1617_v48 = vld [vmem:[%s2442_s1 + $0xc] sm:$0xf] (!%p173_p2)  ;;  %v1629_v53 = vld [vmem:[%s2442_s1 + $0x10] sm:$0xf] (!%p173_p2)  ;;  %vm1357_vm8 = vcmask (!%p173_p2), 1044480  }
   0x9   : > { %1770 = vmatprep.subr.bf16.mxu0 (!%p173_p2), %v1969_v1  ;;  %1748 = vmatprep.subr.bf16.mxu1 (!%p173_p2), %v1969_v1  ;;  %v672_v50 = vsel (!%p173_p2), %vm322_vm0, %v1617_v48, 0  ;;  %v833_v55 = vsel (!%p173_p2), %vm322_vm0, %v1629_v53, 0  ;;  %vm763_vm5 = vsmask.f32 (!%p173_p2), 6400  ;;  %vm1196_vm7 = vsmask.f32 (!%p173_p2), 5376 }
   0xa   : > { %vm1507_vm9 = vcmask (!%p173_p2), 31744  }
   0xd   : > { %s2447_s16 = smov (!%p203_p3, %s1585_s16), 1 }
   0xe   : > { %s1926_s19 = smul.u32 56, %s2447_s16 }
   0xf   : > { %s1927_s13 = smul.u32 80, %s2447_s16 }
  0x10   : > { %s2022_s22 = scalar_lea.vmem %s2441_s0, %s1926_s19 }
  0x11   : > { %v219_v3 = vld [vmem:[%s2022_s22] sm:$0xf]  ;;  %v2026_v4 = vld [vmem:[%s2022_s22 + $0x4] sm:$0xf]  ;;  %v2032_v6 = vld [vmem:[%s2022_s22 + $0x8] sm:$0xff]   ;;  %s2380_s18 = scalar_lea.vmem %s2444_s3, %s1927_s13 }
  0x12   : > { %v2029_v5 = vcombine.low %v219_v3, %v2026_v4  ;;  %v270_v9 = vshll.u32 %v2032_v6, 16  ;;  %v2038_v10 = vld [vmem:[%s2022_s22 + $0x18] sm:$0xff]   ;;  %v2041_v11 = vld [vmem:[%s2022_s22 + $0x20] sm:$0xff]   ;;  %v2044_v12 = vld [vmem:[%s2022_s22 + $0x10] sm:$0xff]   ;;  %v274_v23 = vshrl.u32 %v2032_v6, 16  ;;  %v493_v52 = vrot.slane %v2032_v6, 1 }
  0x13   : > { %v286_v16 = vshll.u32 %v2038_v10, 16  ;;  %v290_v17 = vshrl.u32 %v2038_v10, 16  ;;  %v294_v18 = vshll.u32 %v2041_v11, 16  ;;  %v2053_v19 = vld [vmem:[%s2022_s22 + $0x28] ss:$0 sps:$4 sm:$0x11]  }
  0x14   : > { %v263_v7 = vshrl.u32 %v2029_v5, 16  ;;  %v265_v8 = vshll.u32 %v2029_v5, 16  ;;  %v272_v15 = vrot.slane %v270_v9, 1  ;;  %v278_v24 = vshll.u32 %v2044_v12, 16  ;;  %v2077_v39 = vld [vmem:[%s2022_s22 + $0x24] sm:$0xff]   ;;  %v2148_v2 = vld [vmem:[%s2022_s22 + $0xc] sm:$0xff]  }
  0x15   : > { %v288_v21 = vrot.slane %v286_v16, 1  ;;  %v296_v25 = vrot.slane %v294_v18, 1  ;;  %v298_v29 = vshrl.u32 %v2041_v11, 16  ;;  %v302_v30 = vshll.u32 %v2053_v19, 16  ;;  %v485_v43 = vld [vmem:[%s2022_s22] sm:$0xe] }
  0x16   : > { %v267_v14 = vrot.slane %v265_v8, 1  ;;  %v276_v33 = vor.u32 %v274_v23, %v272_v15  ;;  %v280_v34 = vrot.slane %v278_v24, 1  ;;  %v282_v38 = vshrl.u32 %v2044_v12, 16  ;;  %v1950_v40 = vld [vmem:[%s2022_s22 + $0x2c] ss:$0 sps:$4 sm:$0x11]  }
  0x17   : > { %v292_v28 = vor.u32 %v290_v17, %v288_v21  ;;  %v300_v35 = vor.u32 %v298_v29, %v296_v25  ;;  %v304_v36 = vrot.slane %v302_v30, 1  ;;  %v652_v44 = vrot.slane %v2077_v39, 1  ;;  %v604_v61 = vld [vmem:[%s2022_s22 + $0x4] sm:$0xe]  ;;  %v2143_v62 = vld [vmem:[%s2022_s22 + $0x8] sm:$0xf] }
  0x18   : > { %v268_v20 = vor.u32 %v267_v14, %v263_v7  ;;  %v281_v37 = vsel %vm261_vm2, %v276_v33, %v280_v34  ;;  %v284_v42 = vor.u32 %v282_v38, %v280_v34  ;;  %v654_v45 = vrot.slane %v1950_v40, 1  ;;  %v2167_v18 = vld [vmem:[%s2022_s22 + $0x14] sm:$0xff]   ;;  %v2187_v30 = vld [vmem:[%s2022_s22 + $0x1c] sm:$0xff]   ;;  %v2211_v48 = vld [vmem:[%s2022_s22 + $0x2c] ss:$0 sps:$4 sm:$0x33]  }
  0x19   : > { %v297_v32 = vsel %vm261_vm2, %v292_v28, %v296_v25  ;;  %v305_v41 = vsel %vm261_vm2, %v300_v35, %v304_v36  ;;  %v1611_v49 = vcombine.low %v485_v43, %v2026_v4  ;;  %v495_v56 = vrot.slane %v2044_v12, 1  ;;  %v1643_v24 = vld [vmem:[%s2442_s1 + $0x18] sm:$0xf]  ;;  %v918_v53 = vld [vmem:[%s2022_s22 + $0x4] sm:$0xc] }
  0x1a   : > { %v273_v27 = vsel %vm261_vm2, %v268_v20, %v272_v15  ;;  %1741 = vmatmul.mubr.msk.bf16.vlgmr.msra.gmra.mrb[0].mxu1 %vm306_vm3, %v297_v32  ;;  %v2092_v46 = vsel %vm491_vm4, %v652_v44, %v654_v45  ;;  %v289_v47 = vsel %vm261_vm2, %v284_v42, %v288_v21  ;;  %v497_v58 = vrot.slane %v2038_v10, 1 }
  0x1b   : > { %1729 = vmatmul.mubr.msk.bf16.vlgmr.msra.gmra.mrb[0].mxu0 %vm306_vm3, %v273_v27  ;;  %1749 = vmatpush3.bf16.msra.mxu1 %v410_v31  ;;  %v492_v51 = vrot.slane %v1611_v49, 1  ;;  %v496_v57 = vsel %vm491_vm4, %v493_v52, %v495_v56  ;;  %v499_v60 = vrot.slane %v2041_v11, 1  ;;  %v1618_v0 = vcombine.low %v604_v61, %v2143_v62 }
  0x1c   : > { %1771 = vmatpush3.bf16.msra.mxu0 %v519_v26  ;;  %1732 = vmatprep.mubr.msk.bf16.mxu0 %vm1970_vm1, %v1969_v1  ;;  %v498_v59 = vsel %vm491_vm4, %v495_v56, %v497_v58  ;;  %v501_v3 = vrot.slane %v2053_v19, 1  ;;  %v776_v7 = vshll.u32 %v2148_v2, 16  ;;  %v646_v9 = vrot.slane %v2148_v2, 1 }
  0x1d   : > { %1814 = vmatprep.subr.bf16.mxu0 %v1969_v1  ;;  %1744 = vmatprep.mubr.msk.bf16.mxu1 %vm1970_vm1, %v1969_v1  ;;  %v494_v54 = vsel %vm491_vm4, %v492_v51, %v493_v52  ;;  %v500_v63 = vsel %vm491_vm4, %v497_v58, %v499_v60  ;;  %v765_v4 = vshrl.u32 %v1618_v0, 16  ;;  %v645_v8 = vrot.slane %v1618_v0, 1  ;;  %v1037_v58 = vld [vmem:[%s2022_s22 + $0x8] sm:$0xc] }
  0x1e   : > { %1792 = vmatprep.subr.bf16.mxu1 %v1969_v1  ;;  %v778_v16 = vrot.slane %v776_v7, 2  ;;  %v782_v21 = vshrl.u32 %v2167_v18, 16  ;;  %v785_v22 = vshll.u32 %v2167_v18, 16  ;;  %v648_v23 = vrot.slane %v2167_v18, 1  ;;  %v1662_v7 = vld [vmem:[%s2442_s1 + $0x20] sm:$0xf] }
  0x1f   : > { %v767_v13 = vrot.slane %v765_v4, 1  ;;  %v647_v17 = vsel %vm491_vm4, %v645_v8, %v646_v9  ;;  %v1105_v28 = vsel %vm322_vm0, %v1643_v24, 0  ;;  %v791_v32 = vshrl.u32 %v2187_v30, 16 }
  0x20   : > { %v784_v26 = vrot.slane %v782_v21, 1  ;;  %v787_v27 = vrot.slane %v785_v22, 2  ;;  %v649_v29 = vsel %vm491_vm4, %v646_v9, %v648_v23  ;;  %v794_v33 = vshll.u32 %v2187_v30, 16  ;;  %v2262_v9 = vld [vmem:[%s2022_s22 + $0x18] sm:$0xff]  }
  0x21   : > { %v650_v34 = vrot.slane %v2187_v30, 1  ;;  %v793_v36 = vrot.slane %v791_v32, 1  ;;  %v803_v42 = vshll.u32 %v2077_v39, 16  ;;  %v809_v51 = vshrl.u32 %v2211_v48, 16 }
  0x22   : > { %1745 = vmatmul.mubr.msk.bf16.gmra.mrb[4].mxu1 %vm306_vm3, %v305_v41  ;;  %v788_v31 = vor.u32 %v787_v27, %v784_v26  ;;  %v800_v41 = vshrl.u32 %v2077_v39, 16  ;;  %v812_v52 = vshll.u32 %v2211_v48, 16  ;;  %v1637_v56 = vcombine.low %v918_v53, %v2143_v62 }
  0x23   : > { %1733 = vmatmul.mubr.msk.bf16.gmra.mrb[4].mxu0 %vm306_vm3, %v281_v37  ;;  %1750 = vmatprep.mubr.msk.bf16.mxu1 %vm1970_vm1, %v1969_v1  ;;  %v796_v37 = vrot.slane %v794_v33, 2  ;;  %v651_v38 = vsel %vm491_vm4, %v648_v23, %v650_v34  ;;  %v653_v49 = vsel %vm491_vm4, %v650_v34, %v652_v44  ;;  %v926_v61 = vrot.slane %v2148_v2, 2 }
  0x24   : > { %1736 = vmatprep.mubr.msk.bf16.mxu0 %vm1970_vm1, %v1969_v1  ;;  %v802_v45 = vrot.slane %v800_v41, 1  ;;  %v934_v23 = vrot.slane %v2211_v48, 2 }
  0x25   : > { %v797_v40 = vor.u32 %v796_v37, %v793_v36 }
  0x27   : > { %v798_v43 = vsel %vm763_vm5, %v788_v31, %v797_v40 }
  0x2a   : > { %1751 = vmatmul.mubr.msk.bf16.vlgmr.msra.gmra.mrb[8].mxu1 %vm306_vm3, %v2029_v5  ;;  %v768_v5 = vshll.u32 %v1618_v0, 16 }
  0x2b   : > { %1737 = vmatmul.mubr.msk.bf16.gmra.mrb[8].mxu0 %vm306_vm3, %v289_v47  ;;  %1793 = vmatpush3.bf16.msra.mxu1 %v672_v50  ;;  %v805_v47 = vrot.slane %v803_v42, 2 }
  0x2c   : > { %1772 = vmatprep.mubr.msk.bf16.mxu0 %vm1970_vm1, %v1969_v1  ;;  %1754 = vmatprep.mubr.msk.bf16.mxu1 %vm1970_vm1, %v1969_v1  ;;  %v770_v14 = vrot.slane %v768_v5, 2 }
  0x2d   : > { %1836 = vmatprep.subr.bf16.mxu1 %v1969_v1  ;;  %v806_v50 = vor.u32 %v805_v47, %v802_v45 }
  0x2e   : > { %v771_v19 = vor.u32 %v770_v14, %v767_v13  ;;  %v1081_v13 = vrot.slane %v2262_v9, 2  ;;  %v930_v14 = vrot.slane %v2187_v30, 2 }
  0x2f   : > { %v807_v44 = vsel %vm763_vm5, %v797_v40, %v806_v50  ;;  %v1218_v40 = vshll.u32 %v2262_v9, 16 }
  0x31   : > { %v1220_v47 = vrot.slane %v1218_v40, 3 }
  0x32   : > { %1755 = vmatmul.mubr.msk.bf16.gmra.mrb[12].mxu1 %vm306_vm3, %v2032_v6  ;;  %v773_v6 = vshrl.u32 %v2148_v2, 16 }
  0x33   : > { %1773 = vmatmul.mubr.msk.bf16.vlgmr.msra.gmra.mrb[12].mxu0 %vm306_vm3, %v494_v54  ;;  %1758 = vmatprep.mubr.msk.bf16.mxu1 %vm1970_vm1, %v1969_v1  ;;  %v811_v54 = vrot.slane %v809_v51, 1 }
  0x34   : > { %1815 = vmatpush3.bf16.msra.mxu0 %v833_v55  ;;  %1776 = vmatprep.mubr.msk.bf16.mxu0 %vm1970_vm1, %v1969_v1  ;;  %v775_v15 = vrot.slane %v773_v6, 1  ;;  %v814_v55 = vrot.slane %v812_v52, 2  ;;  %v928_v6 = vrot.slane %v2167_v18, 2 }
  0x35   : > { %1858 = vmatprep.subr.bf16.mxu0 %v1969_v1 }
  0x36   : > { %v779_v20 = vor.u32 %v778_v16, %v775_v15  ;;  %v2276_v16 = vld [vmem:[%s2022_s22 + $0x20] sm:$0xff]  }
  0x37   : > { %v1083_v18 = vrot.slane %v2276_v16, 2  ;;  %v1224_v51 = vshrl.u32 %v2276_v16, 16  ;;  %v1227_v52 = vshll.u32 %v2276_v16, 16 }
  0x38   : > { %v780_v25 = vsel %vm763_vm5, %v771_v19, %v779_v20  ;;  %v789_v35 = vsel %vm763_vm5, %v779_v20, %v788_v31  ;;  %v2289_v20 = vld [vmem:[%s2022_s22 + $0x28] sm:$0xff]  }
  0x39   : > { %v1084_v19 = vsel %vm924_vm6, %v1081_v13, %v1083_v18  ;;  %v1085_v22 = vrot.slane %v2289_v20, 2 }
  0x3a   : > { %1759 = vmatmul.mubr.msk.bf16.gmra.mrb[16].mxu1 %vm306_vm3, %v2044_v12  ;;  %v1636_v12 = vld [vmem:[%s2442_s1 + $0x14] sm:$0xf] }
  0x3b   : > { %1777 = vmatmul.mubr.msk.bf16.gmra.mrb[16].mxu0 %vm306_vm3, %v496_v57  ;;  %1762 = vmatprep.mubr.msk.bf16.mxu1 %vm1970_vm1, %v1969_v1  ;;  %v815_v57 = vor.u32 %v814_v55, %v811_v54  ;;  %v1086_v27 = vsel %vm924_vm6, %v1083_v18, %v1085_v22  ;;  %v1226_v54 = vrot.slane %v1224_v51, 2  ;;  %v1229_v55 = vrot.slane %v1227_v52, 3 }
  0x3c   : > { %1780 = vmatprep.mubr.msk.bf16.mxu0 %vm1970_vm1, %v1969_v1 }
  0x3d   : > { %v816_v62 = vsel %vm763_vm5, %v806_v50, %v815_v57  ;;  %v1230_v57 = vor.u32 %v1229_v55, %v1226_v54 }
  0x42   : > { %1763 = vmatmul.mubr.msk.bf16.gmra.mrb[20].mxu1 %vm306_vm3, %v2038_v10  ;;  %v502_v10 = vsel %vm491_vm4, %v499_v60, %v501_v3  ;;  %v925_v60 = vrot.slane %v1637_v56, 2  ;;  %v1361_v56 = vrot.slane %v2262_v9, 3 }
  0x43   : > { %1781 = vmatmul.mubr.msk.bf16.gmra.mrb[20].mxu0 %vm306_vm3, %v498_v59  ;;  %1766 = vmatprep.mubr.msk.bf16.mxu1 %vm1970_vm1, %v1969_v1  ;;  %v2234_v59 = vld [vmem:[%s2022_s22 + $0xc] sm:$0xf] }
  0x44   : > { %1784 = vmatprep.mubr.msk.bf16.mxu0 %vm1970_vm1, %v1969_v1  ;;  %v1644_v0 = vcombine.low %v1037_v58, %v2234_v59  ;;  %v927_v3 = vsel %vm924_vm6, %v925_v60, %v926_v61  ;;  %v1233_v58 = vshrl.u32 %v2289_v20, 16 }
  0x46   : > { %v1078_v2 = vrot.slane %v1644_v0, 2  ;;  %v1201_v24 = vshll.u32 %v1644_v0, 16 }
  0x48   : > { %v1203_v31 = vrot.slane %v1201_v24, 3 }
  0x4a   : > { %1767 = vmatmul.mubr.msk.bf16.gmra.mrb[24].mxu1 %vm306_vm3, %v2041_v11  ;;  %v952_v11 = vsel %vm322_vm0, %v1636_v12, 0  ;;  %v929_v12 = vsel %vm924_vm6, %v926_v61, %v928_v6 }
  0x4b   : > { %1785 = vmatmul.mubr.msk.bf16.gmra.mrb[24].mxu0 %vm306_vm3, %v500_v63  ;;  %1794 = vmatprep.mubr.msk.bf16.mxu1 %vm1970_vm1, %v1969_v1  ;;  %v1655_v63 = vld [vmem:[%s2442_s1 + $0x1c] sm:$0xf] }
  0x4c   : > { %1788 = vmatprep.mubr.msk.bf16.mxu0 %vm1970_vm1, %v1969_v1  ;;  %v1266_v4 = vsel %vm322_vm0, %v1655_v63, 0 }
  0x52   : > { %1795 = vmatmul.mubr.msk.bf16.vlgmr.msra.gmra.mrb[28].mxu1 %vm306_vm3, %v647_v17  ;;  %v931_v17 = vsel %vm924_vm6, %v928_v6, %v930_v14 }
  0x53   : > { %1789 = vmatmul.mubr.msk.bf16.gmra.mrb[28].mxu0 %vm306_vm3, %v502_v10  ;;  %1837 = vmatpush3.bf16.msra.mxu1 %v952_v11  ;;  %v1385_v10 = vsel %vm322_vm0, %v1662_v7, 0  ;;  %v932_v11 = vrot.slane %v2077_v39, 2  ;;  %v1198_v39 = vshrl.u32 %v1644_v0, 16  ;;  %v1960_v0 = vld [vmem:[%s2022_s22 + $0x30] ss:$0 sps:$4 sm:$0x77]  }
  0x54   : > { %1816 = vmatprep.mubr.msk.bf16.mxu0 %vm1970_vm1, %v1969_v1  ;;  %1798 = vmatprep.mubr.msk.bf16.mxu1 %vm1970_vm1, %v1969_v1 }
  0x55   : > { %1880 = vmatprep.subr.bf16.mxu1 %v1969_v1  ;;  %v933_v21 = vsel %vm924_vm6, %v930_v14, %v932_v11  ;;  %v1200_v30 = vrot.slane %v1198_v39, 2  ;;  %v1367_v14 = vrot.slane %v1960_v0, 3 }
  0x57   : > { %v1204_v36 = vor.u32 %v1203_v31, %v1200_v30 }
  0x5a   : > { %1799 = vmatmul.mubr.msk.bf16.gmra.mrb[32].mxu1 %vm306_vm3, %v649_v29  ;;  %v935_v29 = vsel %vm924_vm6, %v932_v11, %v934_v23 }
  0x5b   : > { %1817 = vmatmul.mubr.msk.bf16.vlgmr.msra.gmra.mrb[32].mxu0 %vm306_vm3, %v780_v25  ;;  %1802 = vmatprep.mubr.msk.bf16.mxu1 %vm1970_vm1, %v1969_v1 }
  0x5c   : > { %1859 = vmatpush3.bf16.msra.mxu0 %v1105_v28  ;;  %1820 = vmatprep.mubr.msk.bf16.mxu0 %vm1970_vm1, %v1969_v1  ;;  %v1958_v28 = vld [vmem:[%s2022_s22 + $0x30] ss:$0 sps:$4 sm:$0x33]  }
  0x5d   : > { %1902 = vmatprep.subr.bf16.mxu0 %v1969_v1  ;;  %v1087_v34 = vrot.slane %v1958_v28, 2 }
  0x5f   : > { %v1088_v41 = vsel %vm924_vm6, %v1085_v22, %v1087_v34 }
  0x62   : > { %1803 = vmatmul.mubr.msk.bf16.gmra.mrb[36].mxu1 %vm306_vm3, %v651_v38  ;;  %v1215_v38 = vshrl.u32 %v2262_v9, 16  ;;  %v1365_v9 = vrot.slane %v2289_v20, 3 }
  0x63   : > { %1821 = vmatmul.mubr.msk.bf16.gmra.mrb[36].mxu0 %vm306_vm3, %v789_v35  ;;  %1806 = vmatprep.mubr.msk.bf16.mxu1 %vm1970_vm1, %v1969_v1  ;;  %v1351_v35 = vld [vmem:[%s2022_s22 + $0x8] sm:$0x8] }
  0x64   : > { %1824 = vmatprep.mubr.msk.bf16.mxu0 %vm1970_vm1, %v1969_v1  ;;  %v1663_v42 = vcombine.low %v1351_v35, %v2234_v59  ;;  %v1217_v45 = vrot.slane %v1215_v38, 2  ;;  %v1236_v59 = vshll.u32 %v2289_v20, 16 }
  0x66   : > { %v1358_v48 = vrot.slane %v1663_v42, 3  ;;  %v1221_v50 = vor.u32 %v1220_v47, %v1217_v45  ;;  %v1238_v63 = vrot.slane %v1236_v59, 3 }
  0x68   : > { %v1231_v61 = vsel %vm1196_vm7, %v1221_v50, %v1230_v57 }
  0x6a   : > { %1807 = vmatmul.mubr.msk.bf16.gmra.mrb[40].mxu1 %vm306_vm3, %v653_v49 }
  0x6b   : > { %1825 = vmatmul.mubr.msk.bf16.gmra.mrb[40].mxu0 %vm306_vm3, %v798_v43  ;;  %1810 = vmatprep.mubr.msk.bf16.mxu1 %vm1970_vm1, %v1969_v1 }
  0x6c   : > { %1828 = vmatprep.mubr.msk.bf16.mxu0 %vm1970_vm1, %v1969_v1 }
  0x72   : > { %1811 = vmatmul.mubr.msk.bf16.gmra.mrb[44].mxu1 %vm306_vm3, %v2092_v46  ;;  %v2245_v46 = vld [vmem:[%s2022_s22 + $0x10] sm:$0xff]   ;;  %s2392_s22 = scalar_lea.vmem %s2445_s4, %s1927_s13 }
  0x73   : > { %1829 = vmatmul.mubr.msk.bf16.gmra.mrb[44].mxu0 %vm306_vm3, %v807_v44  ;;  %1838 = vmatprep.mubr.msk.bf16.mxu1 %vm1970_vm1, %v1969_v1  ;;  %v1079_v5 = vrot.slane %v2245_v46, 2  ;;  %v1206_v25 = vshrl.u32 %v2245_v46, 16  ;;  %v1209_v26 = vshll.u32 %v2245_v46, 16  ;;  %v1359_v49 = vrot.slane %v2245_v46, 3 }
  0x74   : > { %1832 = vmatprep.mubr.msk.bf16.mxu0 %vm1970_vm1, %v1969_v1  ;;  %v1363_v46 = vrot.slane %v2276_v16, 3 }
  0x75   : > { %v1080_v8 = vsel %vm924_vm6, %v1078_v2, %v1079_v5  ;;  %v1082_v15 = vsel %vm924_vm6, %v1079_v5, %v1081_v13  ;;  %v1208_v32 = vrot.slane %v1206_v25, 2  ;;  %v1211_v33 = vrot.slane %v1209_v26, 3 }
  0x76   : > { %v1360_v53 = vsel %vm1357_vm8, %v1358_v48, %v1359_v49  ;;  %v1362_v60 = vsel %vm1357_vm8, %v1359_v49, %v1361_v56  ;;  %v1245_v2 = vshll.u32 %v1960_v0, 16  ;;  %v1364_v5 = vsel %vm1357_vm8, %v1361_v56, %v1363_v46 }
  0x77   : > { %v1212_v37 = vor.u32 %v1211_v33, %v1208_v32 }
  0x79   : > { %v1213_v43 = vsel %vm1196_vm7, %v1204_v36, %v1212_v37  ;;  %v1222_v44 = vsel %vm1196_vm7, %v1212_v37, %v1221_v50 }
  0x7a   : > { %1839 = vmatmul.mubr.msk.bf16.vlgmr.msra.gmra.mrb[48].mxu1 %vm306_vm3, %v927_v3 }
  0x7b   : > { %1833 = vmatmul.mubr.msk.bf16.gmra.mrb[48].mxu0 %vm306_vm3, %v816_v62  ;;  %1881 = vmatpush3.bf16.msra.mxu1 %v1266_v4  ;;  %v1235_v62 = vrot.slane %v1233_v58, 2  ;;  %v1242_v4 = vshrl.u32 %v1960_v0, 16 }
  0x7c   : > { %1860 = vmatprep.mubr.msk.bf16.mxu0 %vm1970_vm1, %v1969_v1  ;;  %1842 = vmatprep.mubr.msk.bf16.mxu1 %vm1970_vm1, %v1969_v1 }
  0x7d   : > { %v1239_v3 = vor.u32 %v1238_v63, %v1235_v62  ;;  %v1244_v7 = vrot.slane %v1242_v4, 2 }
  0x7f   : > { %v1240_v6 = vsel %vm1196_vm7, %v1230_v57, %v1239_v3 }
  0x82   : > { %1843 = vmatmul.mubr.msk.bf16.gmra.mrb[52].mxu1 %vm306_vm3, %v929_v12  ;;  %v1366_v12 = vsel %vm1357_vm8, %v1363_v46, %v1365_v9 }
  0x83   : > { %1861 = vmatmul.mubr.msk.bf16.vlgmr.msra.gmra.mrb[52].mxu0 %vm306_vm3, %v1080_v8  ;;  %1846 = vmatprep.mubr.msk.bf16.mxu1 %vm1970_vm1, %v1969_v1  ;;  %v1247_v8 = vrot.slane %v1245_v2, 3 }
  0x84   : > { %1903 = vmatpush3.bf16.msra.mxu0 %v1385_v10  ;;  %1864 = vmatprep.mubr.msk.bf16.mxu0 %vm1970_vm1, %v1969_v1 }
  0x85   : > { %v1248_v10 = vor.u32 %v1247_v8, %v1244_v7 }
  0x87   : > { %v1249_v13 = vsel %vm1196_vm7, %v1239_v3, %v1248_v10 }
  0x8a   : > { %1847 = vmatmul.mubr.msk.bf16.gmra.mrb[56].mxu1 %vm306_vm3, %v931_v17 }
  0x8b   : > { %1865 = vmatmul.mubr.msk.bf16.gmra.mrb[56].mxu0 %vm306_vm3, %v1082_v15  ;;  %1850 = vmatprep.mubr.msk.bf16.mxu1 %vm1970_vm1, %v1969_v1  ;;  %v1368_v15 = vsel %vm1357_vm8, %v1365_v9, %v1367_v14 }
  0x8c   : > { %1868 = vmatprep.mubr.msk.bf16.mxu0 %vm1970_vm1, %v1969_v1 }
  0x92   : > { %1851 = vmatmul.mubr.msk.bf16.gmra.mrb[60].mxu1 %vm306_vm3, %v933_v21 }
  0x93   : > { %1869 = vmatmul.mubr.msk.bf16.gmra.mrb[60].mxu0 %vm306_vm3, %v1084_v19  ;;  %1854 = vmatprep.mubr.msk.bf16.mxu1 %vm1970_vm1, %v1969_v1 }
  0x94   : > { %1872 = vmatprep.mubr.msk.bf16.mxu0 %vm1970_vm1, %v1969_v1 }
  0x9a   : > { %1855 = vmatmul.mubr.msk.bf16.gmra.mrb[64].mxu1 %vm306_vm3, %v935_v29 }
  0x9b   : > { %1873 = vmatmul.mubr.msk.bf16.gmra.mrb[64].mxu0 %vm306_vm3, %v1086_v27  ;;  %1882 = vmatprep.mubr.msk.bf16.mxu1 %vm1970_vm1, %v1969_v1 }
  0x9c   : > { %1876 = vmatprep.mubr.msk.bf16.mxu0 %vm1970_vm1, %v1969_v1 }
  0xa2   : > { %1883 = vmatmul.mubr.msk.bf16.vlgmr.msra.gmra.mrb[68].mxu1 %vm306_vm3, %v1213_v43 }
  0xa3   : > { %1877 = vmatmul.mubr.msk.bf16.gmra.mrb[68].mxu0 %vm306_vm3, %v1088_v41  ;;  %1886 = vmatprep.mubr.msk.bf16.mxu1 %vm1970_vm1, %v1969_v1 }
  0xa4   : > { %1904 = vmatprep.mubr.msk.bf16.mxu0 %vm1970_vm1, %v1969_v1 }
  0xaa   : > { %1887 = vmatmul.mubr.msk.bf16.gmra.mrb[72].mxu1 %vm306_vm3, %v1222_v44 }
  0xab   : > { %1905 = vmatmul.mubr.msk.bf16.vlgmr.msra.gmra.mrb[72].mxu0 %vm306_vm3, %v1360_v53  ;;  %1890 = vmatprep.mubr.msk.bf16.mxu1 %vm1970_vm1, %v1969_v1 }
  0xac   : > { %1908 = vmatprep.mubr.msk.bf16.mxu0 %vm1970_vm1, %v1969_v1 }
  0xb2   : > { %1891 = vmatmul.mubr.msk.bf16.gmra.mrb[76].mxu1 %vm306_vm3, %v1231_v61 }
  0xb3   : > { %1909 = vmatmul.mubr.msk.bf16.gmra.mrb[76].mxu0 %vm306_vm3, %v1362_v60  ;;  %1894 = vmatprep.mubr.msk.bf16.mxu1 %vm1970_vm1, %v1969_v1 }
  0xb4   : > { %1912 = vmatprep.mubr.msk.bf16.mxu0 %vm1970_vm1, %v1969_v1 }
  0xba   : > { %1895 = vmatmul.mubr.msk.bf16.gmra.mrb[80].mxu1 %vm306_vm3, %v1240_v6 }
  0xbb   : > { %1913 = vmatmul.mubr.msk.bf16.gmra.mrb[80].mxu0 %vm306_vm3, %v1364_v5  ;;  %1898 = vmatprep.mubr.msk.bf16.mxu1 %vm1970_vm1, %v1969_v1 }
  0xbc   : > { %1916 = vmatprep.mubr.msk.bf16.mxu0 %vm1970_vm1, %v1969_v1 }
  0xc2   : > { %1899 = vmatmul.mubr.msk.bf16.gmra.mrb[84].mxu1 %vm306_vm3, %v1249_v13 }
  0xc3   : > { %1917 = vmatmul.mubr.msk.bf16.gmra.mrb[84].mxu0 %vm306_vm3, %v1366_v12 }
  0xc4   : > { %1920 = vmatprep.mubr.msk.bf16.mxu0 %vm1970_vm1, %v1969_v1 }
  0xcb   : > { %1921 = vmatmul.mubr.msk.bf16.gmra.mrb[88].mxu0 %vm306_vm3, %v1368_v15 }
  0xed   : > { %v384_v11 = vpop.f32.mrb[0].mxu1 }
  0xee   : > { %v360_v16 = vpop.f32.mrb[0].mxu0  ;;  %v1742_v20 = vpop.f32.mrb[1].mxu1 }
  0xef   : > { %v1730_v17 = vpop.f32.mrb[1].mxu0  ;;  %v387_v21 = vpop.f32.mrb[2].mxu1 }
  0xf0   : > { %v363_v18 = vpop.f32.mrb[2].mxu0  ;;  %v1743_v22 = vpop.f32.mrb[3].mxu1 }
  0xf1   : > { %v1731_v19 = vpop.f32.mrb[3].mxu0 }
  0xf5   : > { %v392_v25 = vpop.f32.mrb[4].mxu1 }
  0xf6   : > { %v368_v23 = vpop.f32.mrb[4].mxu0  ;;  %v1746_v26 = vpop.f32.mrb[5].mxu1 }
  0xf7   : > { %v1734_v39 = vpop.f32.mrb[5].mxu0  ;;  %v395_v27 = vpop.f32.mrb[6].mxu1 }
  0xf8   : > { %v371_v24 = vpop.f32.mrb[6].mxu0  ;;  %v1747_v28 = vpop.f32.mrb[7].mxu1 }
  0xf9   : > { %v1735_v1 = vpop.f32.mrb[7].mxu0 }
  0xfd   : > { %v446_v31 = vpop.f32.mrb[8].mxu1 }
  0xfe   : > { %v376_v29 = vpop.f32.mrb[8].mxu0  ;;  %v447_v33 = vadd.f32 %v446_v31, %v360_v16  ;;  %v1752_v34 = vpop.f32.mrb[9].mxu1 }
  0xff   : > { %v1738_v30 = vpop.f32.mrb[9].mxu0  ;;  %v449_v36 = vpop.f32.mrb[10].mxu1 }
 0x100   : > { %v379_v32 = vpop.f32.mrb[10].mxu0  ;;  %v450_v37 = vadd.f32 %v449_v36, %v363_v18  ;;  %v1753_v38 = vpop.f32.mrb[11].mxu1 }
 0x101   : > { %v1739_v35 = vpop.f32.mrb[11].mxu0 }
 0x105   : > { %v454_v43 = vpop.f32.mrb[12].mxu1 }
 0x106   : > { %v555_v40 = vpop.f32.mrb[12].mxu0  ;;  %v455_v47 = vadd.f32 %v454_v43, %v368_v23  ;;  %v1756_v48 = vpop.f32.mrb[13].mxu1 }
 0x107   : > { %v594_v41 = vadd.f32 %v555_v40, %v447_v33  ;;  %v1774_v42 = vpop.f32.mrb[13].mxu0  ;;  %v457_v51 = vpop.f32.mrb[14].mxu1 }
 0x108   : > { %v558_v45 = vpop.f32.mrb[14].mxu0  ;;  %v458_v52 = vadd.f32 %v457_v51, %v371_v24  ;;  %v1757_v53 = vpop.f32.mrb[15].mxu1 }
 0x109   : > { %v595_v49 = vadd.f32 %v558_v45, %v450_v37  ;;  %v1775_v50 = vpop.f32.mrb[15].mxu0 }
 0x10d   : > { %v462_v56 = vpop.f32.mrb[16].mxu1 }
 0x10e   : > { %v563_v44 = vpop.f32.mrb[16].mxu0  ;;  %v463_v58 = vadd.f32 %v462_v56, %v376_v29  ;;  %v1760_v59 = vpop.f32.mrb[17].mxu1 }
 0x10f   : > { %v596_v54 = vadd.f32 %v563_v44, %v455_v47  ;;  %v1778_v55 = vpop.f32.mrb[17].mxu0  ;;  %v465_v62 = vpop.f32.mrb[18].mxu1 }
 0x110   : > { %v566_v57 = vpop.f32.mrb[18].mxu0  ;;  %v466_v63 = vadd.f32 %v465_v62, %v379_v32  ;;  %v1761_v0 = vpop.f32.mrb[19].mxu1 }
 0x111   : > { %v597_v60 = vadd.f32 %v566_v57, %v458_v52  ;;  %v1779_v61 = vpop.f32.mrb[19].mxu0 }
 0x115   : > { %v470_v2 = vpop.f32.mrb[20].mxu1 }
 0x116   : > { %v571_v46 = vpop.f32.mrb[20].mxu0  ;;  %v471_v6 = vadd.f32 %v470_v2, %v384_v11  ;;  %v1764_v7 = vpop.f32.mrb[21].mxu1 }
 0x117   : > { %v598_v3 = vadd.f32 %v571_v46, %v463_v58  ;;  %v1782_v4 = vpop.f32.mrb[21].mxu0  ;;  %v473_v10 = vpop.f32.mrb[22].mxu1 }
 0x118   : > { %v574_v5 = vpop.f32.mrb[22].mxu0  ;;  %v474_v12 = vadd.f32 %v473_v10, %v387_v21  ;;  %v1765_v13 = vpop.f32.mrb[23].mxu1 }
 0x119   : > { %v599_v8 = vadd.f32 %v574_v5, %v466_v63  ;;  %v1783_v9 = vpop.f32.mrb[23].mxu0 }
 0x11d   : > { %v478_v17 = vpop.f32.mrb[24].mxu1 }
 0x11e   : > { %v579_v14 = vpop.f32.mrb[24].mxu0  ;;  %v479_v19 = vadd.f32 %v478_v17, %v392_v25  ;;  %v1768_v20 = vpop.f32.mrb[25].mxu1 }
 0x11f   : > { %v600_v15 = vadd.f32 %v579_v14, %v471_v6  ;;  %v1786_v16 = vpop.f32.mrb[25].mxu0  ;;  %v481_v39 = vpop.f32.mrb[26].mxu1 }
 0x120   : > { %v582_v18 = vpop.f32.mrb[26].mxu0  ;;  %v482_v24 = vadd.f32 %v481_v39, %v395_v27  ;;  %v1769_v1 = vpop.f32.mrb[27].mxu1 }
 0x121   : > { %v601_v22 = vadd.f32 %v582_v18, %v474_v12  ;;  %v1787_v23 = vpop.f32.mrb[27].mxu0 }
 0x125   : > { %v708_v29 = vpop.f32.mrb[28].mxu1 }
 0x126   : > { %v587_v26 = vpop.f32.mrb[28].mxu0  ;;  %v747_v31 = vadd.f32 %v708_v29, %v594_v41  ;;  %v1796_v21 = vpop.f32.mrb[29].mxu1 }
 0x127   : > { %v602_v11 = vadd.f32 %v587_v26, %v479_v19  ;;  %v1790_v28 = vpop.f32.mrb[29].mxu0  ;;  %v711_v34 = vpop.f32.mrb[30].mxu1 }
 0x128   : > { %v590_v30 = vpop.f32.mrb[30].mxu0  ;;  %v748_v35 = vadd.f32 %v711_v34, %v595_v49  ;;  %v1797_v36 = vpop.f32.mrb[31].mxu1 }
 0x129   : > { %v603_v32 = vadd.f32 %v590_v30, %v482_v24  ;;  %v1791_v33 = vpop.f32.mrb[31].mxu0 }
 0x12d   : > { %v716_v40 = vpop.f32.mrb[32].mxu1 }
 0x12e   : > { %v869_v37 = vpop.f32.mrb[32].mxu0  ;;  %v749_v43 = vadd.f32 %v716_v40, %v596_v54  ;;  %v1800_v27 = vpop.f32.mrb[33].mxu1 }
 0x12f   : > { %v908_v25 = vadd.f32 %v869_v37, %v747_v31  ;;  %v1818_v38 = vpop.f32.mrb[33].mxu0  ;;  %v719_v48 = vpop.f32.mrb[34].mxu1 }
 0x130   : > { %v872_v42 = vpop.f32.mrb[34].mxu0  ;;  %v750_v50 = vadd.f32 %v719_v48, %v597_v60  ;;  %v1801_v51 = vpop.f32.mrb[35].mxu1 }
 0x131   : > { %v909_v45 = vadd.f32 %v872_v42, %v748_v35  ;;  %v1819_v47 = vpop.f32.mrb[35].mxu0 }
 0x135   : > { %v724_v44 = vpop.f32.mrb[36].mxu1 }
 0x136   : > { %v877_v52 = vpop.f32.mrb[36].mxu0  ;;  %v751_v56 = vadd.f32 %v724_v44, %v598_v3  ;;  %v1804_v49 = vpop.f32.mrb[37].mxu1 }
 0x137   : > { %v910_v41 = vadd.f32 %v877_v52, %v749_v43  ;;  %v1822_v53 = vpop.f32.mrb[37].mxu0  ;;  %v727_v59 = vpop.f32.mrb[38].mxu1 }
 0x138   : > { %v880_v55 = vpop.f32.mrb[38].mxu0  ;;  %v752_v61 = vadd.f32 %v727_v59, %v599_v8  ;;  %v1805_v62 = vpop.f32.mrb[39].mxu1 }
 0x139   : > { %v911_v57 = vadd.f32 %v880_v55, %v750_v50  ;;  %v1823_v58 = vpop.f32.mrb[39].mxu0 }
 0x13d   : > { %v732_v46 = vpop.f32.mrb[40].mxu1 }
 0x13e   : > { %v885_v63 = vpop.f32.mrb[40].mxu0  ;;  %v753_v2 = vadd.f32 %v732_v46, %v600_v15  ;;  %v1808_v60 = vpop.f32.mrb[41].mxu1 }
 0x13f   : > { %v912_v54 = vadd.f32 %v885_v63, %v751_v56  ;;  %v1826_v0 = vpop.f32.mrb[41].mxu0  ;;  %v735_v7 = vpop.f32.mrb[42].mxu1 }
 0x140   : > { %v888_v4 = vpop.f32.mrb[42].mxu0  ;;  %v754_v9 = vadd.f32 %v735_v7, %v601_v22  ;;  %v1809_v10 = vpop.f32.mrb[43].mxu1 }
 0x141   : > { %v913_v5 = vadd.f32 %v888_v4, %v752_v61  ;;  %v1827_v6 = vpop.f32.mrb[43].mxu0 }
 0x145   : > { %v740_v14 = vpop.f32.mrb[44].mxu1 }
 0x146   : > { %v893_v12 = vpop.f32.mrb[44].mxu0  ;;  %v755_v17 = vadd.f32 %v740_v14, %v602_v11  ;;  %v1812_v8 = vpop.f32.mrb[45].mxu1 }
 0x147   : > { %v914_v3 = vadd.f32 %v893_v12, %v753_v2  ;;  %v1830_v13 = vpop.f32.mrb[45].mxu0  ;;  %v743_v20 = vpop.f32.mrb[46].mxu1 }
 0x148   : > { %v896_v16 = vpop.f32.mrb[46].mxu0  ;;  %v756_v23 = vadd.f32 %v743_v20, %v603_v32  ;;  %v1813_v39 = vpop.f32.mrb[47].mxu1 }
 0x149   : > { %v915_v18 = vadd.f32 %v896_v16, %v754_v9  ;;  %v1831_v19 = vpop.f32.mrb[47].mxu0 }
 0x14d   : > { %v988_v26 = vpop.f32.mrb[48].mxu1 }
 0x14e   : > { %v901_v24 = vpop.f32.mrb[48].mxu0  ;;  %v1027_v29 = vadd.f32 %v988_v26, %v908_v25  ;;  %v1840_v22 = vpop.f32.mrb[49].mxu1 }
 0x14f   : > { %v916_v15 = vadd.f32 %v901_v24, %v755_v17  ;;  %v1834_v1 = vpop.f32.mrb[49].mxu0  ;;  %v991_v21 = vpop.f32.mrb[50].mxu1 }
 0x150   : > { %v904_v28 = vpop.f32.mrb[50].mxu0  ;;  %v1028_v33 = vadd.f32 %v991_v21, %v909_v45  ;;  %v1841_v34 = vpop.f32.mrb[51].mxu1  ;;  %v2385_v21 = vld [vmem:[%s2443_s2] ss:$0 sm:$0xff] }
 0x151   : > { %v917_v30 = vadd.f32 %v904_v28, %v756_v23  ;;  %v1835_v31 = vpop.f32.mrb[51].mxu0 }
 0x155   : > { %v996_v37 = vpop.f32.mrb[52].mxu1 }
 0x156   : > { %v1141_v35 = vpop.f32.mrb[52].mxu0  ;;  %v1029_v40 = vadd.f32 %v996_v37, %v910_v41  ;;  %v1844_v32 = vpop.f32.mrb[53].mxu1 }
 0x157   : > { %v1180_v11 = vadd.f32 %v1141_v35, %v1027_v29  ;;  %v1862_v36 = vpop.f32.mrb[53].mxu0  ;;  %v999_v27 = vpop.f32.mrb[54].mxu1 }
 0x158   : > { %v1144_v38 = vpop.f32.mrb[54].mxu0  ;;  %v1030_v47 = vadd.f32 %v999_v27, %v911_v57  ;;  %v1845_v48 = vpop.f32.mrb[55].mxu1  ;;  %v1488_v27 = vld [vmem:[%s2380_s18 + $0x8] sm:$0xff] }
 0x159   : > { %v1181_v42 = vadd.f32 %v1144_v38, %v1028_v33  ;;  %v1863_v43 = vpop.f32.mrb[55].mxu0 }
 0x15d   : > { %v1004_v52 = vpop.f32.mrb[56].mxu1 }
 0x15e   : > { %v1149_v50 = vpop.f32.mrb[56].mxu0  ;;  %v1031_v44 = vadd.f32 %v1004_v52, %v912_v54  ;;  %v1848_v45 = vpop.f32.mrb[57].mxu1 }
 0x15f   : > { %v1182_v25 = vadd.f32 %v1149_v50, %v1029_v40  ;;  %v1866_v51 = vpop.f32.mrb[57].mxu0  ;;  %v1007_v49 = vpop.f32.mrb[58].mxu1 }
 0x160   : > { %v1152_v53 = vpop.f32.mrb[58].mxu0  ;;  %v1032_v58 = vadd.f32 %v1007_v49, %v913_v5  ;;  %v1849_v59 = vpop.f32.mrb[59].mxu1 }
 0x161   : > { %v1183_v55 = vadd.f32 %v1152_v53, %v1030_v47  ;;  %v1867_v56 = vpop.f32.mrb[59].mxu0 }
 0x162   : > { %v1489_v56 = vld [vmem:[%s2380_s18 + $0x10] sm:$0xff] }
 0x165   : > { %v1012_v63 = vpop.f32.mrb[60].mxu1 }
 0x166   : > { %v1157_v61 = vpop.f32.mrb[60].mxu0  ;;  %v1033_v57 = vadd.f32 %v1012_v63, %v914_v3  ;;  %v1852_v46 = vpop.f32.mrb[61].mxu1 }
 0x167   : > { %v2364_v41 = vadd.f32 %v1157_v61, %v1031_v44  ;;  %v1870_v62 = vpop.f32.mrb[61].mxu0  ;;  %v1015_v60 = vpop.f32.mrb[62].mxu1 }
 0x168   : > { %v1160_v0 = vpop.f32.mrb[62].mxu0  ;;  %v1034_v6 = vadd.f32 %v1015_v60, %v915_v18  ;;  %v1853_v54 = vpop.f32.mrb[63].mxu1 }
 0x169   : > { %v2366_v4 = vadd.f32 %v1160_v0, %v1032_v58  ;;  %v1871_v2 = vpop.f32.mrb[63].mxu0  ;;  %v1490_v0 = vld [vmem:[%s2380_s18 + $0x18] sm:$0xff] }
 0x16d   : > { %v1020_v5 = vpop.f32.mrb[64].mxu1 }
 0x16e   : > { %v1165_v7 = vpop.f32.mrb[64].mxu0  ;;  %v1035_v13 = vadd.f32 %v1020_v5, %v916_v15  ;;  %v1856_v14 = vpop.f32.mrb[65].mxu1  ;;  %v1491_v5 = vld [vmem:[%s2380_s18 + $0x20] sm:$0xff] }
 0x16f   : > { %v2368_v9 = vadd.f32 %v1165_v7, %v1033_v57  ;;  %v1874_v10 = vpop.f32.mrb[65].mxu0  ;;  %v1023_v3 = vpop.f32.mrb[66].mxu1 }
 0x170   : > { %v1168_v12 = vpop.f32.mrb[66].mxu0  ;;  %v1036_v8 = vadd.f32 %v1023_v3, %v917_v30  ;;  %v1857_v19 = vpop.f32.mrb[67].mxu1 }
 0x171   : > { %v2370_v16 = vadd.f32 %v1168_v12, %v1034_v6  ;;  %v1875_v17 = vpop.f32.mrb[67].mxu0  ;;  %v1492_v19 = vld [vmem:[%s2380_s18 + $0x28] sm:$0xff] }
 0x175   : > { %v1302_v39 = vpop.f32.mrb[68].mxu1 }
 0x176   : > { %v1173_v20 = vpop.f32.mrb[68].mxu0  ;;  %v1341_v1 = vadd.f32 %v1302_v39, %v1180_v11  ;;  %v1884_v26 = vpop.f32.mrb[69].mxu1  ;;  %v1487_v11 = vld [vmem:[%s2380_s18] sm:$0xff] }
 0x177   : > { %v2372_v23 = vadd.f32 %v1173_v20, %v1035_v13  ;;  %v1878_v18 = vpop.f32.mrb[69].mxu0  ;;  %v1305_v15 = vpop.f32.mrb[70].mxu1 }
 0x178   : > { %v1176_v24 = vpop.f32.mrb[70].mxu0  ;;  %v1342_v22 = vadd.f32 %v1305_v15, %v1181_v42  ;;  %v1885_v31 = vpop.f32.mrb[71].mxu1 }
 0x179   : > { %v2374_v28 = vadd.f32 %v1176_v24, %v1036_v8  ;;  %v1879_v29 = vpop.f32.mrb[71].mxu0 }
 0x17d   : > { %v1310_v35 = vpop.f32.mrb[72].mxu1 }
 0x17e   : > { %v1421_v30 = vpop.f32.mrb[72].mxu0  ;;  %v1343_v37 = vadd.f32 %v1310_v35, %v1182_v25  ;;  %v1888_v40 = vpop.f32.mrb[73].mxu1 }
 0x17f   : > { %v1460_v33 = vadd.f32 %v1421_v30, %v1341_v1  ;;  %v1906_v34 = vpop.f32.mrb[73].mxu0  ;;  %v1313_v43 = vpop.f32.mrb[74].mxu1 }
 0x180   : > { %v1424_v36 = vpop.f32.mrb[74].mxu0  ;;  %v1344_v48 = vadd.f32 %v1313_v43, %v1183_v55  ;;  %v1889_v25 = vpop.f32.mrb[75].mxu1 }
 0x181   : > { %v1477_v38 = vadd.f32 %v2385_v21, %v1460_v33  ;;  %v1461_v32 = vadd.f32 %v1424_v36, %v1342_v22  ;;  %v1907_v42 = vpop.f32.mrb[75].mxu0  ;;  %v1493_v22 = vld [vmem:[%s2380_s18 + $0x30] sm:$0xff]  ;;  %v1494_v36 = vld [vmem:[%s2380_s18 + $0x38] sm:$0xff] }
 0x183   : > { %v1497_v47 = vadd.f32 %v1487_v11, %v1477_v38  ;;  %v1478_v50 = vadd.f32 %v2385_v21, %v1461_v32 }
 0x185   : > { %1508 = vst.msk [vmem:[%s2392_s22] sm:$0xff] %vm1507_vm9, %v1497_v47  ;;  %v1498_v51 = vadd.f32 %v1488_v27, %v1478_v50  ;;  %v1318_v45 = vpop.f32.mrb[76].mxu1  ;;  %v1495_v47 = vld [vmem:[%s2380_s18 + $0x40] sm:$0xff] }
 0x186   : > { %v1429_v52 = vpop.f32.mrb[76].mxu0  ;;  %v1345_v58 = vadd.f32 %v1318_v45, %v2364_v41  ;;  %v1892_v59 = vpop.f32.mrb[77].mxu1 }
 0x187   : > { %1509 = vst.msk [vmem:[%s2392_s22 + $0x8] sm:$0xff] %vm1507_vm9, %v1498_v51  ;;  %v1462_v53 = vadd.f32 %v1429_v52, %v1343_v37  ;;  %v1910_v44 = vpop.f32.mrb[77].mxu0  ;;  %v1321_v63 = vpop.f32.mrb[78].mxu1 }
 0x188   : > { %v1432_v49 = vpop.f32.mrb[78].mxu0  ;;  %v1346_v46 = vadd.f32 %v1321_v63, %v2366_v4  ;;  %v1893_v60 = vpop.f32.mrb[79].mxu1 }
 0x189   : > { %v1479_v55 = vadd.f32 %v2385_v21, %v1462_v53  ;;  %v1463_v61 = vadd.f32 %v1432_v49, %v1344_v48  ;;  %v1911_v62 = vpop.f32.mrb[79].mxu0 }
 0x18b   : > { %v1499_v57 = vadd.f32 %v1489_v56, %v1479_v55  ;;  %v1480_v2 = vadd.f32 %v2385_v21, %v1463_v61 }
 0x18d   : > { %1510 = vst.msk [vmem:[%s2392_s22 + $0x10] sm:$0xff] %vm1507_vm9, %v1499_v57  ;;  %v1500_v6 = vadd.f32 %v1490_v0, %v1480_v2  ;;  %v1326_v10 = vpop.f32.mrb[80].mxu1 }
 0x18e   : > { %v1437_v54 = vpop.f32.mrb[80].mxu0  ;;  %v1347_v13 = vadd.f32 %v1326_v10, %v2368_v9  ;;  %v1896_v14 = vpop.f32.mrb[81].mxu1 }
 0x18f   : > { %1511 = vst.msk [vmem:[%s2392_s22 + $0x18] sm:$0xff] %vm1507_vm9, %v1500_v6  ;;  %v1464_v41 = vadd.f32 %v1437_v54, %v1345_v58  ;;  %v1914_v7 = vpop.f32.mrb[81].mxu0  ;;  %v1329_v8 = vpop.f32.mrb[82].mxu1 }
 0x190   : > { %v1440_v12 = vpop.f32.mrb[82].mxu0  ;;  %v1348_v18 = vadd.f32 %v1329_v8, %v2370_v16  ;;  %v1897_v24 = vpop.f32.mrb[83].mxu1 }
 0x191   : > { %v1481_v4 = vadd.f32 %v2385_v21, %v1464_v41  ;;  %v1465_v17 = vadd.f32 %v1440_v12, %v1346_v46  ;;  %v1915_v3 = vpop.f32.mrb[83].mxu0 }
 0x193   : > { %v1501_v20 = vadd.f32 %v1491_v5, %v1481_v4  ;;  %v1482_v39 = vadd.f32 %v2385_v21, %v1465_v17 }
 0x195   : > { %1512 = vst.msk [vmem:[%s2392_s22 + $0x20] sm:$0xff] %vm1507_vm9, %v1501_v20  ;;  %v1502_v1 = vadd.f32 %v1492_v19, %v1482_v39  ;;  %v1334_v15 = vpop.f32.mrb[84].mxu1 }
 0x196   : > { %v1445_v26 = vpop.f32.mrb[84].mxu0  ;;  %v1349_v30 = vadd.f32 %v1334_v15, %v2372_v23  ;;  %v1900_v33 = vpop.f32.mrb[85].mxu1 }
 0x197   : > { %1513 = vst.msk [vmem:[%s2392_s22 + $0x28] sm:$0xff] %vm1507_vm9, %v1502_v1  ;;  %v1466_v9 = vadd.f32 %v1445_v26, %v1347_v13  ;;  %v1918_v29 = vpop.f32.mrb[85].mxu0  ;;  %v1337_v11 = vpop.f32.mrb[86].mxu1 }
 0x198   : > { %v1448_v31 = vpop.f32.mrb[86].mxu0  ;;  %v1350_v38 = vadd.f32 %v1337_v11, %v2374_v28  ;;  %v1901_v32 = vpop.f32.mrb[87].mxu1  ;;  %v1496_v28 = vld [vmem:[%s2380_s18 + $0x48] sm:$0xff] }
 0x199   : > { %v1483_v16 = vadd.f32 %v2385_v21, %v1466_v9  ;;  %v1467_v34 = vadd.f32 %v1448_v31, %v1348_v18  ;;  %v1919_v35 = vpop.f32.mrb[87].mxu0 }
 0x19b   : > { %v1503_v37 = vadd.f32 %v1493_v22, %v1483_v16  ;;  %v1484_v40 = vadd.f32 %v2385_v21, %v1467_v34 }
 0x19d   : > { %1514 = vst.msk [vmem:[%s2392_s22 + $0x30] sm:$0xff] %vm1507_vm9, %v1503_v37  ;;  %v1504_v23 = vadd.f32 %v1494_v36, %v1484_v40 }
 0x19e   : > { %v1453_v42 = vpop.f32.mrb[88].mxu0 }
 0x19f   : > { %1515 = vst.msk [vmem:[%s2392_s22 + $0x38] sm:$0xff] %vm1507_vm9, %v1504_v23  ;;  %v1468_v43 = vadd.f32 %v1453_v42, %v1349_v30  ;;  %v1922_v27 = vpop.f32.mrb[89].mxu0 }
 0x1a0   : > { %v1456_v48 = vpop.f32.mrb[90].mxu0 }
 0x1a1   : > { %v1485_v50 = vadd.f32 %v2385_v21, %v1468_v43  ;;  %v1469_v25 = vadd.f32 %v1456_v48, %v1350_v38  ;;  %v1923_v51 = vpop.f32.mrb[91].mxu0 }
 0x1a3   : > { %v1505_v52 = vadd.f32 %v1495_v47, %v1485_v50  ;;  %v1486_v53 = vadd.f32 %v2385_v21, %v1469_v25 }
 0x1a5   : > { %1516 = vst.msk [vmem:[%s2392_s22 + $0x40] sm:$0xff] %vm1507_vm9, %v1505_v52  ;;  %v1506_v44 = vadd.f32 %v1496_v28, %v1486_v53 }
 0x1a7   : > { %1517 = vst.msk [vmem:[%s2392_s22 + $0x48] sm:$0xff] %vm1507_vm9, %v1506_v44 }
 0x1a8 PF: > { %s14_s15 = sadd.s32 1, %s1967_s15  }
 0x1a9   : > { %p11_p4 = scmp.ge.s32.totalorder %s14_s15, 4  }
 0x1ab   :  { %13 = sbr.rel (!%p11_p4) target bundleno = 1 (0x1), region = 77 }

// kernel: eoct_conv_forward.9
= control target key start
LH: loop header
LB: loop body
LE: loop exit
PB: predicated region body
PF: predicated region fallthrough
CT: control target
= control target key end

     0   :  { %s1184_s12 = smov 0   ;;  %s1318_s0 = inlined_call_operand.vmem [shape: bf16[2,42,12], index: 0, kind: input, shape index: {}]   ;;  %s1319_s1 = inlined_call_operand.vmem [shape: bf16[9,12,4], index: 1, kind: input, shape index: {}]   ;;  %s1320_s2 = inlined_call_operand.vmem [shape: f32[1,4], index: 2, kind: input, shape index: {}]   ;;  %s1321_s3 = inlined_call_operand.vmem [shape: f32[2,24,4], index: 3, kind: output, shape index: {}]  }
   0x1 LB: > { %s969_s13 = sadd.s32 4294967295, %s1162_s12   ;;  %p973_p0 = scmp.ge.s32.totalorder %s1162_s12, 1  ;;  %s1162_s12 = sphi %s1184_s12, %s13_s12  }
   0x2   : > { %p137_p1 = scmp.lt.s32.totalorder %s1162_s12, 3 }
   0x4   : > { %p138_p2 = pnand %p973_p0, %p137_p1 }
   0x5   : > { %v1134_v0 = vld [vmem:[%s1319_s1 + $0x8] sm:$0x3f] (!%p138_p2)   ;;  %vm219_vm0 = vcmask (!%p138_p2), 1045504   ;;  %p161_p3 = scmp.lt.s32.totalorder (!%p138_p2), %s969_s13, 1  ;;  %v1135_v2 = vld [vmem:[%s1319_s1] sm:$0x3f] (!%p138_p2)  }
   0x6   : > { %141 = sbr.rel (%p138_p2) target bundleno = 280 (0x118), region = 32  ;;  %1116 = vmatprep.subr.msk.bf16.mxu0 (!%p138_p2), %vm219_vm0, %v1134_v0  ;;  %v221_v1 = vsel (!%p138_p2), %vm219_vm0, %v1134_v0, 0  ;;  %1117 = vmatprep.subr.msk.bf16.mxu1 (!%p138_p2), %vm219_vm0, %v1135_v2  ;;  %v283_v3 = vsel (!%p138_p2), %vm219_vm0, %v1135_v2, 0  ;;  %v1138_v4 = vld [vmem:[%s1319_s1 + $0x10] sm:$0x3f] (!%p138_p2)   ;;  %vm212_vm2 = vcmask (!%p138_p2), 97280  }
   0x7   : > { %1063 = vmatpush3.bf16.msra.mxu0 (!%p138_p2), %v221_v1  ;;  %1069 = vmatpush3.bf16.msra.mxu1 (!%p138_p2), %v283_v3  ;;  %v1140_v5 = vld [vmem:[%s1319_s1 + $0x18] sm:$0x3f] (!%p138_p2)   ;;  %vm191_vm1 = vsmask.f32 (!%p138_p2), 7424  ;;  %v1145_v22 = vld [vmem:[%s1319_s1 + $0x28] sm:$0x3f] (!%p138_p2)  }
   0x8   : > { %1118 = vmatprep.subr.msk.bf16.mxu0 (!%p138_p2), %vm219_vm0, %v1138_v4  ;;  %1119 = vmatprep.subr.msk.bf16.mxu1 (!%p138_p2), %vm219_vm0, %v1140_v5  ;;  %v436_v12 = vsel (!%p138_p2), %vm219_vm0, %v1140_v5, 0  ;;  %vm420_vm3 = vcmask (!%p138_p2), 1044480   ;;  %v356_v32 = vsel (!%p138_p2), %vm219_vm0, %v1138_v4, 0  ;;  %vm340_vm4 = vcmask (!%p138_p2), 1046528   ;;  %v1142_v39 = vld [vmem:[%s1319_s1 + $0x20] sm:$0x3f] (!%p138_p2)  }
   0x9   : > { %v596_v49 = vsel (!%p138_p2), %vm219_vm0, %v1145_v22, 0  ;;  %v1150_v54 = vld [vmem:[%s1319_s1 + $0x38] sm:$0x3f] (!%p138_p2)   ;;  %vm496_vm5 = vsmask.f32 (!%p138_p2), 4352  ;;  %v526_v2 = vsel (!%p138_p2), %vm219_vm0, %v1142_v39, 0 }
   0xa   : > { %vm742_vm6 = vsmask.f32 (!%p138_p2), 5376  ;;  %vm910_vm7 = vcmask (!%p138_p2), 31744  }
   0xd   : > { %s1323_s13 = smov (!%p161_p3, %s969_s13), 1 }
   0xe   : > { %s1125_s20 = smul.u32 24, %s1323_s13 }
  0x10   : > { %s1217_s25 = scalar_lea.vmem %s1318_s0, %s1125_s20  ;;  %s170_s15 = scalar_lea.vmem %s1321_s3, %s1125_s20 }
  0x11   : > { %v172_v6 = vld [vmem:[%s1217_s25] sm:$0xf]  ;;  %v1222_v7 = vld [vmem:[%s1217_s25 + $0x4] sm:$0xf]  ;;  %v1225_v8 = vld [vmem:[%s1217_s25 + $0x8] sm:$0xf] }
  0x12   : > { %v177_v9 = vld [vmem:[%s1217_s25 + $0xc] sm:$0x1]  ;;  %v978_v10 = vcombine.low %v172_v6, %v1222_v7  ;;  %v983_v11 = vcombine.low %v1225_v8, %v1225_v8  ;;  %v333_v13 = vld [vmem:[%s1217_s25] sm:$0xe]  ;;  %v1008_v42 = vcombine.low %v1222_v7, %v1225_v8  ;;  %v649_v47 = vld [vmem:[%s1217_s25 + $0x4] sm:$0xc] }
  0x13   : > { %v1234_v14 = vcombine.low %v1225_v8, %v177_v9  ;;  %v989_v15 = vcombine.low %v333_v13, %v1222_v7  ;;  %v409_v16 = vld [vmem:[%s1217_s25] sm:$0x8]  ;;  %v410_v17 = vld [vmem:[%s1217_s25 + $0xc] sm:$0x7]  ;;  %v650_v48 = vld [vmem:[%s1217_s25 + $0x8] sm:$0xf] }
  0x14   : > { %v193_v18 = vshrl.u32 %v978_v10, 16  ;;  %v195_v19 = vshll.u32 %v978_v10, 16  ;;  %1070 = vmatprep.mubr.msk.bf16.mxu1 %vm212_vm2, %v978_v10  ;;  %v995_v20 = vcombine.low %v409_v16, %v1222_v7  ;;  %v996_v21 = vcombine.low %v1225_v8, %v410_v17  ;;  %v1246_v23 = vld [vmem:[%s1217_s25 + $0xc] sm:$0xf]  ;;  %v735_v55 = vld [vmem:[%s1217_s25 + $0x10] sm:$0x7] }
  0x15   : > { %v200_v24 = vshll.u32 %v1234_v14, 16  ;;  %v204_v25 = vshrl.u32 %v1234_v14, 16  ;;  %1071 = vmatmul.mubr.msk.bf16.vlgmr.msra.gmra.mrb[0].mxu1 %vm212_vm2, %v983_v11  ;;  %v341_v26 = vrot.slane %v989_v15, 1  ;;  %v342_v28 = vrot.slane %v1234_v14, 1  ;;  %v651_v52 = vld [vmem:[%s1217_s25 + $0xc] sm:$0xf] }
  0x16   : > { %v197_v27 = vrot.slane %v195_v19, 1  ;;  %1081 = vmatpush3.bf16.msra.mxu1 %v436_v12  ;;  %v421_v29 = vrot.slane %v995_v20, 3  ;;  %v422_v30 = vrot.slane %v996_v21, 3  ;;  %v1002_v33 = vcombine.low %v1225_v8, %v1246_v23  ;;  %v652_v61 = vld [vmem:[%s1217_s25 + $0x10] sm:$0x3] }
  0x17   : > { %v202_v31 = vrot.slane %v200_v24, 1  ;;  %1121 = vmatprep.subr.msk.bf16.mxu1 %vm219_vm0, %v1145_v22  ;;  %v498_v36 = vshrl.u32 %v995_v20, 16  ;;  %v501_v37 = vshll.u32 %v995_v20, 16  ;;  %v343_v44 = vsel %vm340_vm4, %v341_v26, %v342_v28  ;;  %v1147_v6 = vld [vmem:[%s1319_s1 + $0x30] sm:$0x3f]  }
  0x18   : > { %v198_v34 = vor.u32 %v197_v27, %v193_v18  ;;  %v423_v35 = vsel %vm420_vm3, %v421_v29, %v422_v30  ;;  %v506_v40 = vshrl.u32 %v1002_v33, 16  ;;  %v509_v41 = vshll.u32 %v1002_v33, 16  ;;  %v825_v15 = vld [vmem:[%s1217_s25 + $0x4] sm:$0x8]  ;;  %v1154_v18 = vld [vmem:[%s1319_s1 + $0x40] sm:$0x3f]  }
  0x19   : > { %v206_v38 = vor.u32 %v204_v25, %v202_v31  ;;  %1082 = vmatprep.mubr.msk.bf16.mxu1 %vm212_vm2, %v423_v35  ;;  %v500_v45 = vrot.slane %v498_v36, 3  ;;  %v503_v46 = vrot.slane %v501_v37, 4  ;;  %v1015_v53 = vcombine.low %v649_v47, %v650_v48 }
  0x1a   : > { %v203_v43 = vsel %vm191_vm1, %v198_v34, %v202_v31  ;;  %v508_v50 = vrot.slane %v506_v40, 3  ;;  %v511_v51 = vrot.slane %v509_v41, 4  ;;  %v1022_v56 = vcombine.low %v651_v52, %v735_v55 }
  0x1b   : > { %1064 = vmatprep.mubr.msk.bf16.mxu0 %vm212_vm2, %v203_v43  ;;  %v504_v57 = vor.u32 %v503_v46, %v500_v45  ;;  %v744_v59 = vshrl.u32 %v1015_v53, 16  ;;  %v747_v60 = vshll.u32 %v1015_v53, 16  ;;  %v1009_v3 = vcombine.low %v1246_v23, %v1246_v23 }
  0x1c   : > { %1065 = vmatmul.mubr.msk.bf16.vlgmr.msra.gmra.mrb[0].mxu0 %vm212_vm2, %v206_v38  ;;  %v512_v58 = vor.u32 %v511_v51, %v508_v50  ;;  %v752_v62 = vshrl.u32 %v1022_v56, 16  ;;  %v755_v1 = vshll.u32 %v1022_v56, 16  ;;  %v1016_v7 = vcombine.low %v651_v52, %v652_v61 }
  0x1d   : > { %1075 = vmatpush3.bf16.msra.mxu0 %v356_v32  ;;  %1076 = vmatprep.mubr.msk.bf16.mxu0 %vm212_vm2, %v343_v44  ;;  %v746_v63 = vrot.slane %v744_v59, 2  ;;  %v749_v0 = vrot.slane %v747_v60, 3  ;;  %v772_v10 = vsel %vm219_vm0, %v1150_v54, 0  ;;  %v667_v12 = vrot.slane %v1015_v53, 2 }
  0x1e   : > { %1120 = vmatprep.subr.msk.bf16.mxu0 %vm219_vm0, %v1142_v39  ;;  %1083 = vmatmul.mubr.msk.bf16.vlgmr.msra.gmra.mrb[4].mxu1 %vm212_vm2, %v422_v30  ;;  %v754_v4 = vrot.slane %v752_v62, 2  ;;  %v513_v5 = vsel %vm496_vm5, %v504_v57, %v512_v58  ;;  %v757_v9 = vrot.slane %v755_v1, 3  ;;  %v668_v13 = vrot.slane %v1016_v7, 2 }
  0x1f   : > { %1093 = vmatpush3.bf16.msra.mxu1 %v596_v49  ;;  %1094 = vmatprep.mubr.msk.bf16.mxu1 %vm212_vm2, %v1008_v42  ;;  %v750_v8 = vor.u32 %v749_v0, %v746_v63  ;;  %v682_v16 = vsel %vm219_vm0, %v1147_v6, 0  ;;  %v1028_v19 = vcombine.low %v825_v15, %v650_v48  ;;  %v833_v21 = vrot.slane %v1022_v56, 3 }
  0x20   : > { %1123 = vmatprep.subr.msk.bf16.mxu1 %vm219_vm0, %v1150_v54  ;;  %v758_v11 = vor.u32 %v757_v9, %v754_v4  ;;  %v669_v17 = vsel %vm219_vm0, %v667_v12, %v668_v13  ;;  %v847_v22 = vsel %vm219_vm0, %v1154_v18, 0 }
  0x21   : > { %v832_v20 = vrot.slane %v1028_v19, 3 }
  0x22   : > { %v759_v14 = vsel %vm742_vm6, %v750_v8, %v758_v11 }
  0x23   : > { %v834_v23 = vsel %vm420_vm3, %v832_v20, %v833_v21 }
  0x24   : > { %1077 = vmatmul.mubr.msk.bf16.vlgmr.msra.gmra.mrb[4].mxu0 %vm212_vm2, %v342_v28 }
  0x25   : > { %1087 = vmatpush3.bf16.msra.mxu0 %v526_v2  ;;  %1088 = vmatprep.mubr.msk.bf16.mxu0 %vm212_vm2, %v513_v5 }
  0x26   : > { %1122 = vmatprep.subr.msk.bf16.mxu0 %vm219_vm0, %v1147_v6  ;;  %1095 = vmatmul.mubr.msk.bf16.vlgmr.msra.gmra.mrb[8].mxu1 %vm212_vm2, %v1009_v3 }
  0x27   : > { %1105 = vmatpush3.bf16.msra.mxu1 %v772_v10  ;;  %1106 = vmatprep.mubr.msk.bf16.mxu1 %vm212_vm2, %v759_v14  ;;  %v1032_v14 = vld [vmem:[%s1320_s2] ss:$0 sm:$0xff] }
  0x2c   : > { %1089 = vmatmul.mubr.msk.bf16.vlgmr.msra.gmra.mrb[8].mxu0 %vm212_vm2, %v512_v58 }
  0x2d   : > { %1099 = vmatpush3.bf16.msra.mxu0 %v682_v16  ;;  %1100 = vmatprep.mubr.msk.bf16.mxu0 %vm212_vm2, %v669_v17 }
  0x2e   : > { %1124 = vmatprep.subr.msk.bf16.mxu0 %vm219_vm0, %v1154_v18  ;;  %1107 = vmatmul.mubr.msk.bf16.vlgmr.msra.gmra.mrb[12].mxu1 %vm212_vm2, %v758_v11 }
  0x34   : > { %1101 = vmatmul.mubr.msk.bf16.vlgmr.msra.gmra.mrb[12].mxu0 %vm212_vm2, %v668_v13 }
  0x35   : > { %1111 = vmatpush3.bf16.msra.mxu0 %v847_v22  ;;  %1112 = vmatprep.mubr.msk.bf16.mxu0 %vm212_vm2, %v834_v23 }
  0x3c   : > { %1113 = vmatmul.mubr.msk.bf16.vlgmr.msra.gmra.mrb[16].mxu0 %vm212_vm2, %v833_v21 }
  0xe8   : > { %v1072_v24 = vpop.f32.mrb[0].mxu1 }
  0xe9   : > { %v319_v25 = vpop.f32.mrb[1].mxu1 }
  0xea   : > { %v1073_v26 = vpop.f32.mrb[2].mxu1 }
  0xeb   : > { %v322_v27 = vpop.f32.mrb[3].mxu1 }
  0xef   : > { %v1066_v28 = vpop.f32.mrb[0].mxu0 }
  0xf0   : > { %v328_v29 = vadd.f32 %v1072_v24, %v1066_v28  ;;  %v257_v30 = vpop.f32.mrb[1].mxu0 }
  0xf1   : > { %v320_v31 = vadd.f32 %v319_v25, %v257_v30  ;;  %v1067_v32 = vpop.f32.mrb[2].mxu0  ;;  %v1084_v33 = vpop.f32.mrb[4].mxu1 }
  0xf2   : > { %v260_v34 = vpop.f32.mrb[3].mxu0  ;;  %v472_v35 = vpop.f32.mrb[5].mxu1 }
  0xf3   : > { %v323_v36 = vadd.f32 %v322_v27, %v260_v34  ;;  %v1085_v37 = vpop.f32.mrb[6].mxu1 }
  0xf4   : > { %v475_v38 = vpop.f32.mrb[7].mxu1 }
  0xf7   : > { %v1078_v39 = vpop.f32.mrb[4].mxu0 }
  0xf8   : > { %v408_v40 = vadd.f32 %v1078_v39, %v328_v29  ;;  %v392_v41 = vpop.f32.mrb[5].mxu0 }
  0xf9   : > { %v406_v42 = vadd.f32 %v392_v41, %v320_v31  ;;  %v1079_v43 = vpop.f32.mrb[6].mxu0  ;;  %v1096_v44 = vpop.f32.mrb[8].mxu1 }
  0xfa   : > { %v488_v45 = vadd.f32 %v1084_v33, %v408_v40  ;;  %v395_v46 = vpop.f32.mrb[7].mxu0  ;;  %v632_v47 = vpop.f32.mrb[9].mxu1 }
  0xfb   : > { %v407_v48 = vadd.f32 %v395_v46, %v323_v36  ;;  %v486_v49 = vadd.f32 %v472_v35, %v406_v42  ;;  %v1097_v50 = vpop.f32.mrb[10].mxu1 }
  0xfc   : > { %v635_v51 = vpop.f32.mrb[11].mxu1 }
  0xfd   : > { %v487_v52 = vadd.f32 %v475_v38, %v407_v48 }
  0xff   : > { %v1090_v53 = vpop.f32.mrb[8].mxu0 }
 0x100   : > { %v578_v54 = vadd.f32 %v1090_v53, %v488_v45  ;;  %v562_v55 = vpop.f32.mrb[9].mxu0 }
 0x101   : > { %v576_v56 = vadd.f32 %v562_v55, %v486_v49  ;;  %v1091_v57 = vpop.f32.mrb[10].mxu0  ;;  %v1108_v58 = vpop.f32.mrb[12].mxu1 }
 0x102   : > { %v648_v59 = vadd.f32 %v1096_v44, %v578_v54  ;;  %v565_v60 = vpop.f32.mrb[11].mxu0  ;;  %v808_v61 = vpop.f32.mrb[13].mxu1 }
 0x103   : > { %v577_v62 = vadd.f32 %v565_v60, %v487_v52  ;;  %v646_v63 = vadd.f32 %v632_v47, %v576_v56  ;;  %v1109_v0 = vpop.f32.mrb[14].mxu1 }
 0x104   : > { %v811_v1 = vpop.f32.mrb[15].mxu1 }
 0x105   : > { %v647_v2 = vadd.f32 %v635_v51, %v577_v62 }
 0x107   : > { %v1102_v3 = vpop.f32.mrb[12].mxu0 }
 0x108   : > { %v734_v4 = vadd.f32 %v1102_v3, %v648_v59  ;;  %v718_v5 = vpop.f32.mrb[13].mxu0 }
 0x109   : > { %v732_v6 = vadd.f32 %v718_v5, %v646_v63  ;;  %v1103_v7 = vpop.f32.mrb[14].mxu0 }
 0x10a   : > { %v824_v8 = vadd.f32 %v1108_v58, %v734_v4  ;;  %v721_v9 = vpop.f32.mrb[15].mxu0 }
 0x10b   : > { %v733_v10 = vadd.f32 %v721_v9, %v647_v2  ;;  %v822_v11 = vadd.f32 %v808_v61, %v732_v6 }
 0x10d   : > { %v823_v12 = vadd.f32 %v811_v1, %v733_v10 }
 0x10f   : > { %v1114_v13 = vpop.f32.mrb[16].mxu0 }
 0x110   : > { %v899_v15 = vadd.f32 %v1114_v13, %v824_v8  ;;  %v883_v16 = vpop.f32.mrb[17].mxu0 }
 0x111   : > { %v897_v17 = vadd.f32 %v883_v16, %v822_v11  ;;  %v1115_v18 = vpop.f32.mrb[18].mxu0 }
 0x112   : > { %v909_v19 = vadd.f32 %v1032_v14, %v899_v15  ;;  %v886_v20 = vpop.f32.mrb[19].mxu0 }
 0x113   : > { %v907_v21 = vadd.f32 %v1032_v14, %v897_v17  ;;  %v898_v22 = vadd.f32 %v886_v20, %v823_v12 }
 0x114   : > { %913 = vst.msk [vmem:[%s170_s15 + $0x10] sm:$0xff] %vm910_vm7, %v909_v19 }
 0x115   : > { %911 = vst.msk [vmem:[%s170_s15] sm:$0xff] %vm910_vm7, %v907_v21  ;;  %v908_v23 = vadd.f32 %v1032_v14, %v898_v22 }
 0x117   : > { %912 = vst.msk [vmem:[%s170_s15 + $0x8] sm:$0xff] %vm910_vm7, %v908_v23 }
 0x118 PF: > { %s13_s12 = sadd.s32 1, %s1162_s12  }
 0x119   : > { %p10_p4 = scmp.ge.s32.totalorder %s13_s12, 4  }
 0x11b   :  { %12 = sbr.rel (!%p10_p4) target bundleno = 1 (0x1), region = 70 }

// kernel: eoct_conv_forward.7
= control target key start
LH: loop header
LB: loop body
LE: loop exit
PB: predicated region body
PF: predicated region fallthrough
CT: control target
= control target key end

     0   :  { %s5195_s18 = smov 0   ;;  %s6252_s0 = inlined_call_operand.vmem [shape: bf16[2,342,4], index: 0, kind: input, shape index: {}]   ;;  %s6253_s1 = inlined_call_operand.vmem [shape: bf16[9,4,8], index: 1, kind: input, shape index: {}]   ;;  %s6254_s2 = inlined_call_operand.vmem [shape: f32[1,8], index: 2, kind: input, shape index: {}]   ;;  %s6255_s3 = inlined_call_operand.vmem [shape: f32[2,288,8], index: 3, kind: input, shape index: {}]   ;;  %s6256_s4 = inlined_call_operand.vmem [shape: f32[2,288,8], index: 4, kind: input, shape index: {}]   ;;  %s6257_s5 = inlined_call_operand.vmem [shape: f32[2,288,8], index: 5, kind: output, shape index: {}]  }
   0x1 LB: > { %s4017_s19 = sadd.s32 4294967295, %s5163_s18   ;;  %p4021_p0 = scmp.ge.s32.totalorder %s5163_s18, 1  ;;  %s5163_s18 = sphi %s5195_s18, %s15_s18  }
   0x2   : > { %p207_p1 = scmp.lt.s32.totalorder %s5163_s18, 3 }
   0x4   : > { %p208_p2 = pnand %p4021_p0, %p207_p1 }
   0x5   : > { %vm603_vm0 = vcmask (!%p208_p2), 1041408   ;;  %v4140_v0 = vld [vmem:[%s6253_s1 + $0x8] sm:$0x3] (!%p208_p2)  ;;  %v4026_v1 = vld [vmem:[%s6253_s1 + $0x2] sm:$0x3] (!%p208_p2)  ;;  %p245_p3 = scmp.lt.s32.totalorder (!%p208_p2), %s4017_s19, 1 }
   0x6   : > { %211 = sbr.rel (%p208_p2) target bundleno = 575 (0x23f), region = 40  ;;  %5068 = vmatprep.subr.msk.bf16.mxu0 (!%p208_p2), %vm603_vm0, %v4140_v0  ;;  %5064 = vmatprep.subr.msk.bf16.mxu1 (!%p208_p2), %vm603_vm0, %v4026_v1  ;;  %v5212_v2 = vsel (!%p208_p2), %vm603_vm0, %v4140_v0, 0  ;;  %v605_v3 = vsel (!%p208_p2), %vm603_vm0, %v4026_v1, 0  ;;  %v4160_v4 = vld [vmem:[%s6253_s1 + $0xa] sm:$0x3] (!%p208_p2)  ;;  %vm548_vm2 = vcmask (!%p208_p2), 31744  }
   0x7   : > { %4585 = vmatpush3.bf16.msra.mxu0 (!%p208_p2), %v5212_v2  ;;  %4433 = vmatpush3.bf16.msra.mxu1 (!%p208_p2), %v605_v3  ;;  %v302_v5 = vld [vmem:[%s6253_s1] sm:$0x3] (!%p208_p2)  ;;  %vm399_vm1 = vsmask.f32 (!%p208_p2), 7424  ;;  %v5233_v6 = vsel (!%p208_p2), %vm603_vm0, %v4160_v4, 0  ;;  %vm2206_vm4 = vcmask (!%p208_p2), 1045504  }
   0x8   : > { %5070 = vmatprep.subr.msk.bf16.mxu0 (!%p208_p2), %vm603_vm0, %v4160_v4  ;;  %5065 = vmatprep.subr.msk.bf16.mxu1 (!%p208_p2), %vm603_vm0, %v302_v5  ;;  %vm1759_vm3 = vsmask.f32 (!%p208_p2), 6400  ;;  %v821_v12 = vsel (!%p208_p2), %vm603_vm0, %v302_v5, 0  ;;  %v5281_v39 = vld [vmem:[%s6253_s1 + $0x4] sm:$0x3] (!%p208_p2)  ;;  %vm1006_vm5 = vcmask (!%p208_p2), 1046528  }
   0x9   : > { %v5315_v1 = vld [vmem:[%s6253_s1 + $0xc] sm:$0x3] (!%p208_p2)  ;;  %vm2959_vm6 = vsmask.f32 (!%p208_p2), 5376  ;;  %vm3406_vm7 = vcmask (!%p208_p2), 1044480   ;;  %vm3901_vm8 = vcmask (!%p208_p2), 64512  }
   0xd   : > { %s6259_s19 = smov (!%p245_p3, %s4017_s19), 1 }
   0xe   : > { %s5074_s28 = smul.u32 172, %s6259_s19 }
   0xf   : > { %s5075_s21 = smul.u32 288, %s6259_s19 }
  0x10   : > { %s5230_s6 = scalar_lea.vmem %s6252_s0, %s5074_s28 }
  0x11   : > { %v266_v7 = vld [vmem:[%s5230_s6] sm:$0xf]  ;;  %v5237_v8 = vld [vmem:[%s5230_s6 + $0x4] sm:$0xf]  ;;  %v5243_v10 = vld [vmem:[%s5230_s6 + $0x8] sm:$0xff]   ;;  %s6039_s24 = scalar_lea.vmem %s6255_s3, %s5075_s21  ;;  %s6049_s29 = scalar_lea.vmem %s6256_s4, %s5075_s21 }
  0x12   : > { %v5240_v9 = vcombine.low %v266_v7, %v5237_v8  ;;  %v1314_v11 = vld [vmem:[%s5230_s6 + $0x8] sm:$0xe]  ;;  %v5248_v13 = vld [vmem:[%s5230_s6 + $0xc] sm:$0xf]  ;;  %v408_v16 = vshll.u32 %v5243_v10, 16  ;;  %v412_v17 = vshrl.u32 %v5243_v10, 16 }
  0x13   : > { %v5255_v18 = vld [vmem:[%s5230_s6 + $0x10] sm:$0xff]   ;;  %v5261_v20 = vcombine.low %v1314_v11, %v5248_v13  ;;  %v5269_v28 = vld [vmem:[%s5230_s6 + $0x18] sm:$0xff]   ;;  %v5275_v34 = vld [vmem:[%s5230_s6 + $0x20] sm:$0xff]  }
  0x14   : > { %v401_v14 = vshrl.u32 %v5240_v9, 16  ;;  %v403_v15 = vshll.u32 %v5240_v9, 16  ;;  %v5258_v19 = vld [vmem:[%s5230_s6 + $0x10] sm:$0xff]   ;;  %v410_v22 = vrot.slane %v408_v16, 1  ;;  %v1769_v23 = vshrl.u32 %v5255_v18, 16  ;;  %v5272_v33 = vld [vmem:[%s5230_s6 + $0x18] sm:$0xff]  }
  0x15   : > { %v1772_v24 = vshll.u32 %v5255_v18, 16  ;;  %v1761_v25 = vshrl.u32 %v5261_v20, 16  ;;  %v1764_v26 = vshll.u32 %v5261_v20, 16  ;;  %v416_v27 = vshll.u32 %v5258_v19, 16  ;;  %v5290_v48 = vld [vmem:[%s5230_s6 + $0x20] sm:$0xff]   ;;  %v5293_v49 = vld [vmem:[%s5230_s6 + $0x28] sm:$0xff]  }
  0x16   : > { %v405_v21 = vrot.slane %v403_v15, 1  ;;  %v414_v30 = vor.u32 %v412_v17, %v410_v22  ;;  %v1771_v31 = vrot.slane %v1769_v23, 1  ;;  %v1778_v38 = vshrl.u32 %v5269_v28, 16  ;;  %v5299_v54 = vld [vmem:[%s5230_s6 + $0x28] sm:$0xff]   ;;  %v5305_v59 = vld [vmem:[%s5230_s6 + $0x30] sm:$0xff]   ;;  %v5329_v23 = vld [vmem:[%s5230_s6 + $0x38] sm:$0xff]  }
  0x17   : > { %v1774_v32 = vrot.slane %v1772_v24, 2  ;;  %v1763_v35 = vrot.slane %v1761_v25, 1  ;;  %v1766_v36 = vrot.slane %v1764_v26, 2  ;;  %v418_v37 = vrot.slane %v416_v27, 1  ;;  %v5310_v0 = vld [vmem:[%s5230_s6 + $0x30] sm:$0xff]  }
  0x18   : > { %v406_v29 = vor.u32 %v405_v21, %v401_v14  ;;  %v1781_v42 = vshll.u32 %v5269_v28, 16  ;;  %v420_v43 = vshrl.u32 %v5258_v19, 16  ;;  %v1780_v46 = vrot.slane %v1778_v38, 1 }
  0x19   : > { %v1775_v41 = vor.u32 %v1774_v32, %v1771_v31  ;;  %v1767_v44 = vor.u32 %v1766_v36, %v1763_v35  ;;  %v419_v45 = vsel %vm399_vm1, %v414_v30, %v418_v37  ;;  %v424_v47 = vshll.u32 %v5272_v33, 16  ;;  %v5338_v35 = vld [vmem:[%s5230_s6 + $0x38] sm:$0xff]  }
  0x1a   : > { %v411_v40 = vsel %vm399_vm1, %v406_v29, %v410_v22  ;;  %v1783_v50 = vrot.slane %v1781_v42, 2  ;;  %v422_v51 = vor.u32 %v420_v43, %v418_v37  ;;  %v1787_v52 = vshrl.u32 %v5275_v34, 16 }
  0x1b   : > { %4434 = vmatprep.mubr.msk.bf16.mxu1 %vm548_vm2, %v411_v40  ;;  %v1790_v53 = vshll.u32 %v5275_v34, 16  ;;  %v1776_v55 = vsel %vm1759_vm3, %v1767_v44, %v1775_v41  ;;  %v426_v56 = vrot.slane %v424_v47, 1  ;;  %v428_v57 = vshrl.u32 %v5272_v33, 16  ;;  %v5349_v44 = vld [vmem:[%s5230_s6 + $0x40] sm:$0xff]  }
  0x1c   : > { %4435 = vmatmul.mubr.msk.bf16.vlgmr.msra.gmra.mrb[0].mxu1 %vm548_vm2, %v419_v45  ;;  %v432_v58 = vshll.u32 %v5290_v48, 16  ;;  %4586 = vmatprep.mubr.msk.bf16.mxu0 %vm548_vm2, %v1776_v55  ;;  %v1784_v60 = vor.u32 %v1783_v50, %v1780_v46  ;;  %v1789_v61 = vrot.slane %v1787_v52, 1  ;;  %v1796_v63 = vshrl.u32 %v5293_v49, 16 }
  0x1d   : > { %4471 = vmatpush3.bf16.msra.mxu1 %v821_v12  ;;  %v1792_v62 = vrot.slane %v1790_v53, 2  ;;  %v427_v3 = vsel %vm399_vm1, %v422_v51, %v426_v56  ;;  %v430_v4 = vor.u32 %v428_v57, %v426_v56  ;;  %v1799_v7 = vshll.u32 %v5293_v49, 16  ;;  %v5354_v51 = vld [vmem:[%s5230_s6 + $0x40] sm:$0xff]  }
  0x1e   : > { %5066 = vmatprep.subr.msk.bf16.mxu1 %vm603_vm0, %v5281_v39  ;;  %v434_v5 = vrot.slane %v432_v58, 1  ;;  %v1785_v11 = vsel %vm1759_vm3, %v1775_v41, %v1784_v60  ;;  %4438 = vmatprep.mubr.msk.bf16.mxu1 %vm548_vm2, %v427_v3  ;;  %v1798_v14 = vrot.slane %v1796_v63, 1  ;;  %v436_v15 = vshrl.u32 %v5290_v48, 16  ;;  %v5365_v63 = vld [vmem:[%s5230_s6 + $0x48] sm:$0xff]  }
  0x1f   : > { %v1793_v12 = vor.u32 %v1792_v62, %v1789_v61  ;;  %4587 = vmatmul.mubr.msk.bf16.vlgmr.msra.gmra.mrb[0].mxu0 %vm548_vm2, %v1785_v11  ;;  %v1801_v17 = vrot.slane %v1799_v7, 2  ;;  %v440_v21 = vshll.u32 %v5299_v54, 16  ;;  %v1805_v22 = vshrl.u32 %v5305_v59, 16  ;;  %v5362_v62 = vld [vmem:[%s5230_s6 + $0x48] sm:$0xff]  }
  0x20   : > { %v435_v16 = vsel %vm399_vm1, %v430_v4, %v434_v5  ;;  %4623 = vmatpush3.bf16.msra.mxu0 %v5233_v6  ;;  %v438_v25 = vor.u32 %v436_v15, %v434_v5  ;;  %v1808_v26 = vshll.u32 %v5305_v59, 16  ;;  %v444_v27 = vshrl.u32 %v5299_v54, 16 }
  0x21   : > { %v1794_v24 = vsel %vm1759_vm3, %v1784_v60, %v1793_v12  ;;  %v1802_v29 = vor.u32 %v1801_v17, %v1798_v14  ;;  %v442_v30 = vrot.slane %v440_v21, 1  ;;  %v1807_v31 = vrot.slane %v1805_v22, 1  ;;  %5071 = vmatprep.subr.msk.bf16.mxu0 %vm603_vm0, %v5315_v1  ;;  %v5374_v14 = vld [vmem:[%s5230_s6 + $0x50] sm:$0xff]  }
  0x22   : > { %4590 = vmatprep.mubr.msk.bf16.mxu0 %vm548_vm2, %v1794_v24  ;;  %v448_v32 = vshll.u32 %v5310_v0, 16  ;;  %v1810_v6 = vrot.slane %v1808_v26, 2  ;;  %v1814_v36 = vshrl.u32 %v5329_v23, 16  ;;  %v1817_v37 = vshll.u32 %v5329_v23, 16 }
  0x23   : > { %v452_v38 = vshrl.u32 %v5310_v0, 16  ;;  %v1803_v40 = vsel %vm1759_vm3, %v1793_v12, %v1802_v29  ;;  %v443_v41 = vsel %vm399_vm1, %v438_v25, %v442_v30  ;;  %v446_v42 = vor.u32 %v444_v27, %v442_v30  ;;  %v5382_v25 = vld [vmem:[%s5230_s6 + $0x50] sm:$0xff]  }
  0x24   : > { %4439 = vmatmul.mubr.msk.bf16.gmra.mrb[4].mxu1 %vm548_vm2, %v435_v16  ;;  %v450_v43 = vrot.slane %v448_v32, 1  ;;  %v1811_v45 = vor.u32 %v1810_v6, %v1807_v31  ;;  %v1816_v46 = vrot.slane %v1814_v36, 1  ;;  %v1819_v47 = vrot.slane %v1817_v37, 2 }
  0x25   : > { %4442 = vmatprep.mubr.msk.bf16.mxu1 %vm548_vm2, %v443_v41  ;;  %v456_v50 = vshll.u32 %v5338_v35, 16  ;;  %v1823_v55 = vshrl.u32 %v5349_v44, 16  ;;  %v1826_v56 = vshll.u32 %v5349_v44, 16  ;;  %v460_v61 = vshrl.u32 %v5338_v35, 16  ;;  %v5392_v41 = vld [vmem:[%s5230_s6 + $0x58] sm:$0xff]  }
  0x26   : > { %v451_v52 = vsel %vm399_vm1, %v446_v42, %v450_v43  ;;  %v454_v53 = vor.u32 %v452_v38, %v450_v43  ;;  %v1812_v57 = vsel %vm1759_vm3, %v1802_v29, %v1811_v45  ;;  %v1820_v58 = vor.u32 %v1819_v47, %v1816_v46  ;;  %v5387_v29 = vld [vmem:[%s5230_s6 + $0x58] sm:$0xff]  }
  0x27   : > { %v458_v60 = vrot.slane %v456_v50, 1  ;;  %4591 = vmatmul.mubr.msk.bf16.gmra.mrb[4].mxu0 %vm548_vm2, %v1803_v40  ;;  %v1825_v3 = vrot.slane %v1823_v55, 1  ;;  %v1828_v4 = vrot.slane %v1826_v56, 2  ;;  %v464_v5 = vshll.u32 %v5354_v51, 16 }
  0x28   : > { %v468_v7 = vshrl.u32 %v5354_v51, 16  ;;  %4594 = vmatprep.mubr.msk.bf16.mxu0 %vm548_vm2, %v1812_v57  ;;  %v1832_v12 = vshrl.u32 %v5362_v62, 16  ;;  %v1835_v16 = vshll.u32 %v5362_v62, 16  ;;  %v472_v17 = vshll.u32 %v5365_v63, 16  ;;  %v2200_v57 = vld [vmem:[%s5230_s6 + $0x8] sm:$0xc] }
  0x29   : > { %v459_v11 = vsel %vm399_vm1, %v454_v53, %v458_v60  ;;  %v1829_v15 = vor.u32 %v1828_v4, %v1825_v3  ;;  %v466_v21 = vrot.slane %v464_v5, 1  ;;  %v1841_v22 = vshrl.u32 %v5374_v14, 16 }
  0x2a   : > { %v1844_v24 = vshll.u32 %v5374_v14, 16  ;;  %v1821_v26 = vsel %vm1759_vm3, %v1811_v45, %v1820_v58  ;;  %v462_v27 = vor.u32 %v460_v61, %v458_v60  ;;  %v1834_v30 = vrot.slane %v1832_v12, 1 }
  0x2b   : > { %v1837_v31 = vrot.slane %v1835_v16, 2  ;;  %v470_v32 = vor.u32 %v468_v7, %v466_v21  ;;  %v474_v6 = vrot.slane %v472_v17, 1  ;;  %v1830_v36 = vsel %vm1759_vm3, %v1820_v58, %v1829_v15  ;;  %v5406_v58 = vld [vmem:[%s5230_s6 + $0x60] sm:$0xff]  }
  0x2c   : > { %4443 = vmatmul.mubr.msk.bf16.gmra.mrb[8].mxu1 %vm548_vm2, %v451_v52  ;;  %v1843_v37 = vrot.slane %v1841_v22, 1  ;;  %v1846_v38 = vrot.slane %v1844_v24, 2  ;;  %v480_v40 = vshll.u32 %v5382_v25, 16  ;;  %v467_v42 = vsel %vm399_vm1, %v462_v27, %v466_v21 }
  0x2d   : > { %4446 = vmatprep.mubr.msk.bf16.mxu1 %vm548_vm2, %v459_v11  ;;  %v476_v43 = vshrl.u32 %v5365_v63, 16  ;;  %v1850_v45 = vshrl.u32 %v5387_v29, 16  ;;  %v1853_v46 = vshll.u32 %v5387_v29, 16  ;;  %v1838_v47 = vor.u32 %v1837_v31, %v1834_v30  ;;  %v5411_v11 = vld [vmem:[%s5230_s6 + $0x68] sm:$0xff]  }
  0x2e   : > { %v475_v50 = vsel %vm399_vm1, %v470_v32, %v474_v6  ;;  %v484_v52 = vshrl.u32 %v5382_v25, 16  ;;  %v488_v53 = vshll.u32 %v5392_v41, 16  ;;  %v1847_v55 = vor.u32 %v1846_v38, %v1843_v37  ;;  %v5428_v32 = vld [vmem:[%s5230_s6 + $0x70] sm:$0xff]  }
  0x2f   : > { %4595 = vmatmul.mubr.msk.bf16.gmra.mrb[8].mxu0 %vm548_vm2, %v1821_v26  ;;  %v482_v56 = vrot.slane %v480_v40, 1  ;;  %v478_v60 = vor.u32 %v476_v43, %v474_v6  ;;  %v1852_v61 = vrot.slane %v1850_v45, 1  ;;  %v1855_v3 = vrot.slane %v1853_v46, 2  ;;  %v5434_v40 = vld [vmem:[%s5230_s6 + $0x78] sm:$0xff]  }
  0x30   : > { %4598 = vmatprep.mubr.msk.bf16.mxu0 %vm548_vm2, %v1830_v36  ;;  %v1839_v4 = vsel %vm1759_vm3, %v1829_v15, %v1838_v47  ;;  %v490_v7 = vrot.slane %v488_v53, 1  ;;  %v1848_v12 = vsel %vm1759_vm3, %v1838_v47, %v1847_v55  ;;  %v4161_v16 = vcombine.low %v2200_v57, %v5248_v13 }
  0x31   : > { %v486_v5 = vor.u32 %v484_v52, %v482_v56  ;;  %v496_v17 = vshll.u32 %v5406_v58, 16  ;;  %v483_v21 = vsel %vm399_vm1, %v478_v60, %v482_v56  ;;  %v492_v22 = vshrl.u32 %v5392_v41, 16  ;;  %v5449_v56 = vld [vmem:[%s5230_s6 + $0x80] sm:$0xff]  }
  0x32   : > { %v5420_v15 = vor.u32 %v1855_v3, %v1852_v61  ;;  %v500_v26 = vshrl.u32 %v5406_v58, 16  ;;  %v504_v27 = vshll.u32 %v5411_v11, 16  ;;  %v2207_v13 = vrot.slane %v4161_v16, 2 }
  0x33   : > { %v491_v24 = vsel %vm399_vm1, %v486_v5, %v490_v7  ;;  %v2208_v30 = vrot.slane %v5255_v18, 2  ;;  %v498_v31 = vrot.slane %v496_v17, 1  ;;  %v494_v6 = vor.u32 %v492_v22, %v490_v7 }
  0x34   : > { %4447 = vmatmul.mubr.msk.bf16.gmra.mrb[12].mxu1 %vm548_vm2, %v467_v42  ;;  %v1857_v36 = vsel %vm1759_vm3, %v1847_v55, %v5420_v15  ;;  %v506_v38 = vrot.slane %v504_v27, 1  ;;  %v512_v18 = vshll.u32 %v5428_v32, 16  ;;  %v2210_v45 = vrot.slane %v5269_v28, 2  ;;  %v5479_v27 = vld [vmem:[%s5230_s6 + $0x90] ss:$0 sps:$4 sm:$0x11]  }
  0x35   : > { %4450 = vmatprep.mubr.msk.bf16.mxu1 %vm548_vm2, %v475_v50  ;;  %v502_v37 = vor.u32 %v500_v26, %v498_v31  ;;  %v2209_v42 = vsel %vm2206_vm4, %v2207_v13, %v2208_v30  ;;  %v499_v43 = vsel %vm399_vm1, %v494_v6, %v498_v31  ;;  %v508_v46 = vshrl.u32 %v5411_v11, 16 }
  0x36   : > { %v516_v50 = vshrl.u32 %v5428_v32, 16  ;;  %v520_v52 = vshll.u32 %v5434_v40, 16  ;;  %v2212_v53 = vrot.slane %v5275_v34, 2  ;;  %v514_v55 = vrot.slane %v512_v18, 1  ;;  %v5462_v34 = vld [vmem:[%s6253_s1 + $0xe] sm:$0x3] }
  0x37   : > { %4599 = vmatmul.mubr.msk.bf16.gmra.mrb[12].mxu0 %vm548_vm2, %v1839_v4  ;;  %v507_v47 = vsel %vm399_vm1, %v502_v37, %v506_v38  ;;  %v2738_v28 = vsel %vm603_vm0, %v5315_v1, 0  ;;  %v510_v57 = vor.u32 %v508_v46, %v506_v38  ;;  %v2211_v60 = vsel %vm2206_vm4, %v2208_v30, %v2210_v45  ;;  %v5456_v4 = vld [vmem:[%s5230_s6 + $0x88] sm:$0xff]  }
  0x38   : > { %4602 = vmatprep.mubr.msk.bf16.mxu0 %vm548_vm2, %v1848_v12  ;;  %v518_v61 = vor.u32 %v516_v50, %v514_v55  ;;  %v522_v3 = vrot.slane %v520_v52, 1  ;;  %v2213_v5 = vsel %vm2206_vm4, %v2210_v45, %v2212_v53  ;;  %v528_v7 = vshll.u32 %v5449_v56, 16 }
  0x39   : > { %v515_v1 = vsel %vm399_vm1, %v510_v57, %v514_v55  ;;  %v2214_v12 = vrot.slane %v5293_v49, 2  ;;  %v524_v16 = vshrl.u32 %v5434_v40, 16  ;;  %v536_v22 = vshll.u32 %v5456_v4, 16  ;;  %v5506_v55 = vld [vmem:[%s5230_s6 + $0x60] sm:$0xff]   ;;  %v5525_v57 = vld [vmem:[%s5230_s6 + $0x68] sm:$0xff]  }
  0x3a   : > { %v523_v17 = vsel %vm399_vm1, %v518_v61, %v522_v3  ;;  %v530_v26 = vrot.slane %v528_v7, 1  ;;  %v544_v37 = vshll.u32 %v5479_v27, 16  ;;  %v2218_v38 = vrot.slane %v5329_v23, 2  ;;  %v5543_v7 = vld [vmem:[%s5230_s6 + $0x78] sm:$0xff]  }
  0x3b   : > { %v526_v49 = vor.u32 %v524_v16, %v522_v3  ;;  %v2215_v13 = vsel %vm2206_vm4, %v2212_v53, %v2214_v12  ;;  %v538_v31 = vrot.slane %v536_v22, 1  ;;  %v2220_v18 = vrot.slane %v5349_v44, 2  ;;  %v5559_v22 = vld [vmem:[%s5230_s6 + $0x88] sm:$0xff]  }
  0x3c   : > { %4451 = vmatmul.mubr.msk.bf16.gmra.mrb[16].mxu1 %vm548_vm2, %v483_v21  ;;  %v532_v21 = vshrl.u32 %v5449_v56, 16  ;;  %v546_v45 = vrot.slane %v544_v37, 1  ;;  %v2222_v23 = vrot.slane %v5362_v62, 2  ;;  %v2224_v44 = vrot.slane %v5374_v14, 2 }
  0x3d   : > { %4454 = vmatprep.mubr.msk.bf16.mxu1 %vm548_vm2, %v491_v24  ;;  %v2216_v24 = vrot.slane %v5305_v59, 2  ;;  %v531_v59 = vsel %vm399_vm1, %v526_v49, %v530_v26  ;;  %v2226_v62 = vrot.slane %v5387_v29, 2  ;;  %v1099_v14 = vsel %vm603_vm0, %v5281_v39, 0 }
  0x3e   : > { %v534_v30 = vor.u32 %v532_v21, %v530_v26  ;;  %v2223_v52 = vsel %vm2206_vm4, %v2220_v18, %v2222_v23  ;;  %v2225_v53 = vsel %vm2206_vm4, %v2222_v23, %v2224_v44  ;;  %v2230_v61 = vrot.slane %v5525_v57, 2  ;;  %v5563_v26 = vld [vmem:[%s5230_s6 + $0x90] sm:$0xff]  }
  0x3f   : > { %4603 = vmatmul.mubr.msk.bf16.gmra.mrb[16].mxu0 %vm548_vm2, %v1857_v36  ;;  %v2217_v6 = vsel %vm2206_vm4, %v2214_v12, %v2216_v24  ;;  %v540_v36 = vshrl.u32 %v5456_v4, 16  ;;  %v2219_v46 = vsel %vm2206_vm4, %v2216_v24, %v2218_v38  ;;  %v2227_v29 = vsel %vm2206_vm4, %v2224_v44, %v2226_v62  ;;  %v5547_v12 = vld [vmem:[%s5230_s6 + $0x80] sm:$0xff]  }
  0x40   : > { %4624 = vmatprep.mubr.msk.bf16.mxu0 %vm548_vm2, %v2209_v42  ;;  %v539_v42 = vsel %vm399_vm1, %v534_v30, %v538_v31  ;;  %v2234_v16 = vrot.slane %v5543_v7, 2  ;;  %v2238_v49 = vrot.slane %v5559_v22, 2  ;;  %v2514_v30 = vld [vmem:[%s5230_s6 + $0x10] sm:$0xc] }
  0x44   : > { %4455 = vmatmul.mubr.msk.bf16.gmra.mrb[20].mxu1 %vm548_vm2, %v499_v43  ;;  %v542_v43 = vor.u32 %v540_v36, %v538_v31  ;;  %v5573_v31 = vld [vmem:[%s5230_s6 + $0x14] sm:$0xf] }
  0x45   : > { %4458 = vmatprep.mubr.msk.bf16.mxu1 %vm548_vm2, %v507_v47  ;;  %v2221_v47 = vsel %vm2206_vm4, %v2218_v38, %v2220_v18  ;;  %v5583_v37 = vcombine.low %v2514_v30, %v5573_v31  ;;  %v5586_v38 = vld [vmem:[%s5230_s6 + $0x18] sm:$0xff]  }
  0x46   : > { %v547_v50 = vsel %vm399_vm1, %v542_v43, %v546_v45  ;;  %v2647_v43 = vrot.slane %v5586_v38, 2 }
  0x47   : > { %4625 = vmatmul.mubr.msk.bf16.vlgmr.msra.gmra.mrb[0].mxu0 %vm548_vm2, %v2211_v60  ;;  %v5531_v60 = vld [vmem:[%s5230_s6 + $0x70] sm:$0xff]   ;;  %v2646_v18 = vrot.slane %v5583_v37, 2 }
  0x48   : > { %4661 = vmatpush3.bf16.msra.mxu0 %v2738_v28  ;;  %4628 = vmatprep.mubr.msk.bf16.mxu0 %vm548_vm2, %v2213_v5  ;;  %v2228_v28 = vrot.slane %v5506_v55, 2  ;;  %v2232_v3 = vrot.slane %v5531_v60, 2 }
  0x49   : > { %5072 = vmatprep.subr.msk.bf16.mxu0 %vm603_vm0, %v5462_v34 }
  0x4a   : > { %v2229_v39 = vsel %vm2206_vm4, %v2226_v62, %v2228_v28  ;;  %v2231_v5 = vsel %vm2206_vm4, %v2228_v28, %v2230_v61  ;;  %v2235_v21 = vsel %vm2206_vm4, %v2232_v3, %v2234_v16  ;;  %v3185_v62 = vsel %vm603_vm0, %v5462_v34, 0  ;;  %v5621_v28 = vld [vmem:[%s5230_s6 + $0x38] sm:$0xff]  }
  0x4c   : > { %4459 = vmatmul.mubr.msk.bf16.gmra.mrb[24].mxu1 %vm548_vm2, %v515_v1  ;;  %v2233_v1 = vsel %vm2206_vm4, %v2230_v61, %v2232_v3  ;;  %v2655_v61 = vrot.slane %v5621_v28, 2  ;;  %v5640_v3 = vld [vmem:[%s5230_s6 + $0x40] sm:$0xff]  }
  0x4d   : > { %4462 = vmatprep.mubr.msk.bf16.mxu1 %vm548_vm2, %v523_v17  ;;  %v2236_v17 = vrot.slane %v5547_v12, 2 }
  0x4f   : > { %4629 = vmatmul.mubr.msk.bf16.gmra.mrb[4].mxu0 %vm548_vm2, %v2215_v13  ;;  %v2237_v24 = vsel %vm2206_vm4, %v2234_v16, %v2236_v17  ;;  %v2240_v13 = vrot.slane %v5563_v26, 2  ;;  %v1000_v16 = vld [vmem:[%s5230_s6] sm:$0xe] }
  0x50   : > { %4632 = vmatprep.mubr.msk.bf16.mxu0 %vm548_vm2, %v2217_v6  ;;  %v2239_v6 = vsel %vm2206_vm4, %v2236_v17, %v2238_v49  ;;  %v2657_v17 = vrot.slane %v5640_v3, 2 }
  0x51   : > { %v2241_v36 = vsel %vm2206_vm4, %v2238_v49, %v2240_v13 }
  0x52   : > { %v2658_v49 = vsel %vm2206_vm4, %v2655_v61, %v2657_v17 }
  0x54   : > { %4463 = vmatmul.mubr.msk.bf16.gmra.mrb[28].mxu1 %vm548_vm2, %v531_v59  ;;  %v5579_v59 = vld [vmem:[%s5230_s6 + $0x98] ss:$0 sps:$4 sm:$0x33]  }
  0x55   : > { %4466 = vmatprep.mubr.msk.bf16.mxu1 %vm548_vm2, %v539_v42  ;;  %v2242_v42 = vrot.slane %v5579_v59, 2 }
  0x57   : > { %4633 = vmatmul.mubr.msk.bf16.gmra.mrb[8].mxu0 %vm548_vm2, %v2219_v46  ;;  %v2243_v45 = vsel %vm2206_vm4, %v2240_v13, %v2242_v42  ;;  %v5599_v46 = vld [vmem:[%s5230_s6 + $0x20] sm:$0xff]   ;;  %v5658_v13 = vld [vmem:[%s5230_s6 + $0x50] sm:$0xff]  }
  0x58   : > { %4636 = vmatprep.mubr.msk.bf16.mxu0 %vm548_vm2, %v2221_v47  ;;  %v2648_v47 = vsel %vm2206_vm4, %v2646_v18, %v2647_v43  ;;  %v2649_v23 = vrot.slane %v5599_v46, 2  ;;  %v2661_v42 = vrot.slane %v5658_v13, 2 }
  0x5c   : > { %4467 = vmatmul.mubr.msk.bf16.gmra.mrb[32].mxu1 %vm548_vm2, %v547_v50  ;;  %v5603_v50 = vld [vmem:[%s5230_s6 + $0x28] sm:$0xff]  }
  0x5d   : > { %4472 = vmatprep.mubr.msk.bf16.mxu1 %vm548_vm2, %v5240_v9  ;;  %v5517_v9 = vld [vmem:[%s6253_s1 + $0x6] sm:$0x3]  ;;  %v2651_v44 = vrot.slane %v5603_v50, 2 }
  0x5f   : > { %4637 = vmatmul.mubr.msk.bf16.gmra.mrb[12].mxu0 %vm548_vm2, %v2223_v52  ;;  %v2650_v52 = vsel %vm2206_vm4, %v2647_v43, %v2649_v23 }
  0x60   : > { %4640 = vmatprep.mubr.msk.bf16.mxu0 %vm548_vm2, %v2225_v53  ;;  %v5615_v53 = vld [vmem:[%s5230_s6 + $0x30] sm:$0xff]  }
  0x64   : > { %4473 = vmatmul.mubr.msk.bf16.vlgmr.msra.gmra.mrb[0].mxu1 %vm548_vm2, %v5243_v10 }
  0x65   : > { %4476 = vmatprep.mubr.msk.bf16.mxu1 %vm548_vm2, %v5258_v19  ;;  %4509 = vmatpush3.bf16.msra.mxu1 %v1099_v14  ;;  %v2652_v14 = vsel %vm2206_vm4, %v2649_v23, %v2651_v44  ;;  %v1012_v23 = vrot.slane %v5272_v33, 1 }
  0x66   : > { %5067 = vmatprep.subr.msk.bf16.mxu1 %vm603_vm0, %v5517_v9 }
  0x67   : > { %4641 = vmatmul.mubr.msk.bf16.gmra.mrb[16].mxu0 %vm548_vm2, %v2227_v29  ;;  %v5626_v29 = vld [vmem:[%s6253_s1 + $0x10] sm:$0x3] }
  0x68   : > { %4644 = vmatprep.mubr.msk.bf16.mxu0 %vm548_vm2, %v2229_v39  ;;  %v2653_v39 = vrot.slane %v5615_v53, 2 }
  0x6a   : > { %v2654_v34 = vsel %vm2206_vm4, %v2651_v44, %v2653_v39 }
  0x6c   : > { %4477 = vmatmul.mubr.msk.bf16.gmra.mrb[4].mxu1 %vm548_vm2, %v5272_v33 }
  0x6d   : > { %4480 = vmatprep.mubr.msk.bf16.mxu1 %vm548_vm2, %v5290_v48 }
  0x6f   : > { %4645 = vmatmul.mubr.msk.bf16.gmra.mrb[20].mxu0 %vm548_vm2, %v2231_v5  ;;  %v2656_v5 = vsel %vm2206_vm4, %v2653_v39, %v2655_v61  ;;  %v1538_v39 = vsel %vm603_vm0, %v5517_v9, 0  ;;  %v1014_v61 = vrot.slane %v5290_v48, 1  ;;  %v5146_v9 = vld [vmem:[%s6253_s1 + $0x8] sm:$0x3] }
  0x70   : > { %4648 = vmatprep.mubr.msk.bf16.mxu0 %vm548_vm2, %v2233_v1  ;;  %v5644_v1 = vld [vmem:[%s5230_s6 + $0x48] sm:$0xff]  }
  0x71   : > { %v1015_v48 = vsel %vm1006_vm5, %v1012_v23, %v1014_v61 }
  0x74   : > { %4481 = vmatmul.mubr.msk.bf16.gmra.mrb[8].mxu1 %vm548_vm2, %v5299_v54 }
  0x75   : > { %4484 = vmatprep.mubr.msk.bf16.mxu1 %vm548_vm2, %v5310_v0 }
  0x77   : > { %4649 = vmatmul.mubr.msk.bf16.gmra.mrb[24].mxu0 %vm548_vm2, %v2235_v21  ;;  %v4083_v21 = vcombine.low %v1000_v16, %v5237_v8  ;;  %v5663_v8 = vld [vmem:[%s5230_s6 + $0x58] sm:$0xff]   ;;  %v1016_v16 = vrot.slane %v5299_v54, 1 }
  0x78   : > { %4652 = vmatprep.mubr.msk.bf16.mxu0 %vm548_vm2, %v2237_v24  ;;  %v2659_v24 = vrot.slane %v5644_v1, 2  ;;  %v2663_v43 = vrot.slane %v5663_v8, 2 }
  0x79   : > { %v1007_v30 = vrot.slane %v4083_v21, 1  ;;  %v5705_v21 = vld [vmem:[%s5230_s6 + $0x78] sm:$0xff]   ;;  %v1017_v54 = vsel %vm1006_vm5, %v1014_v61, %v1016_v16 }
  0x7a   : > { %v2664_v44 = vsel %vm2206_vm4, %v2661_v42, %v2663_v43 }
  0x7c   : > { %4485 = vmatmul.mubr.msk.bf16.gmra.mrb[12].mxu1 %vm548_vm2, %v5338_v35 }
  0x7d   : > { %4488 = vmatprep.mubr.msk.bf16.mxu1 %vm548_vm2, %v5354_v51 }
  0x7f   : > { %4653 = vmatmul.mubr.msk.bf16.gmra.mrb[28].mxu0 %vm548_vm2, %v2239_v6  ;;  %v1008_v6 = vrot.slane %v5243_v10, 1  ;;  %v1010_v10 = vrot.slane %v5258_v19, 1 }
  0x80   : > { %4656 = vmatprep.mubr.msk.bf16.mxu0 %vm548_vm2, %v2241_v36  ;;  %v2660_v36 = vsel %vm2206_vm4, %v2657_v17, %v2659_v24 }
  0x81   : > { %v1009_v18 = vsel %vm1006_vm5, %v1007_v30, %v1008_v6  ;;  %v1018_v30 = vrot.slane %v5310_v0, 1 }
  0x84   : > { %4489 = vmatmul.mubr.msk.bf16.gmra.mrb[16].mxu1 %vm548_vm2, %v5365_v63 }
  0x85   : > { %4492 = vmatprep.mubr.msk.bf16.mxu1 %vm548_vm2, %v5382_v25 }
  0x87   : > { %4657 = vmatmul.mubr.msk.bf16.gmra.mrb[32].mxu0 %vm548_vm2, %v2243_v45  ;;  %v2662_v45 = vsel %vm2206_vm4, %v2659_v24, %v2661_v42  ;;  %v1020_v42 = vrot.slane %v5338_v35, 1  ;;  %v1022_v35 = vrot.slane %v5354_v51, 1 }
  0x88   : > { %4662 = vmatprep.mubr.msk.bf16.mxu0 %vm548_vm2, %v2648_v47  ;;  %v5676_v47 = vld [vmem:[%s5230_s6 + $0x60] sm:$0xff]  }
  0x89   : > { %v2665_v19 = vrot.slane %v5676_v47, 2 }
  0x8c   : > { %4493 = vmatmul.mubr.msk.bf16.gmra.mrb[20].mxu1 %vm548_vm2, %v5392_v41 }
  0x8d   : > { %4496 = vmatprep.mubr.msk.bf16.mxu1 %vm548_vm2, %v5406_v58 }
  0x8f   : > { %4663 = vmatmul.mubr.msk.bf16.vlgmr.msra.gmra.mrb[0].mxu0 %vm548_vm2, %v2650_v52  ;;  %v5681_v52 = vld [vmem:[%s5230_s6 + $0x68] sm:$0xff]  }
  0x90   : > { %4699 = vmatpush3.bf16.msra.mxu0 %v3185_v62  ;;  %4666 = vmatprep.mubr.msk.bf16.mxu0 %vm548_vm2, %v2652_v14  ;;  %v1011_v62 = vsel %vm1006_vm5, %v1008_v6, %v1010_v10  ;;  %v1013_v14 = vsel %vm1006_vm5, %v1010_v10, %v1012_v23  ;;  %v2667_v33 = vrot.slane %v5681_v52, 2  ;;  %v1019_v10 = vsel %vm1006_vm5, %v1016_v16, %v1018_v30 }
  0x91   : > { %5073 = vmatprep.subr.msk.bf16.mxu0 %vm603_vm0, %v5626_v29  ;;  %v2961_v16 = vshrl.u32 %v5583_v37, 16 }
  0x92   : > { %v2668_v17 = vsel %vm2206_vm4, %v2665_v19, %v2667_v33 }
  0x94   : > { %4497 = vmatmul.mubr.msk.bf16.gmra.mrb[24].mxu1 %vm548_vm2, %v5411_v11 }
  0x95   : > { %4500 = vmatprep.mubr.msk.bf16.mxu1 %vm548_vm2, %v5428_v32 }
  0x97   : > { %4667 = vmatmul.mubr.msk.bf16.gmra.mrb[4].mxu0 %vm548_vm2, %v2654_v34  ;;  %v2666_v34 = vsel %vm2206_vm4, %v2663_v43, %v2665_v19  ;;  %v5723_v43 = vld [vmem:[%s5230_s6 + $0x88] sm:$0xff]   ;;  %v1024_v19 = vrot.slane %v5365_v63, 1  ;;  %v2964_v63 = vshll.u32 %v5583_v37, 16 }
  0x98   : > { %4670 = vmatprep.mubr.msk.bf16.mxu0 %vm548_vm2, %v2656_v5  ;;  %v5696_v5 = vld [vmem:[%s5230_s6 + $0x70] sm:$0xff]   ;;  %v2675_v23 = vrot.slane %v5723_v43, 2 }
  0x99   : > { %v2669_v24 = vrot.slane %v5696_v5, 2  ;;  %v1025_v51 = vsel %vm1006_vm5, %v1022_v35, %v1024_v19 }
  0x9b   : > { %v2670_v6 = vsel %vm2206_vm4, %v2667_v33, %v2669_v24  ;;  %v1023_v33 = vsel %vm1006_vm5, %v1020_v42, %v1022_v35 }
  0x9c   : > { %4501 = vmatmul.mubr.msk.bf16.gmra.mrb[28].mxu1 %vm548_vm2, %v5434_v40 }
  0x9d   : > { %4504 = vmatprep.mubr.msk.bf16.mxu1 %vm548_vm2, %v5449_v56 }
  0x9f   : > { %4671 = vmatmul.mubr.msk.bf16.gmra.mrb[8].mxu0 %vm548_vm2, %v2658_v49  ;;  %v2671_v49 = vrot.slane %v5705_v21, 2 }
  0xa0   : > { %4674 = vmatprep.mubr.msk.bf16.mxu0 %vm548_vm2, %v2660_v36  ;;  %v5718_v36 = vld [vmem:[%s5230_s6 + $0x80] sm:$0xff]  }
  0xa1   : > { %v2673_v0 = vrot.slane %v5718_v36, 2 }
  0xa4   : > { %4505 = vmatmul.mubr.msk.bf16.gmra.mrb[32].mxu1 %vm548_vm2, %v5456_v4 }
  0xa5   : > { %4510 = vmatprep.mubr.msk.bf16.mxu1 %vm548_vm2, %v1009_v18  ;;  %v2672_v18 = vsel %vm2206_vm4, %v2669_v24, %v2671_v49 }
  0xa7   : > { %4675 = vmatmul.mubr.msk.bf16.gmra.mrb[12].mxu0 %vm548_vm2, %v2662_v45  ;;  %v1021_v45 = vsel %vm1006_vm5, %v1018_v30, %v1020_v42  ;;  %v1028_v30 = vrot.slane %v5392_v41, 1  ;;  %v2966_v42 = vrot.slane %v2964_v63, 3  ;;  %v2987_v41 = vshrl.u32 %v5603_v50, 16 }
  0xa8   : > { %4678 = vmatprep.mubr.msk.bf16.mxu0 %vm548_vm2, %v2664_v44  ;;  %v2674_v44 = vsel %vm2206_vm4, %v2671_v49, %v2673_v0  ;;  %v5142_v49 = vld [vmem:[%s5230_s6 + $0xa0] ss:$0 sps:$4 sm:$0x33]  }
  0xac   : > { %4511 = vmatmul.mubr.msk.bf16.vlgmr.msra.gmra.mrb[0].mxu1 %vm548_vm2, %v1011_v62  ;;  %v5736_v62 = vld [vmem:[%s5230_s6 + $0x90] sm:$0xff]  }
  0xad   : > { %4514 = vmatprep.mubr.msk.bf16.mxu1 %vm548_vm2, %v1013_v14  ;;  %4547 = vmatpush3.bf16.msra.mxu1 %v1538_v39  ;;  %v5740_v14 = vld [vmem:[%s5230_s6 + $0x98] sm:$0xff]   ;;  %v2676_v39 = vsel %vm2206_vm4, %v2673_v0, %v2675_v23  ;;  %v2677_v61 = vrot.slane %v5736_v62, 2  ;;  %v2681_v0 = vrot.slane %v5142_v49, 2 }
  0xae   : > { %5069 = vmatprep.subr.msk.bf16.mxu1 %vm603_vm0, %v5146_v9  ;;  %v2969_v9 = vshrl.u32 %v5586_v38, 16 }
  0xaf   : > { %4679 = vmatmul.mubr.msk.bf16.gmra.mrb[16].mxu0 %vm548_vm2, %v2666_v34  ;;  %v2679_v34 = vrot.slane %v5740_v14, 2  ;;  %v2678_v24 = vsel %vm2206_vm4, %v2675_v23, %v2677_v61  ;;  %v2981_v23 = vshll.u32 %v5599_v46, 16 }
  0xb0   : > { %4682 = vmatprep.mubr.msk.bf16.mxu0 %vm548_vm2, %v2668_v17  ;;  %v2972_v17 = vshll.u32 %v5586_v38, 16  ;;  %v2971_v37 = vrot.slane %v2969_v9, 2  ;;  %v2989_v9 = vrot.slane %v2987_v41, 2  ;;  %v3014_v41 = vshrl.u32 %v5640_v3, 16 }
  0xb4   : > { %4515 = vmatmul.mubr.msk.bf16.gmra.mrb[4].mxu1 %vm548_vm2, %v1015_v48  ;;  %v1026_v48 = vrot.slane %v5382_v25, 1 }
  0xb5   : > { %4518 = vmatprep.mubr.msk.bf16.mxu1 %vm548_vm2, %v1017_v54  ;;  %v2680_v54 = vsel %vm2206_vm4, %v2677_v61, %v2679_v34 }
  0xb6   : > { %v1029_v25 = vsel %vm1006_vm5, %v1026_v48, %v1028_v30 }
  0xb7   : > { %4683 = vmatmul.mubr.msk.bf16.gmra.mrb[20].mxu0 %vm548_vm2, %v2670_v6  ;;  %v2963_v6 = vrot.slane %v2961_v16, 2  ;;  %v1032_v16 = vrot.slane %v5411_v11, 1  ;;  %v3005_v11 = vshrl.u32 %v5621_v28, 16 }
  0xb8   : > { %4686 = vmatprep.mubr.msk.bf16.mxu0 %vm548_vm2, %v2672_v18  ;;  %v2974_v18 = vrot.slane %v2972_v17, 3 }
  0xb9   : > { %v2967_v35 = vor.u32 %v2966_v42, %v2963_v6  ;;  %v3008_v6 = vshll.u32 %v5621_v28, 16 }
  0xbc   : > { %4519 = vmatmul.mubr.msk.bf16.gmra.mrb[8].mxu1 %vm548_vm2, %v1019_v10  ;;  %v1027_v10 = vsel %vm1006_vm5, %v1024_v19, %v1026_v48  ;;  %v1030_v19 = vrot.slane %v5406_v58, 1  ;;  %v2996_v58 = vshrl.u32 %v5615_v53, 16 }
  0xbd   : > { %4522 = vmatprep.mubr.msk.bf16.mxu1 %vm548_vm2, %v1021_v45  ;;  %v2978_v45 = vshrl.u32 %v5599_v46, 16 }
  0xbe   : > { %v1031_v48 = vsel %vm1006_vm5, %v1028_v30, %v1030_v19  ;;  %v1034_v30 = vrot.slane %v5428_v32, 1  ;;  %v3017_v32 = vshll.u32 %v5640_v3, 16 }
  0xbf   : > { %4687 = vmatmul.mubr.msk.bf16.gmra.mrb[24].mxu0 %vm548_vm2, %v2674_v44  ;;  %v2975_v44 = vor.u32 %v2974_v18, %v2971_v37  ;;  %v2980_v61 = vrot.slane %v2978_v45, 2  ;;  %v2998_v37 = vrot.slane %v2996_v58, 2  ;;  %v3007_v45 = vrot.slane %v3005_v11, 2 }
  0xc0   : > { %4690 = vmatprep.mubr.msk.bf16.mxu0 %vm548_vm2, %v2676_v39  ;;  %v2990_v39 = vshll.u32 %v5603_v50, 16  ;;  %v3032_v58 = vshrl.u32 %v5658_v13, 16  ;;  %v3044_v11 = vshll.u32 %v5663_v8, 16 }
  0xc1   : > { %v2976_v63 = vsel %vm2959_vm6, %v2967_v35, %v2975_v44  ;;  %v1035_v35 = vsel %vm1006_vm5, %v1032_v16, %v1034_v30 }
  0xc2   : > { %v2992_v17 = vrot.slane %v2990_v39, 3 }
  0xc4   : > { %4523 = vmatmul.mubr.msk.bf16.gmra.mrb[12].mxu1 %vm548_vm2, %v1023_v33  ;;  %v2682_v33 = vsel %vm2206_vm4, %v2679_v34, %v2681_v0  ;;  %v2999_v34 = vshll.u32 %v5615_v53, 16  ;;  %v2993_v49 = vor.u32 %v2992_v17, %v2989_v9  ;;  %v3499_v0 = vsel %vm603_vm0, %v5626_v29, 0 }
  0xc5   : > { %4526 = vmatprep.mubr.msk.bf16.mxu1 %vm548_vm2, %v1025_v51  ;;  %v2983_v51 = vrot.slane %v2981_v23, 3  ;;  %v3010_v23 = vrot.slane %v3008_v6, 3  ;;  %v3023_v29 = vshrl.u32 %v5644_v1, 16 }
  0xc6   : > { %v3001_v18 = vrot.slane %v2999_v34, 3  ;;  %v3035_v34 = vshll.u32 %v5658_v13, 16 }
  0xc7   : > { %4691 = vmatmul.mubr.msk.bf16.gmra.mrb[28].mxu0 %vm548_vm2, %v2678_v24  ;;  %v2984_v24 = vor.u32 %v2983_v51, %v2980_v61  ;;  %v3011_v39 = vor.u32 %v3010_v23, %v3007_v45  ;;  %v3016_v61 = vrot.slane %v3014_v41, 2  ;;  %v3019_v51 = vrot.slane %v3017_v32, 3 }
  0xc8   : > { %4694 = vmatprep.mubr.msk.bf16.mxu0 %vm548_vm2, %v2680_v54  ;;  %v1033_v54 = vsel %vm1006_vm5, %v1030_v19, %v1032_v16  ;;  %v3026_v19 = vshll.u32 %v5644_v1, 16  ;;  %v3025_v17 = vrot.slane %v3023_v29, 2  ;;  %v3046_v23 = vrot.slane %v3044_v11, 3  ;;  %v5148_v29 = vld [vmem:[%s5230_s6 + $0x18] sm:$0xff]  }
  0xc9   : > { %v2985_v42 = vsel %vm2959_vm6, %v2975_v44, %v2984_v24  ;;  %v3002_v44 = vor.u32 %v3001_v18, %v2998_v37  ;;  %v3037_v37 = vrot.slane %v3035_v34, 3  ;;  %v1446_v18 = vrot.slane %v5261_v20, 1 }
  0xca   : > { %v3050_v32 = vshrl.u32 %v5676_v47, 16  ;;  %v3053_v20 = vshll.u32 %v5676_v47, 16  ;;  %v3071_v34 = vshll.u32 %v5696_v5, 16  ;;  %v3080_v11 = vshll.u32 %v5705_v21, 16 }
  0xcb   : > { %v3003_v16 = vsel %vm2959_vm6, %v2993_v49, %v3002_v44  ;;  %v3012_v9 = vsel %vm2959_vm6, %v3002_v44, %v3011_v39 }
  0xcc   : > { %4527 = vmatmul.mubr.msk.bf16.gmra.mrb[16].mxu1 %vm548_vm2, %v1027_v10  ;;  %v1036_v10 = vrot.slane %v5434_v40, 1 }
  0xcd   : > { %4530 = vmatprep.mubr.msk.bf16.mxu1 %vm548_vm2, %v1029_v25  ;;  %v2994_v25 = vsel %vm2959_vm6, %v2984_v24, %v2993_v49 }
  0xce   : > { %v1037_v40 = vsel %vm1006_vm5, %v1034_v30, %v1036_v10  ;;  %v1042_v30 = vrot.slane %v5479_v27, 1 }
  0xcf   : > { %4695 = vmatmul.mubr.msk.bf16.gmra.mrb[32].mxu0 %vm548_vm2, %v2682_v33  ;;  %v1038_v33 = vrot.slane %v5449_v56, 1 }
  0xd0   : > { %4700 = vmatprep.mubr.msk.bf16.mxu0 %vm548_vm2, %v2976_v63  ;;  %v1040_v63 = vrot.slane %v5456_v4, 1  ;;  %v3041_v4 = vshrl.u32 %v5663_v8, 16 }
  0xd1   : > { %v1039_v24 = vsel %vm1006_vm5, %v1036_v10, %v1038_v33  ;;  %v5147_v10 = vld [vmem:[%s5230_s6 + $0x10] sm:$0xff]  }
  0xd2   : > { %v1041_v56 = vsel %vm1006_vm5, %v1038_v33, %v1040_v63  ;;  %v3043_v45 = vrot.slane %v3041_v4, 2  ;;  %v3077_v4 = vshrl.u32 %v5705_v21, 16 }
  0xd4   : > { %4531 = vmatmul.mubr.msk.bf16.gmra.mrb[20].mxu1 %vm548_vm2, %v1031_v48  ;;  %v3028_v48 = vrot.slane %v3026_v19, 3  ;;  %v3047_v44 = vor.u32 %v3046_v23, %v3043_v45  ;;  %v1449_v19 = vrot.slane %v5148_v29, 1  ;;  %v3079_v45 = vrot.slane %v3077_v4, 2 }
  0xd5   : > { %4534 = vmatprep.mubr.msk.bf16.mxu1 %vm548_vm2, %v1033_v54  ;;  %v3020_v54 = vor.u32 %v3019_v51, %v3016_v61  ;;  %v3052_v61 = vrot.slane %v3050_v32, 2  ;;  %v3055_v51 = vrot.slane %v3053_v20, 3  ;;  %v3082_v23 = vrot.slane %v3080_v11, 3  ;;  %v5154_v11 = vld [vmem:[%s5230_s6 + $0x48] sm:$0xff]  }
  0xd6   : > { %v3029_v49 = vor.u32 %v3028_v48, %v3025_v17  ;;  %v3089_v32 = vshll.u32 %v5718_v36, 16  ;;  %v3116_v4 = vshll.u32 %v5740_v14, 16 }
  0xd7   : > { %4701 = vmatmul.mubr.msk.bf16.vlgmr.msra.gmra.mrb[0].mxu0 %vm548_vm2, %v2985_v42  ;;  %v3021_v6 = vsel %vm2959_vm6, %v3011_v39, %v3020_v54  ;;  %v3034_v42 = vrot.slane %v3032_v58, 2  ;;  %v3062_v39 = vshll.u32 %v5681_v52, 16  ;;  %v3068_v58 = vshrl.u32 %v5696_v5, 16 }
  0xd8   : > { %4737 = vmatpush3.bf16.msra.mxu0 %v3499_v0  ;;  %4704 = vmatprep.mubr.msk.bf16.mxu0 %vm548_vm2, %v2994_v25  ;;  %v1447_v0 = vrot.slane %v5147_v10, 1  ;;  %v3030_v25 = vsel %vm2959_vm6, %v3020_v54, %v3029_v49  ;;  %v3056_v54 = vor.u32 %v3055_v51, %v3052_v61  ;;  %v5151_v10 = vld [vmem:[%s5230_s6 + $0x30] sm:$0xff]   ;;  %v3083_v20 = vor.u32 %v3082_v23, %v3079_v45  ;;  %v5153_v51 = vld [vmem:[%s5230_s6 + $0x40] sm:$0xff]  }
  0xd9   : > { %v3038_v41 = vor.u32 %v3037_v37, %v3034_v42  ;;  %v3064_v48 = vrot.slane %v3062_v39, 3  ;;  %v3070_v37 = vrot.slane %v3068_v58, 2  ;;  %v5152_v39 = vld [vmem:[%s5230_s6 + $0x38] sm:$0xff]   ;;  %v3091_v61 = vrot.slane %v3089_v32, 3 }
  0xda   : > { %v1448_v27 = vsel %vm1006_vm5, %v1446_v18, %v1447_v0  ;;  %v3057_v42 = vsel %vm2959_vm6, %v3047_v44, %v3056_v54  ;;  %v3073_v18 = vrot.slane %v3071_v34, 3  ;;  %v1457_v29 = vrot.slane %v5152_v39, 1 }
  0xdb   : > { %v3039_v33 = vsel %vm2959_vm6, %v3029_v49, %v3038_v41  ;;  %v3107_v58 = vshll.u32 %v5736_v62, 16  ;;  %v3118_v23 = vrot.slane %v3116_v4, 3  ;;  %v3412_v4 = vrot.slane %v5603_v50, 3 }
  0xdc   : > { %4535 = vmatmul.mubr.msk.bf16.gmra.mrb[24].mxu1 %vm548_vm2, %v1035_v35  ;;  %v1043_v35 = vsel %vm1006_vm5, %v1040_v63, %v1042_v30  ;;  %v3414_v50 = vrot.slane %v5615_v53, 3 }
  0xdd   : > { %4538 = vmatprep.mubr.msk.bf16.mxu1 %vm548_vm2, %v1037_v40  ;;  %v3059_v40 = vshrl.u32 %v5681_v52, 16 }
  0xdf   : > { %4705 = vmatmul.mubr.msk.bf16.gmra.mrb[4].mxu0 %vm548_vm2, %v3003_v16  ;;  %v5149_v16 = vld [vmem:[%s5230_s6 + $0x20] sm:$0xff]   ;;  %v3061_v17 = vrot.slane %v3059_v40, 2  ;;  %v3098_v40 = vshll.u32 %v5723_v43, 16 }
  0xe0   : > { %4708 = vmatprep.mubr.msk.bf16.mxu0 %vm548_vm2, %v3012_v9  ;;  %v1451_v63 = vrot.slane %v5149_v16, 1  ;;  %v3048_v9 = vsel %vm2959_vm6, %v3038_v41, %v3047_v44  ;;  %v3074_v41 = vor.u32 %v3073_v18, %v3070_v37  ;;  %v3095_v44 = vshrl.u32 %v5723_v43, 16  ;;  %v5155_v18 = vld [vmem:[%s5230_s6 + $0x50] sm:$0xff]  }
  0xe1   : > { %v3065_v49 = vor.u32 %v3064_v48, %v3061_v17  ;;  %v1459_v16 = vrot.slane %v5153_v51, 1  ;;  %v3100_v17 = vrot.slane %v3098_v40, 3  ;;  %v3109_v37 = vrot.slane %v3107_v58, 3  ;;  %v5156_v40 = vld [vmem:[%s5230_s6 + $0x58] sm:$0xff]  }
  0xe2   : > { %v1465_v39 = vrot.slane %v5156_v40, 1  ;;  %v1868_v40 = vshrl.u32 %v5525_v57, 16 }
  0xe4   : > { %4539 = vmatmul.mubr.msk.bf16.gmra.mrb[28].mxu1 %vm548_vm2, %v1039_v24  ;;  %v1450_v24 = vsel %vm1006_vm5, %v1447_v0, %v1449_v19  ;;  %v1455_v0 = vrot.slane %v5151_v10, 1  ;;  %v1463_v10 = vrot.slane %v5155_v18, 1  ;;  %v3416_v18 = vrot.slane %v5621_v28, 3 }
  0xe5   : > { %4542 = vmatprep.mubr.msk.bf16.mxu1 %vm548_vm2, %v1041_v56  ;;  %v1452_v56 = vsel %vm1006_vm5, %v1449_v19, %v1451_v63  ;;  %v3075_v19 = vsel %vm2959_vm6, %v3065_v49, %v3074_v41 }
  0xe6   : > { %v1458_v48 = vsel %vm1006_vm5, %v1455_v0, %v1457_v29  ;;  %v3417_v53 = vsel %vm3406_vm7, %v3414_v50, %v3416_v18 }
  0xe7   : > { %4709 = vmatmul.mubr.msk.bf16.gmra.mrb[8].mxu0 %vm548_vm2, %v3021_v6  ;;  %v5150_v6 = vld [vmem:[%s5230_s6 + $0x28] sm:$0xff]  }
  0xe8   : > { %4712 = vmatprep.mubr.msk.bf16.mxu0 %vm548_vm2, %v3030_v25  ;;  %v1453_v30 = vrot.slane %v5150_v6, 1  ;;  %v3066_v25 = vsel %vm2959_vm6, %v3056_v54, %v3065_v49  ;;  %v1460_v54 = vsel %vm1006_vm5, %v1457_v29, %v1459_v16  ;;  %v3113_v49 = vshrl.u32 %v5740_v14, 16 }
  0xe9   : > { %v1461_v6 = vrot.slane %v5154_v11, 1  ;;  %v1473_v11 = vrot.slane %v5543_v7, 1 }
  0xea   : > { %v3115_v45 = vrot.slane %v3113_v49, 2 }
  0xec   : > { %4543 = vmatmul.mubr.msk.bf16.gmra.mrb[32].mxu1 %vm548_vm2, %v1043_v35  ;;  %v1454_v35 = vsel %vm1006_vm5, %v1451_v63, %v1453_v30  ;;  %v3084_v63 = vsel %vm2959_vm6, %v3074_v41, %v3083_v20 }
  0xed   : > { %4548 = vmatprep.mubr.msk.bf16.mxu1 %vm548_vm2, %v1448_v27  ;;  %v3086_v27 = vshrl.u32 %v5718_v36, 16 }
  0xef   : > { %4713 = vmatmul.mubr.msk.bf16.gmra.mrb[12].mxu0 %vm548_vm2, %v3039_v33  ;;  %v3088_v33 = vrot.slane %v3086_v27, 2 }
  0xf0   : > { %4716 = vmatprep.mubr.msk.bf16.mxu0 %vm548_vm2, %v3048_v9  ;;  %v3097_v9 = vrot.slane %v3095_v44, 2  ;;  %v3400_v44 = vld [vmem:[%s5230_s6 + $0x10] sm:$0x8] }
  0xf2   : > { %v3101_v34 = vor.u32 %v3100_v17, %v3097_v9 }
  0xf4   : > { %4549 = vmatmul.mubr.msk.bf16.vlgmr.msra.gmra.mrb[0].mxu1 %vm548_vm2, %v1450_v24  ;;  %v3092_v24 = vor.u32 %v3091_v61, %v3088_v33  ;;  %v1467_v61 = vrot.slane %v5506_v55, 1 }
  0xf5   : > { %4552 = vmatprep.mubr.msk.bf16.mxu1 %vm548_vm2, %v1452_v56  ;;  %4775 = vmatpush3.bf16.msra.mxu1 %v5212_v2  ;;  %v1456_v2 = vsel %vm1006_vm5, %v1453_v30, %v1455_v0  ;;  %v3104_v56 = vshrl.u32 %v5736_v62, 16  ;;  %v5876_v0 = vld [vmem:[%s5230_s6 + $0xa0] ss:$0 sps:$4 sm:$0x77]  }
  0xf6   : > { %v3093_v30 = vsel %vm2959_vm6, %v3083_v20, %v3092_v24  ;;  %v3122_v27 = vshrl.u32 %v5876_v0, 16  ;;  %v3125_v32 = vshll.u32 %v5876_v0, 16  ;;  %v3119_v20 = vor.u32 %v3118_v23, %v3115_v45 }
  0xf7   : > { %4717 = vmatmul.mubr.msk.bf16.gmra.mrb[16].mxu0 %vm548_vm2, %v3057_v42  ;;  %v3106_v42 = vrot.slane %v3104_v56, 2  ;;  %v1468_v17 = vsel %vm1006_vm5, %v1465_v39, %v1467_v61  ;;  %v1471_v56 = vrot.slane %v5531_v60, 1  ;;  %v1479_v45 = vrot.slane %v5563_v26, 1 }
  0xf8   : > { %4720 = vmatprep.mubr.msk.bf16.mxu0 %vm548_vm2, %v3066_v25  ;;  %v3102_v25 = vsel %vm2959_vm6, %v3092_v24, %v3101_v34  ;;  %v3127_v33 = vrot.slane %v3125_v32, 3  ;;  %v3408_v24 = vrot.slane %v5586_v38, 3  ;;  %v3410_v38 = vrot.slane %v5599_v46, 3 }
  0xf9   : > { %v3110_v41 = vor.u32 %v3109_v37, %v3106_v42  ;;  %v1474_v46 = vsel %vm1006_vm5, %v1471_v56, %v1473_v11  ;;  %v1859_v23 = vshrl.u32 %v5506_v55, 16 }
  0xfa   : > { %v3413_v42 = vsel %vm3406_vm7, %v3410_v38, %v3412_v4 }
  0xfb   : > { %v3111_v29 = vsel %vm2959_vm6, %v3101_v34, %v3110_v41  ;;  %v3120_v51 = vsel %vm2959_vm6, %v3110_v41, %v3119_v20  ;;  %v5145_v41 = vld [vmem:[%s5230_s6 + $0x98] ss:$0 sps:$4 sm:$0x11]   ;;  %v1861_v32 = vrot.slane %v1859_v23, 1  ;;  %s6063_s6 = scalar_lea.vmem %s6257_s5, %s5075_s21 }
  0xfc   : > { %4553 = vmatmul.mubr.msk.bf16.gmra.mrb[4].mxu1 %vm548_vm2, %v1454_v35  ;;  %v1462_v35 = vsel %vm1006_vm5, %v1459_v16, %v1461_v6  ;;  %v4239_v16 = vcombine.low %v3400_v44, %v5573_v31  ;;  %v3420_v44 = vrot.slane %v5644_v1, 3 }
  0xfd   : > { %4556 = vmatprep.mubr.msk.bf16.mxu1 %vm548_vm2, %v1456_v2  ;;  %v1464_v2 = vsel %vm1006_vm5, %v1461_v6, %v1463_v10  ;;  %v3411_v6 = vsel %vm3406_vm7, %v3408_v24, %v3410_v38 }
  0xff   : > { %4721 = vmatmul.mubr.msk.bf16.gmra.mrb[20].mxu0 %vm548_vm2, %v3075_v19  ;;  %v3124_v19 = vrot.slane %v3122_v27, 2 }
 0x100   : > { %4724 = vmatprep.mubr.msk.bf16.mxu0 %vm548_vm2, %v3084_v63  ;;  %v1466_v63 = vsel %vm1006_vm5, %v1463_v10, %v1465_v39  ;;  %v1477_v10 = vrot.slane %v5559_v22, 1  ;;  %v1871_v39 = vshll.u32 %v5525_v57, 16 }
 0x101   : > { %v3128_v9 = vor.u32 %v3127_v33, %v3124_v19  ;;  %v1880_v33 = vshll.u32 %v5531_v60, 16 }
 0x102   : > { %v1480_v27 = vsel %vm1006_vm5, %v1477_v10, %v1479_v45 }
 0x103   : > { %v3129_v31 = vsel %vm2959_vm6, %v3119_v20, %v3128_v9 }
 0x104   : > { %4557 = vmatmul.mubr.msk.bf16.gmra.mrb[8].mxu1 %vm548_vm2, %v1458_v48  ;;  %v3407_v48 = vrot.slane %v4239_v16, 3  ;;  %v1873_v16 = vrot.slane %v1871_v39, 2 }
 0x105   : > { %4560 = vmatprep.mubr.msk.bf16.mxu1 %vm548_vm2, %v1460_v54  ;;  %v1469_v54 = vrot.slane %v5525_v57, 1 }
 0x106   : > { %v3409_v58 = vsel %vm3406_vm7, %v3407_v48, %v3408_v24  ;;  %v3424_v48 = vrot.slane %v5663_v8, 3  ;;  %v1886_v24 = vshrl.u32 %v5543_v7, 16 }
 0x107   : > { %4725 = vmatmul.mubr.msk.bf16.gmra.mrb[24].mxu0 %vm548_vm2, %v3093_v30  ;;  %v1470_v34 = vsel %vm1006_vm5, %v1467_v61, %v1469_v54  ;;  %v1472_v49 = vsel %vm1006_vm5, %v1469_v54, %v1471_v56  ;;  %v1475_v30 = vrot.slane %v5547_v12, 1  ;;  %v1889_v54 = vshll.u32 %v5543_v7, 16 }
 0x108   : > { %4728 = vmatprep.mubr.msk.bf16.mxu0 %vm548_vm2, %v3102_v25  ;;  %v3415_v25 = vsel %vm3406_vm7, %v3412_v4, %v3414_v50 }
 0x109   : > { %v1476_v37 = vsel %vm1006_vm5, %v1473_v11, %v1475_v30  ;;  %v1478_v28 = vsel %vm1006_vm5, %v1475_v30, %v1477_v10  ;;  %v1891_v38 = vrot.slane %v1889_v54, 2  ;;  %v1904_v30 = vshrl.u32 %v5559_v22, 16 }
 0x10b   : > { %v1906_v10 = vrot.slane %v1904_v30, 1 }
 0x10c   : > { %4561 = vmatmul.mubr.msk.bf16.gmra.mrb[12].mxu1 %vm548_vm2, %v1462_v35  ;;  %v1862_v35 = vshll.u32 %v5506_v55, 16  ;;  %v1481_v55 = vrot.slane %v5145_v41, 1  ;;  %v1925_v41 = vshll.u32 %v5579_v59, 16 }
 0x10d   : > { %4564 = vmatprep.mubr.msk.bf16.mxu1 %vm548_vm2, %v1464_v2  ;;  %v3418_v2 = vrot.slane %v5640_v3, 3  ;;  %v1877_v3 = vshrl.u32 %v5531_v60, 16 }
 0x10e   : > { %v1864_v20 = vrot.slane %v1862_v35, 2  ;;  %v1482_v1 = vsel %vm1006_vm5, %v1479_v45, %v1481_v55  ;;  %v3430_v45 = vrot.slane %v5696_v5, 3 }
 0x10f   : > { %4729 = vmatmul.mubr.msk.bf16.gmra.mrb[28].mxu0 %vm548_vm2, %v3111_v29  ;;  %v3419_v29 = vsel %vm3406_vm7, %v3416_v18, %v3418_v2  ;;  %v3421_v61 = vsel %vm3406_vm7, %v3418_v2, %v3420_v44  ;;  %v1879_v9 = vrot.slane %v1877_v3, 1  ;;  %v3440_v3 = vrot.slane %v5740_v14, 3 }
 0x110   : > { %4732 = vmatprep.mubr.msk.bf16.mxu0 %vm548_vm2, %v3120_v51  ;;  %v1865_v19 = vor.u32 %v1864_v20, %v1861_v32  ;;  %v1870_v51 = vrot.slane %v1868_v40, 1  ;;  %v3436_v40 = vrot.slane %v5723_v43, 3 }
 0x112   : > { %v1866_v57 = vsel %vm1759_vm3, %v5420_v15, %v1865_v19  ;;  %v1874_v60 = vor.u32 %v1873_v16, %v1870_v51  ;;  %v1898_v15 = vshll.u32 %v5547_v12, 16 }
 0x114   : > { %4565 = vmatmul.mubr.msk.bf16.gmra.mrb[16].mxu1 %vm548_vm2, %v1466_v63  ;;  %v3422_v63 = vrot.slane %v5658_v13, 3  ;;  %v1895_v13 = vshrl.u32 %v5547_v12, 16  ;;  %v1875_v8 = vsel %vm1759_vm3, %v1865_v19, %v1874_v60  ;;  %v1900_v11 = vrot.slane %v1898_v15, 2 }
 0x115   : > { %4568 = vmatprep.mubr.msk.bf16.mxu1 %vm548_vm2, %v1468_v17  ;;  %v1882_v17 = vrot.slane %v1880_v33, 2 }
 0x116   : > { %v1897_v4 = vrot.slane %v1895_v13, 1 }
 0x117   : > { %4733 = vmatmul.mubr.msk.bf16.gmra.mrb[32].mxu0 %vm548_vm2, %v3129_v31  ;;  %v3423_v31 = vsel %vm3406_vm7, %v3420_v44, %v3422_v63  ;;  %v1883_v56 = vor.u32 %v1882_v17, %v1879_v9  ;;  %v3434_v44 = vrot.slane %v5718_v36, 3  ;;  %v3438_v36 = vrot.slane %v5736_v62, 3 }
 0x118   : > { %4738 = vmatprep.mubr.msk.bf16.mxu0 %vm548_vm2, %v3409_v58  ;;  %v3425_v58 = vsel %vm3406_vm7, %v3422_v63, %v3424_v48  ;;  %v1901_v50 = vor.u32 %v1900_v11, %v1897_v4  ;;  %v3759_v11 = vld [vmem:[%s6039_s24 + $0x10] sm:$0xff] }
 0x119   : > { %v1884_v7 = vsel %vm1759_vm3, %v1874_v60, %v1883_v56  ;;  %v3439_v43 = vsel %vm3406_vm7, %v3436_v40, %v3438_v36  ;;  %v3441_v33 = vsel %vm3406_vm7, %v3438_v36, %v3440_v3 }
 0x11c   : > { %4569 = vmatmul.mubr.msk.bf16.gmra.mrb[20].mxu1 %vm548_vm2, %v1470_v34  ;;  %v1888_v34 = vrot.slane %v1886_v24, 1 }
 0x11d   : > { %4572 = vmatprep.mubr.msk.bf16.mxu1 %vm548_vm2, %v1472_v49  ;;  %v3426_v49 = vrot.slane %v5676_v47, 3  ;;  %v1913_v47 = vshrl.u32 %v5563_v26, 16 }
 0x11e   : > { %v1892_v12 = vor.u32 %v1891_v38, %v1888_v34 }
 0x11f   : > { %4739 = vmatmul.mubr.msk.bf16.vlgmr.msra.gmra.mrb[0].mxu0 %vm548_vm2, %v3411_v6  ;;  %v3428_v6 = vrot.slane %v5681_v52, 3  ;;  %v1915_v23 = vrot.slane %v1913_v47, 1  ;;  %v3831_v47 = vld [vmem:[%s6049_s29 + $0x10] sm:$0xff] }
 0x120   : > { %4742 = vmatprep.mubr.msk.bf16.mxu0 %vm548_vm2, %v3413_v42  ;;  %v1907_v42 = vshll.u32 %v5559_v22, 16  ;;  %v1893_v52 = vsel %vm1759_vm3, %v1883_v56, %v1892_v12  ;;  %v1902_v22 = vsel %vm1759_vm3, %v1892_v12, %v1901_v50 }
 0x121   : > { %v3429_v18 = vsel %vm3406_vm7, %v3426_v49, %v3428_v6  ;;  %v3431_v2 = vsel %vm3406_vm7, %v3428_v6, %v3430_v45 }
 0x124   : > { %4573 = vmatmul.mubr.msk.bf16.gmra.mrb[24].mxu1 %vm548_vm2, %v1474_v46  ;;  %v3427_v46 = vsel %vm3406_vm7, %v3424_v48, %v3426_v49  ;;  %v6044_v49 = vld [vmem:[%s6254_s2] ss:$0 sm:$0xff] }
 0x125   : > { %4576 = vmatprep.mubr.msk.bf16.mxu1 %vm548_vm2, %v1476_v37  ;;  %v1916_v37 = vshll.u32 %v5563_v26, 16 }
 0x127   : > { %4743 = vmatmul.mubr.msk.bf16.gmra.mrb[4].mxu0 %vm548_vm2, %v3415_v25  ;;  %v1909_v25 = vrot.slane %v1907_v42, 2  ;;  %v1918_v35 = vrot.slane %v1916_v37, 2  ;;  %v3757_v42 = vld [vmem:[%s6039_s24] sm:$0xff] }
 0x128   : > { %4746 = vmatprep.mubr.msk.bf16.mxu0 %vm548_vm2, %v3417_v53  ;;  %v3432_v53 = vrot.slane %v5705_v21, 3  ;;  %v1927_v21 = vrot.slane %v1925_v41, 2  ;;  %v3830_v41 = vld [vmem:[%s6049_s29 + $0x8] sm:$0xff] }
 0x129   : > { %v1910_v26 = vor.u32 %v1909_v25, %v1906_v10  ;;  %v3829_v25 = vld [vmem:[%s6049_s29] sm:$0xff] }
 0x12a   : > { %v3433_v5 = vsel %vm3406_vm7, %v3430_v45, %v3432_v53  ;;  %v3435_v39 = vsel %vm3406_vm7, %v3432_v53, %v3434_v44 }
 0x12b   : > { %v1911_v32 = vsel %vm1759_vm3, %v1901_v50, %v1910_v26 }
 0x12c   : > { %4577 = vmatmul.mubr.msk.bf16.gmra.mrb[28].mxu1 %vm548_vm2, %v1478_v28  ;;  %v1922_v28 = vshrl.u32 %v5579_v59, 16 }
 0x12d   : > { %4580 = vmatprep.mubr.msk.bf16.mxu1 %vm548_vm2, %v1480_v27  ;;  %v1919_v27 = vor.u32 %v1918_v35, %v1915_v23  ;;  %v3832_v35 = vld [vmem:[%s6049_s29 + $0x18] sm:$0xff] }
 0x12e   : > { %v1924_v20 = vrot.slane %v1922_v28, 1 }
 0x12f   : > { %4747 = vmatmul.mubr.msk.bf16.gmra.mrb[8].mxu0 %vm548_vm2, %v3419_v29  ;;  %v1920_v55 = vsel %vm1759_vm3, %v1910_v26, %v1919_v27  ;;  %v3437_v29 = vsel %vm3406_vm7, %v3434_v44, %v3436_v40 }
 0x130   : > { %4750 = vmatprep.mubr.msk.bf16.mxu0 %vm548_vm2, %v3421_v61  ;;  %v1928_v59 = vor.u32 %v1927_v21, %v1924_v20  ;;  %v3442_v61 = vrot.slane %v5876_v0, 3 }
 0x132   : > { %v1929_v19 = vsel %vm1759_vm3, %v1919_v27, %v1928_v59 }
 0x134   : > { %4581 = vmatmul.mubr.msk.bf16.gmra.mrb[32].mxu1 %vm548_vm2, %v1482_v1  ;;  %v3443_v1 = vsel %vm3406_vm7, %v3440_v3, %v3442_v61  ;;  %v3835_v3 = vld [vmem:[%s6049_s29 + $0x30] sm:$0xff] }
 0x135   : > { %4606 = vmatprep.mubr.msk.bf16.mxu1 %vm548_vm2, %v1866_v57 }
 0x137   : > { %4751 = vmatmul.mubr.msk.bf16.gmra.mrb[12].mxu0 %vm548_vm2, %v3423_v31 }
 0x138   : > { %4754 = vmatprep.mubr.msk.bf16.mxu0 %vm548_vm2, %v3425_v58 }
 0x13c   : > { %4607 = vmatmul.mubr.msk.bf16.vlgmr.msra.gmra.mrb[20].mxu1 %vm548_vm2, %v1875_v8 }
 0x13d   : > { %4610 = vmatprep.mubr.msk.bf16.mxu1 %vm548_vm2, %v1884_v7 }
 0x13f   : > { %4755 = vmatmul.mubr.msk.bf16.gmra.mrb[16].mxu0 %vm548_vm2, %v3427_v46 }
 0x140   : > { %4758 = vmatprep.mubr.msk.bf16.mxu0 %vm548_vm2, %v3429_v18  ;;  %v3760_v18 = vld [vmem:[%s6039_s24 + $0x18] sm:$0xff] }
 0x144   : > { %4611 = vmatmul.mubr.msk.bf16.gmra.mrb[24].mxu1 %vm548_vm2, %v1893_v52 }
 0x145   : > { %4614 = vmatprep.mubr.msk.bf16.mxu1 %vm548_vm2, %v1902_v22  ;;  %v3758_v22 = vld [vmem:[%s6039_s24 + $0x8] sm:$0xff] }
 0x147   : > { %4759 = vmatmul.mubr.msk.bf16.gmra.mrb[20].mxu0 %vm548_vm2, %v3431_v2 }
 0x148   : > { %4762 = vmatprep.mubr.msk.bf16.mxu0 %vm548_vm2, %v3433_v5 }
 0x14c   : > { %4615 = vmatmul.mubr.msk.bf16.gmra.mrb[28].mxu1 %vm548_vm2, %v1911_v32 }
 0x14d   : > { %4618 = vmatprep.mubr.msk.bf16.mxu1 %vm548_vm2, %v1920_v55  ;;  %v3763_v55 = vld [vmem:[%s6039_s24 + $0x30] sm:$0xff] }
 0x14f   : > { %4763 = vmatmul.mubr.msk.bf16.gmra.mrb[24].mxu0 %vm548_vm2, %v3435_v39 }
 0x150   : > { %4766 = vmatprep.mubr.msk.bf16.mxu0 %vm548_vm2, %v3437_v29  ;;  %v3761_v29 = vld [vmem:[%s6039_s24 + $0x20] sm:$0xff] }
 0x154   : > { %4619 = vmatmul.mubr.msk.bf16.gmra.mrb[32].mxu1 %vm548_vm2, %v1929_v19 }
 0x157   : > { %4767 = vmatmul.mubr.msk.bf16.gmra.mrb[28].mxu0 %vm548_vm2, %v3439_v43 }
 0x158   : > { %4770 = vmatprep.mubr.msk.bf16.mxu0 %vm548_vm2, %v3441_v33  ;;  %v3764_v33 = vld [vmem:[%s6039_s24 + $0x38] sm:$0xff] }
 0x15f   : > { %4771 = vmatmul.mubr.msk.bf16.gmra.mrb[32].mxu0 %vm548_vm2, %v3443_v1 }
 0x1c7   : > { %v4550_v51 = vpop.f32.mrb[0].mxu1 }
 0x1c8   : > { %v1574_v62 = vpop.f32.mrb[1].mxu1 }
 0x1c9   : > { %v4551_v16 = vpop.f32.mrb[2].mxu1 }
 0x1ca   : > { %v1577_v14 = vpop.f32.mrb[3].mxu1 }
 0x1cf   : > { %v4554_v63 = vpop.f32.mrb[4].mxu1 }
 0x1d0   : > { %v1590_v57 = vpop.f32.mrb[5].mxu1 }
 0x1d1   : > { %v4555_v9 = vpop.f32.mrb[6].mxu1 }
 0x1d2   : > { %v6009_v17 = vpop.f32.mrb[7].mxu1 }
 0x1d7   : > { %v6011_v48 = vpop.f32.mrb[8].mxu1 }
 0x1d8   : > { %v6013_v60 = vpop.f32.mrb[9].mxu1 }
 0x1d9   : > { %v6015_v24 = vpop.f32.mrb[10].mxu1 }
 0x1da   : > { %v6017_v0 = vpop.f32.mrb[11].mxu1 }
 0x1df   : > { %v6019_v54 = vpop.f32.mrb[12].mxu1 }
 0x1e0   : > { %v6021_v31 = vpop.f32.mrb[13].mxu1 }
 0x1e1   : > { %v6023_v56 = vpop.f32.mrb[14].mxu1 }
 0x1e2   : > { %v6025_v13 = vpop.f32.mrb[15].mxu1 }
 0x1e7   : > { %v6027_v15 = vpop.f32.mrb[16].mxu1 }
 0x1e8   : > { %v6029_v58 = vpop.f32.mrb[17].mxu1 }
 0x1e9   : > { %v6031_v8 = vpop.f32.mrb[18].mxu1 }
 0x1ea   : > { %v6033_v34 = vpop.f32.mrb[19].mxu1 }
 0x1f2   : > { %v4740_v38 = vpop.f32.mrb[0].mxu0 }
 0x1f3   : > { %v4776_v7 = vadd.f32 %v4740_v38, %v4550_v51  ;;  %v3535_v4 = vpop.f32.mrb[1].mxu0  ;;  %v3833_v51 = vld [vmem:[%s6049_s29 + $0x20] sm:$0xff] }
 0x1f4   : > { %v4777_v6 = vadd.f32 %v3535_v4, %v1574_v62  ;;  %v4741_v12 = vpop.f32.mrb[2].mxu0 }
 0x1f5   : > { %v3723_v30 = vadd.f32 %v4776_v7, %v6044_v49  ;;  %v4778_v46 = vadd.f32 %v4741_v12, %v4551_v16  ;;  %v3538_v50 = vpop.f32.mrb[3].mxu0  ;;  %v3762_v16 = vld [vmem:[%s6039_s24 + $0x28] sm:$0xff] }
 0x1f6   : > { %v3721_v37 = vadd.f32 %v4777_v6, %v6044_v49  ;;  %v4779_v52 = vadd.f32 %v3538_v50, %v1577_v14  ;;  %v3834_v7 = vld [vmem:[%s6049_s29 + $0x28] sm:$0xff] }
 0x1f7   : > { %v3795_v10 = vadd.f32 %v3759_v11, %v3723_v30  ;;  %v3724_v45 = vadd.f32 %v4778_v46, %v6044_v49  ;;  %v3767_v46 = vld [vmem:[%s6039_s24 + $0x50] sm:$0xff] }
 0x1f8   : > { %v3793_v23 = vadd.f32 %v3757_v42, %v3721_v37  ;;  %v3722_v53 = vadd.f32 %v4779_v52, %v6044_v49 }
 0x1f9   : > { %v3867_v26 = vadd.f32 %v3831_v47, %v3795_v10  ;;  %v3796_v28 = vadd.f32 %v3760_v18, %v3724_v45  ;;  %v3765_v18 = vld [vmem:[%s6039_s24 + $0x40] sm:$0xff]  ;;  %v3839_v10 = vld [vmem:[%s6049_s29 + $0x50] sm:$0xff]  ;;  %v3768_v45 = vld [vmem:[%s6039_s24 + $0x58] sm:$0xff] }
 0x1fa   : > { %v3865_v2 = vadd.f32 %v3829_v25, %v3793_v23  ;;  %v3794_v27 = vadd.f32 %v3758_v22, %v3722_v53  ;;  %v4744_v5 = vpop.f32.mrb[4].mxu0  ;;  %v3837_v23 = vld [vmem:[%s6049_s29 + $0x40] sm:$0xff]  ;;  %v3766_v53 = vld [vmem:[%s6039_s24 + $0x48] sm:$0xff] }
 0x1fb   : > { %3904 = vst.msk [vmem:[%s6063_s6 + $0x10] sm:$0xff] %vm3901_vm8, %v3867_v26  ;;  %v3868_v32 = vadd.f32 %v3832_v35, %v3796_v28  ;;  %v4780_v20 = vadd.f32 %v4744_v5, %v4554_v63  ;;  %v3551_v21 = vpop.f32.mrb[5].mxu0  ;;  %v3836_v63 = vld [vmem:[%s6049_s29 + $0x38] sm:$0xff] }
 0x1fc   : > { %3902 = vst.msk [vmem:[%s6063_s6] sm:$0xff] %vm3901_vm8, %v3865_v2  ;;  %v3866_v44 = vadd.f32 %v3830_v41, %v3794_v27  ;;  %v4781_v40 = vadd.f32 %v3551_v21, %v1590_v57  ;;  %v4745_v59 = vpop.f32.mrb[6].mxu0  ;;  %v3838_v27 = vld [vmem:[%s6049_s29 + $0x48] sm:$0xff] }
 0x1fd   : > { %3905 = vst.msk [vmem:[%s6063_s6 + $0x18] sm:$0xff] %vm3901_vm8, %v3868_v32  ;;  %v3727_v39 = vadd.f32 %v4780_v20, %v6044_v49  ;;  %v4782_v19 = vadd.f32 %v4745_v59, %v4555_v9  ;;  %v3554_v36 = vpop.f32.mrb[7].mxu0 }
 0x1fe   : > { %3903 = vst.msk [vmem:[%s6063_s6 + $0x8] sm:$0xff] %vm3901_vm8, %v3866_v44  ;;  %v3725_v43 = vadd.f32 %v4781_v40, %v6044_v49  ;;  %v4783_v61 = vadd.f32 %v3554_v36, %v6009_v17  ;;  %v3771_v40 = vld [vmem:[%s6039_s24 + $0x70] sm:$0xff] }
 0x1ff   : > { %v3799_v1 = vadd.f32 %v3763_v55, %v3727_v39  ;;  %v3728_v62 = vadd.f32 %v4782_v19, %v6044_v49  ;;  %v3769_v19 = vld [vmem:[%s6039_s24 + $0x60] sm:$0xff] }
 0x200   : > { %v3797_v14 = vadd.f32 %v3761_v29, %v3725_v43  ;;  %v3726_v57 = vadd.f32 %v4783_v61, %v6044_v49  ;;  %v3843_v43 = vld [vmem:[%s6049_s29 + $0x70] sm:$0xff]  ;;  %v3772_v61 = vld [vmem:[%s6039_s24 + $0x78] sm:$0xff] }
 0x201   : > { %v3871_v9 = vadd.f32 %v3835_v3, %v3799_v1  ;;  %v3800_v38 = vadd.f32 %v3764_v33, %v3728_v62  ;;  %v3841_v62 = vld [vmem:[%s6049_s29 + $0x60] sm:$0xff] }
 0x202   : > { %v3869_v4 = vadd.f32 %v3833_v51, %v3797_v14  ;;  %v3798_v11 = vadd.f32 %v3762_v16, %v3726_v57  ;;  %v4748_v17 = vpop.f32.mrb[8].mxu0  ;;  %v3770_v14 = vld [vmem:[%s6039_s24 + $0x68] sm:$0xff]  ;;  %v3844_v57 = vld [vmem:[%s6049_s29 + $0x78] sm:$0xff] }
 0x203   : > { %3908 = vst.msk [vmem:[%s6063_s6 + $0x30] sm:$0xff] %vm3901_vm8, %v3871_v9  ;;  %v3872_v6 = vadd.f32 %v3836_v63, %v3800_v38  ;;  %v4784_v12 = vadd.f32 %v4748_v17, %v6011_v48  ;;  %v3567_v30 = vpop.f32.mrb[9].mxu0 }
 0x204   : > { %3906 = vst.msk [vmem:[%s6063_s6 + $0x20] sm:$0xff] %vm3901_vm8, %v3869_v4  ;;  %v3870_v42 = vadd.f32 %v3834_v7, %v3798_v11  ;;  %v4785_v50 = vadd.f32 %v3567_v30, %v6013_v60  ;;  %v4749_v47 = vpop.f32.mrb[10].mxu0 }
 0x205   : > { %3909 = vst.msk [vmem:[%s6063_s6 + $0x38] sm:$0xff] %vm3901_vm8, %v3872_v6  ;;  %v3731_v37 = vadd.f32 %v4784_v12, %v6044_v49  ;;  %v4786_v52 = vadd.f32 %v4749_v47, %v6015_v24  ;;  %v3570_v48 = vpop.f32.mrb[11].mxu0  ;;  %v3840_v24 = vld [vmem:[%s6049_s29 + $0x58] sm:$0xff] }
 0x206   : > { %3907 = vst.msk [vmem:[%s6063_s6 + $0x28] sm:$0xff] %vm3901_vm8, %v3870_v42  ;;  %v3729_v25 = vadd.f32 %v4785_v50, %v6044_v49  ;;  %v4787_v60 = vadd.f32 %v3570_v48, %v6017_v0  ;;  %v3775_v50 = vld [vmem:[%s6039_s24 + $0x90] sm:$0xff] }
 0x207   : > { %v3803_v22 = vadd.f32 %v3767_v46, %v3731_v37  ;;  %v3732_v35 = vadd.f32 %v4786_v52, %v6044_v49  ;;  %v3773_v52 = vld [vmem:[%s6039_s24 + $0x80] sm:$0xff] }
 0x208   : > { %v3801_v26 = vadd.f32 %v3765_v18, %v3729_v25  ;;  %v3730_v28 = vadd.f32 %v4787_v60, %v6044_v49  ;;  %v3847_v25 = vld [vmem:[%s6049_s29 + $0x90] sm:$0xff]  ;;  %v3776_v60 = vld [vmem:[%s6039_s24 + $0x98] sm:$0xff] }
 0x209   : > { %v3875_v41 = vadd.f32 %v3839_v10, %v3803_v22  ;;  %v3804_v2 = vadd.f32 %v3768_v45, %v3732_v35  ;;  %v3845_v35 = vld [vmem:[%s6049_s29 + $0x80] sm:$0xff] }
 0x20a   : > { %v3873_v5 = vadd.f32 %v3837_v23, %v3801_v26  ;;  %v3802_v32 = vadd.f32 %v3766_v53, %v3730_v28  ;;  %v4752_v20 = vpop.f32.mrb[12].mxu0  ;;  %v3774_v26 = vld [vmem:[%s6039_s24 + $0x88] sm:$0xff]  ;;  %v3848_v28 = vld [vmem:[%s6049_s29 + $0x98] sm:$0xff] }
 0x20b   : > { %3912 = vst.msk [vmem:[%s6063_s6 + $0x50] sm:$0xff] %vm3901_vm8, %v3875_v41  ;;  %v3876_v0 = vadd.f32 %v3840_v24, %v3804_v2  ;;  %v4788_v21 = vadd.f32 %v4752_v20, %v6019_v54  ;;  %v3583_v44 = vpop.f32.mrb[13].mxu0 }
 0x20c   : > { %3910 = vst.msk [vmem:[%s6063_s6 + $0x40] sm:$0xff] %vm3901_vm8, %v3873_v5  ;;  %v3874_v55 = vadd.f32 %v3838_v27, %v3802_v32  ;;  %v4789_v59 = vadd.f32 %v3583_v44, %v6021_v31  ;;  %v4753_v39 = vpop.f32.mrb[14].mxu0 }
 0x20d   : > { %3913 = vst.msk [vmem:[%s6063_s6 + $0x58] sm:$0xff] %vm3901_vm8, %v3876_v0  ;;  %v3735_v29 = vadd.f32 %v4788_v21, %v6044_v49  ;;  %v4790_v36 = vadd.f32 %v4753_v39, %v6023_v56  ;;  %v3586_v54 = vpop.f32.mrb[15].mxu0 }
 0x20e   : > { %3911 = vst.msk [vmem:[%s6063_s6 + $0x48] sm:$0xff] %vm3901_vm8, %v3874_v55  ;;  %v3733_v33 = vadd.f32 %v4789_v59, %v6044_v49  ;;  %v4791_v31 = vadd.f32 %v3586_v54, %v6025_v13  ;;  %v3842_v13 = vld [vmem:[%s6049_s29 + $0x68] sm:$0xff]  ;;  %v3779_v59 = vld [vmem:[%s6039_s24 + $0xb0] sm:$0xff] }
 0x20f   : > { %v4608_v3 = vpop.f32.mrb[20].mxu1  ;;  %v3807_v51 = vadd.f32 %v3771_v40, %v3735_v29  ;;  %v3736_v16 = vadd.f32 %v4790_v36, %v6044_v49  ;;  %v3777_v36 = vld [vmem:[%s6039_s24 + $0xa0] sm:$0xff] }
 0x210   : > { %v2101_v1 = vpop.f32.mrb[21].mxu1  ;;  %v3805_v63 = vadd.f32 %v3769_v19, %v3733_v33  ;;  %v3734_v9 = vadd.f32 %v4791_v31, %v6044_v49  ;;  %v3780_v31 = vld [vmem:[%s6039_s24 + $0xb8] sm:$0xff] }
 0x211   : > { %v4609_v56 = vpop.f32.mrb[22].mxu1  ;;  %v3879_v7 = vadd.f32 %v3843_v43, %v3807_v51  ;;  %v3808_v4 = vadd.f32 %v3772_v61, %v3736_v16  ;;  %v3849_v16 = vld [vmem:[%s6049_s29 + $0xa0] sm:$0xff] }
 0x212   : > { %v2104_v38 = vpop.f32.mrb[23].mxu1  ;;  %v3877_v11 = vadd.f32 %v3841_v62, %v3805_v63  ;;  %v3806_v17 = vadd.f32 %v3770_v14, %v3734_v9  ;;  %v4756_v6 = vpop.f32.mrb[16].mxu0  ;;  %v3778_v63 = vld [vmem:[%s6039_s24 + $0xa8] sm:$0xff]  ;;  %v3852_v9 = vld [vmem:[%s6049_s29 + $0xb8] sm:$0xff] }
 0x213   : > { %3916 = vst.msk [vmem:[%s6063_s6 + $0x70] sm:$0xff] %vm3901_vm8, %v3879_v7  ;;  %v3880_v12 = vadd.f32 %v3844_v57, %v3808_v4  ;;  %v4792_v30 = vadd.f32 %v4756_v6, %v6027_v15  ;;  %v3599_v42 = vpop.f32.mrb[17].mxu0 }
 0x214   : > { %3914 = vst.msk [vmem:[%s6063_s6 + $0x60] sm:$0xff] %vm3901_vm8, %v3877_v11  ;;  %v3878_v46 = vadd.f32 %v3842_v13, %v3806_v17  ;;  %v4793_v47 = vadd.f32 %v3599_v42, %v6029_v58  ;;  %v4757_v37 = vpop.f32.mrb[18].mxu0 }
 0x215   : > { %3917 = vst.msk [vmem:[%s6063_s6 + $0x78] sm:$0xff] %vm3901_vm8, %v3880_v12  ;;  %v3739_v18 = vadd.f32 %v4792_v30, %v6044_v49  ;;  %v4794_v48 = vadd.f32 %v4757_v37, %v6031_v8  ;;  %v3602_v15 = vpop.f32.mrb[19].mxu0 }
 0x216   : > { %3915 = vst.msk [vmem:[%s6063_s6 + $0x68] sm:$0xff] %vm3901_vm8, %v3878_v46  ;;  %v3737_v45 = vadd.f32 %v4793_v47, %v6044_v49  ;;  %v4795_v58 = vadd.f32 %v3602_v15, %v6033_v34  ;;  %v3846_v34 = vld [vmem:[%s6049_s29 + $0x88] sm:$0xff]  ;;  %v3783_v47 = vld [vmem:[%s6039_s24 + $0xd0] sm:$0xff] }
 0x217   : > { %v4612_v10 = vpop.f32.mrb[24].mxu1  ;;  %v3811_v23 = vadd.f32 %v3775_v50, %v3739_v18  ;;  %v3740_v53 = vadd.f32 %v4794_v48, %v6044_v49  ;;  %v3781_v48 = vld [vmem:[%s6039_s24 + $0xc0] sm:$0xff] }
 0x218   : > { %v2117_v22 = vpop.f32.mrb[25].mxu1  ;;  %v3809_v24 = vadd.f32 %v3773_v52, %v3737_v45  ;;  %v3738_v41 = vadd.f32 %v4795_v58, %v6044_v49  ;;  %v3784_v58 = vld [vmem:[%s6039_s24 + $0xd8] sm:$0xff] }
 0x219   : > { %v4613_v8 = vpop.f32.mrb[26].mxu1  ;;  %v3883_v27 = vadd.f32 %v3847_v25, %v3811_v23  ;;  %v3812_v5 = vadd.f32 %v3776_v60, %v3740_v53  ;;  %v3853_v53 = vld [vmem:[%s6049_s29 + $0xc0] sm:$0xff] }
 0x21a   : > { %v2120_v2 = vpop.f32.mrb[27].mxu1  ;;  %v3881_v32 = vadd.f32 %v3845_v35, %v3809_v24  ;;  %v3810_v20 = vadd.f32 %v3774_v26, %v3738_v41  ;;  %v4760_v0 = vpop.f32.mrb[20].mxu0  ;;  %v3782_v24 = vld [vmem:[%s6039_s24 + $0xc8] sm:$0xff]  ;;  %v3856_v41 = vld [vmem:[%s6049_s29 + $0xd8] sm:$0xff] }
 0x21b   : > { %3920 = vst.msk [vmem:[%s6063_s6 + $0x90] sm:$0xff] %vm3901_vm8, %v3883_v27  ;;  %v3884_v21 = vadd.f32 %v3848_v28, %v3812_v5  ;;  %v4796_v44 = vadd.f32 %v4760_v0, %v4608_v3  ;;  %v3615_v55 = vpop.f32.mrb[21].mxu0  ;;  %v3851_v3 = vld [vmem:[%s6049_s29 + $0xb0] sm:$0xff] }
 0x21c   : > { %3918 = vst.msk [vmem:[%s6063_s6 + $0x80] sm:$0xff] %vm3901_vm8, %v3881_v32  ;;  %v3882_v40 = vadd.f32 %v3846_v34, %v3810_v20  ;;  %v4797_v39 = vadd.f32 %v3615_v55, %v2101_v1  ;;  %v4761_v29 = vpop.f32.mrb[22].mxu0 }
 0x21d   : > { %3921 = vst.msk [vmem:[%s6063_s6 + $0x98] sm:$0xff] %vm3901_vm8, %v3884_v21  ;;  %v3743_v19 = vadd.f32 %v4796_v44, %v6044_v49  ;;  %v4798_v54 = vadd.f32 %v4761_v29, %v4609_v56  ;;  %v3618_v43 = vpop.f32.mrb[23].mxu0 }
 0x21e   : > { %3919 = vst.msk [vmem:[%s6063_s6 + $0x88] sm:$0xff] %vm3901_vm8, %v3882_v40  ;;  %v3741_v61 = vadd.f32 %v4797_v39, %v6044_v49  ;;  %v4799_v51 = vadd.f32 %v3618_v43, %v2104_v38  ;;  %v3850_v38 = vld [vmem:[%s6049_s29 + $0xa8] sm:$0xff]  ;;  %v3787_v39 = vld [vmem:[%s6039_s24 + $0xf0] sm:$0xff] }
 0x21f   : > { %v4616_v33 = vpop.f32.mrb[28].mxu1  ;;  %v3815_v62 = vadd.f32 %v3779_v59, %v3743_v19  ;;  %v3744_v14 = vadd.f32 %v4798_v54, %v6044_v49  ;;  %v3785_v54 = vld [vmem:[%s6039_s24 + $0xe0] sm:$0xff] }
 0x220   : > { %v2133_v1 = vpop.f32.mrb[29].mxu1  ;;  %v3813_v56 = vadd.f32 %v3777_v36, %v3741_v61  ;;  %v3742_v7 = vadd.f32 %v4799_v51, %v6044_v49 }
 0x221   : > { %v4617_v57 = vpop.f32.mrb[30].mxu1  ;;  %v3887_v13 = vadd.f32 %v3851_v3, %v3815_v62  ;;  %v3816_v11 = vadd.f32 %v3780_v31, %v3744_v14  ;;  %v3788_v31 = vld [vmem:[%s6039_s24 + $0xf8] sm:$0xff]  ;;  %v3786_v14 = vld [vmem:[%s6039_s24 + $0xe8] sm:$0xff] }
 0x222   : > { %v2136_v4 = vpop.f32.mrb[31].mxu1  ;;  %v3885_v17 = vadd.f32 %v3849_v16, %v3813_v56  ;;  %v3814_v6 = vadd.f32 %v3778_v63, %v3742_v7  ;;  %v4764_v12 = vpop.f32.mrb[24].mxu0  ;;  %v3860_v56 = vld [vmem:[%s6049_s29 + $0xf8] sm:$0xff] }
 0x223   : > { %3924 = vst.msk [vmem:[%s6063_s6 + $0xb0] sm:$0xff] %vm3901_vm8, %v3887_v13  ;;  %v3888_v30 = vadd.f32 %v3852_v9, %v3816_v11  ;;  %v4800_v42 = vadd.f32 %v4764_v12, %v4612_v10  ;;  %v3631_v46 = vpop.f32.mrb[25].mxu0  ;;  %v3855_v10 = vld [vmem:[%s6049_s29 + $0xd0] sm:$0xff]  ;;  %v3858_v13 = vld [vmem:[%s6049_s29 + $0xe8] sm:$0xff] }
 0x224   : > { %3922 = vst.msk [vmem:[%s6063_s6 + $0xa0] sm:$0xff] %vm3901_vm8, %v3885_v17  ;;  %v3886_v50 = vadd.f32 %v3850_v38, %v3814_v6  ;;  %v4801_v37 = vadd.f32 %v3631_v46, %v2117_v22  ;;  %v4765_v18 = vpop.f32.mrb[26].mxu0 }
 0x225   : > { %3925 = vst.msk [vmem:[%s6063_s6 + $0xb8] sm:$0xff] %vm3901_vm8, %v3888_v30  ;;  %v3747_v52 = vadd.f32 %v4800_v42, %v6044_v49  ;;  %v4802_v15 = vadd.f32 %v4765_v18, %v4613_v8  ;;  %v3634_v25 = vpop.f32.mrb[27].mxu0  ;;  %v3791_v42 = vld [vmem:[%s6039_s24 + $0x110] sm:$0xff] }
 0x226   : > { %3923 = vst.msk [vmem:[%s6063_s6 + $0xa8] sm:$0xff] %vm3901_vm8, %v3886_v50  ;;  %v3745_v60 = vadd.f32 %v4801_v37, %v6044_v49  ;;  %v4803_v23 = vadd.f32 %v3634_v25, %v2120_v2  ;;  %v3854_v2 = vld [vmem:[%s6049_s29 + $0xc8] sm:$0xff]  ;;  %v3789_v37 = vld [vmem:[%s6039_s24 + $0x100] sm:$0xff]  ;;  %v3792_v25 = vld [vmem:[%s6039_s24 + $0x118] sm:$0xff] }
 0x227   : > { %v4620_v45 = vpop.f32.mrb[32].mxu1  ;;  %v3819_v35 = vadd.f32 %v3783_v47, %v3747_v52  ;;  %v3748_v26 = vadd.f32 %v4802_v15, %v6044_v49 }
 0x228   : > { %v2149_v22 = vpop.f32.mrb[33].mxu1  ;;  %v3817_v8 = vadd.f32 %v3781_v48, %v3745_v60  ;;  %v3746_v27 = vadd.f32 %v4803_v23, %v6044_v49  ;;  %v3863_v48 = vld [vmem:[%s6049_s29 + $0x110] sm:$0xff]  ;;  %v3861_v60 = vld [vmem:[%s6049_s29 + $0x100] sm:$0xff]  ;;  %v3790_v23 = vld [vmem:[%s6039_s24 + $0x108] sm:$0xff] }
 0x229   : > { %v4621_v28 = vpop.f32.mrb[34].mxu1  ;;  %v3891_v34 = vadd.f32 %v3855_v10, %v3819_v35  ;;  %v3820_v32 = vadd.f32 %v3784_v58, %v3748_v26  ;;  %v3864_v35 = vld [vmem:[%s6049_s29 + $0x118] sm:$0xff] }
 0x22a   : > { %v2152_v5 = vpop.f32.mrb[35].mxu1  ;;  %v3889_v20 = vadd.f32 %v3853_v53, %v3817_v8  ;;  %v3818_v0 = vadd.f32 %v3782_v24, %v3746_v27  ;;  %v4768_v21 = vpop.f32.mrb[28].mxu0 }
 0x22b   : > { %3928 = vst.msk [vmem:[%s6063_s6 + $0xd0] sm:$0xff] %vm3901_vm8, %v3891_v34  ;;  %v3892_v44 = vadd.f32 %v3856_v41, %v3820_v32  ;;  %v4804_v55 = vadd.f32 %v4768_v21, %v4616_v33  ;;  %v3647_v40 = vpop.f32.mrb[29].mxu0  ;;  %v3859_v33 = vld [vmem:[%s6049_s29 + $0xf0] sm:$0xff] }
 0x22c   : > { %3926 = vst.msk [vmem:[%s6063_s6 + $0xc0] sm:$0xff] %vm3901_vm8, %v3889_v20  ;;  %v3890_v59 = vadd.f32 %v3854_v2, %v3818_v0  ;;  %v4805_v29 = vadd.f32 %v3647_v40, %v2133_v1  ;;  %v4769_v19 = vpop.f32.mrb[30].mxu0  ;;  %v3857_v1 = vld [vmem:[%s6049_s29 + $0xe0] sm:$0xff] }
 0x22d   : > { %3929 = vst.msk [vmem:[%s6063_s6 + $0xd8] sm:$0xff] %vm3901_vm8, %v3892_v44  ;;  %v3751_v36 = vadd.f32 %v4804_v55, %v6044_v49  ;;  %v4806_v43 = vadd.f32 %v4769_v19, %v4617_v57  ;;  %v3650_v3 = vpop.f32.mrb[31].mxu0 }
 0x22e   : > { %3927 = vst.msk [vmem:[%s6063_s6 + $0xc8] sm:$0xff] %vm3901_vm8, %v3890_v59  ;;  %v3749_v61 = vadd.f32 %v4805_v29, %v6044_v49  ;;  %v4807_v51 = vadd.f32 %v3650_v3, %v2136_v4 }
 0x22f   : > { %v3823_v62 = vadd.f32 %v3787_v39, %v3751_v36  ;;  %v3752_v16 = vadd.f32 %v4806_v43, %v6044_v49 }
 0x230   : > { %v3821_v63 = vadd.f32 %v3785_v54, %v3749_v61  ;;  %v3750_v57 = vadd.f32 %v4807_v51, %v6044_v49 }
 0x231   : > { %v3895_v9 = vadd.f32 %v3859_v33, %v3823_v62  ;;  %v3824_v7 = vadd.f32 %v3788_v31, %v3752_v16 }
 0x232   : > { %v3893_v11 = vadd.f32 %v3857_v1, %v3821_v63  ;;  %v3822_v38 = vadd.f32 %v3786_v14, %v3750_v57  ;;  %v4772_v4 = vpop.f32.mrb[32].mxu0 }
 0x233   : > { %3932 = vst.msk [vmem:[%s6063_s6 + $0xf0] sm:$0xff] %vm3901_vm8, %v3895_v9  ;;  %v3896_v17 = vadd.f32 %v3860_v56, %v3824_v7  ;;  %v4808_v6 = vadd.f32 %v4772_v4, %v4620_v45  ;;  %v3663_v12 = vpop.f32.mrb[33].mxu0 }
 0x234   : > { %3930 = vst.msk [vmem:[%s6063_s6 + $0xe0] sm:$0xff] %vm3901_vm8, %v3893_v11  ;;  %v3894_v30 = vadd.f32 %v3858_v13, %v3822_v38  ;;  %v4809_v46 = vadd.f32 %v3663_v12, %v2149_v22  ;;  %v4773_v50 = vpop.f32.mrb[34].mxu0 }
 0x235   : > { %3933 = vst.msk [vmem:[%s6063_s6 + $0xf8] sm:$0xff] %vm3901_vm8, %v3896_v17  ;;  %v3755_v47 = vadd.f32 %v4808_v6, %v6044_v49  ;;  %v4810_v18 = vadd.f32 %v4773_v50, %v4621_v28  ;;  %v3666_v52 = vpop.f32.mrb[35].mxu0  ;;  %v3862_v28 = vld [vmem:[%s6049_s29 + $0x108] sm:$0xff] }
 0x236   : > { %3931 = vst.msk [vmem:[%s6063_s6 + $0xe8] sm:$0xff] %vm3901_vm8, %v3894_v30  ;;  %v3753_v15 = vadd.f32 %v4809_v46, %v6044_v49  ;;  %v4811_v45 = vadd.f32 %v3666_v52, %v2152_v5 }
 0x237   : > { %v3827_v10 = vadd.f32 %v3791_v42, %v3755_v47  ;;  %v3756_v58 = vadd.f32 %v4810_v18, %v6044_v49 }
 0x238   : > { %v3825_v22 = vadd.f32 %v3789_v37, %v3753_v15  ;;  %v3754_v53 = vadd.f32 %v4811_v45, %v6044_v49 }
 0x239   : > { %v3899_v26 = vadd.f32 %v3863_v48, %v3827_v10  ;;  %v3828_v24 = vadd.f32 %v3792_v25, %v3756_v58 }
 0x23a   : > { %v3897_v8 = vadd.f32 %v3861_v60, %v3825_v22  ;;  %v3826_v41 = vadd.f32 %v3790_v23, %v3754_v53 }
 0x23b   : > { %3936 = vst.msk [vmem:[%s6063_s6 + $0x110] sm:$0xff] %vm3901_vm8, %v3899_v26  ;;  %v3900_v27 = vadd.f32 %v3864_v35, %v3828_v24 }
 0x23c   : > { %3934 = vst.msk [vmem:[%s6063_s6 + $0x100] sm:$0xff] %vm3901_vm8, %v3897_v8  ;;  %v3898_v5 = vadd.f32 %v3862_v28, %v3826_v41 }
 0x23d   : > { %3937 = vst.msk [vmem:[%s6063_s6 + $0x118] sm:$0xff] %vm3901_vm8, %v3900_v27 }
 0x23e   : > { %3935 = vst.msk [vmem:[%s6063_s6 + $0x108] sm:$0xff] %vm3901_vm8, %v3898_v5 }
 0x23f PF: > { %s15_s18 = sadd.s32 1, %s5163_s18  }
 0x240   : > { %p12_p4 = scmp.ge.s32.totalorder %s15_s18, 4  }
 0x242   :  { %14 = sbr.rel (!%p12_p4) target bundleno = 1 (0x1), region = 84 }

</bundles_post_ra>
